<compile_context>
chip_gen: v7x
topology: tpu7x:2x2x1
jax: 0.10.0
libtpu: 0.0.40
codegen_flags: <defaults>
</compile_context>

<pallas_src>
import math
from functools import partial

import jax
import jax.numpy as jnp
from jax.experimental import pallas as pl
from jax.experimental.pallas import tpu as pltpu

EPS = 1e-5  # nn.LayerNorm default eps

# Sub-pixel decomposition of ConvTranspose2d(k=4, stride=2, pad=1):
# for output parity r, contributions come from (zpad row offset da, kernel row kr).
ROW_TAPS = {0: ((0, 3), (1, 1)), 1: ((1, 2), (2, 0))}
PHASES = ((0, 0), (0, 1), (1, 0), (1, 1))            # (r, c); phase index d = 2r + c


def _round_up(x, m):
    return (x + m - 1) // m * m


def _vmem():
    return pl.BlockSpec(memory_space=pltpu.MemorySpace.VMEM)


# ----------------------------------------------------------------------------
# Fused kernel: gate -> conv(3x3,s2)+ReLU -> deconv(4x4,s2, sub-pixel)+ReLU
#               -> (skip add) -> LayerNorm(C)
# Layout: spatial positions flattened on the sublane axis with fixed row stride
# G = Wo+2 (the zpad grid), channels on lanes, so every conv/deconv tap is a
# constant-offset slice; taps are K-concatenated into single MXU matmuls.
# Inputs:
#   pee/peo/poe/poo : (PH, C)    parity phases of the zero-padded input (bf16)
#   w1t             : (C, C*C)   Linear1 weight, transposed          (bf16)
#   w2t             : (C*C, C)   Linear2 weight, transposed          (bf16)
#   wct             : (C, 9*C)   conv taps, [co, (ky*3+kx)*C + ci]   (f32)
#   wtp             : (4, 4C, C) deconv taps grouped per output phase (bf16)
#   gb              : (2, C)     LayerNorm gamma / beta               (f32)
# Output:
#   o               : (S_dec, 4*C) the 4 sub-pixel phases, post skip+LN (f32)
# Scratch:
#   z_ref           : (S_z, C)   zero-padded conv output on the G grid (f32)
# ----------------------------------------------------------------------------
def fused_adapter_kernel(pee_ref, peo_ref, poe_ref, poo_ref,
                         w1t_ref, w2t_ref, wct_ref, wtp_ref, gb_ref,
                         o_ref, z_ref, *, hw, G, F, S_z, S_dec, Ho, Wo, skip):
    C = gb_ref.shape[1]
    f32, bf16 = jnp.float32, jnp.bfloat16
    phase_refs = {(0, 0): pee_ref, (0, 1): peo_ref, (1, 0): poe_ref, (1, 1): poo_ref}

    # ---- channel attention gate: AdaptiveAvgPool -> Linear -> ReLU -> Linear -> Sigmoid.
    # The 4 parity phases partition the zero-padded input, so their sum == sum(x).
    pooled = (jnp.sum(pee_ref[...], axis=0, keepdims=True, dtype=f32)
              + jnp.sum(peo_ref[...], axis=0, keepdims=True, dtype=f32)
              + jnp.sum(poe_ref[...], axis=0, keepdims=True, dtype=f32)
              + jnp.sum(poo_ref[...], axis=0, keepdims=True, dtype=f32)) * (1.0 / float(hw))
    h = jnp.maximum(jnp.dot(pooled.astype(bf16), w1t_ref[...],
                            preferred_element_type=f32), 0.0)                  # (1, C*C)
    g = jax.nn.sigmoid(jnp.dot(h.astype(bf16), w2t_ref[...],
                               preferred_element_type=f32))                    # (1, C)

    # ---- Conv2d(3x3, stride=2, pad=1, no bias) with the gate folded into the weights.
    # wct is (C_out, 9*C_in), so scaling the contracted ci columns by g is a lane
    # broadcast; the 9 shifted slabs are lane-concatenated and contracted in ONE matmul.
    g9 = jnp.concatenate([g] * 9, axis=1)                                      # (1, 9C)
    wc_g = (wct_ref[...] * g9).astype(bf16)                                    # (C, 9C)
    lhs_parts = []
    for ky in range(3):
        for kx in range(3):
            ph = phase_refs[(ky % 2, kx % 2)]
            start = F + (ky // 2 - 1) * G + (kx // 2 - 1)
            lhs_parts.append(ph[start:start + S_z, :])                         # bf16 (S_z, C)
    lhs = jnp.concatenate(lhs_parts, axis=1)                                   # (S_z, 9C)
    acc = jax.lax.dot_general(lhs, wc_g, (((1,), (1,)), ((), ())),
                              preferred_element_type=f32)                      # (S_z, C)

    # ReLU, then zero the non-interior rows of the zpad grid (in-kernel iota mask;
    # float div/floor is exact for these small integer ranges).
    q = jax.lax.broadcasted_iota(jnp.int32, (S_z, 1), 0).astype(f32)
    row = jnp.floor(q / float(G))
    col = q - row * float(G)
    interior = ((row >= 1.0) & (row <= float(Ho)) &
                (col >= 1.0) & (col <= float(Wo))).astype(f32)                 # (S_z, 1)
    z_ref[...] = jnp.maximum(acc, 0.0) * interior

    # ---- ConvTranspose2d(4x4, stride=2, pad=1) via 4 sub-pixel output phases,
    # each one K=4C matmul over concatenated z shifts, fused with ReLU + skip + LN.
    zsh = {}
    for da in range(3):
        for db in range(3):
            off = da * G + db
            zsh[(da, db)] = z_ref[off:off + S_dec, :].astype(bf16)             # cast once, reuse
    gamma = gb_ref[0:1, :]
    beta = gb_ref[1:2, :]
    outs = []
    for d, (r, c) in enumerate(PHASES):
        lhs_d = jnp.concatenate(
            [zsh[(da, db)] for (da, _) in ROW_TAPS[r] for (db, _) in ROW_TAPS[c]],
            axis=1)                                                            # (S_dec, 4C)
        y = jnp.dot(lhs_d, wtp_ref[d], preferred_element_type=f32)             # (S_dec, C)
        y = jnp.maximum(y, 0.0)                                                # ReLU after deconv
        if skip:
            sp = phase_refs[(1 - r, 1 - c)]                                    # ungated x, same pixels
            start = F + r * G + c
            y = y + sp[start:start + S_dec, :].astype(f32)
        # LayerNorm over channels (lane axis), per spatial position.
        mu = jnp.mean(y, axis=1, keepdims=True)
        var = jnp.mean((y - mu) ** 2, axis=1, keepdims=True)
        outs.append((y - mu) * jax.lax.rsqrt(var + EPS) * gamma + beta)
    o_ref[...] = jnp.concatenate(outs, axis=1)                                 # (S_dec, 4C), one store


# ----------------------------------------------------------------------------
# Glue: PyTorch-style bilinear interpolate (align_corners=False), separable.
# Exact identity for perfect-square hidden_size.
# ----------------------------------------------------------------------------
def _resize_axis_linear(x, out_size, axis):
    in_size = x.shape[axis]
    if out_size == in_size:
        return x
    scale = in_size / out_size
    dst = jnp.arange(out_size, dtype=jnp.float32)
    src = jnp.clip((dst + 0.5) * scale - 0.5, 0.0, in_size - 1)
    lo = jnp.floor(src).astype(jnp.int32)
    hi = jnp.minimum(lo + 1, in_size - 1)
    w = src - lo.astype(jnp.float32)
    xlo = jnp.take(x, lo, axis=axis)
    xhi = jnp.take(x, hi, axis=axis)
    bshape = [1] * x.ndim
    bshape[axis] = out_size
    w = w.reshape(bshape)
    return xlo * (1.0 - w) + xhi * w


def torch_bilinear(x, out_sizes, axes):
    for sz, ax in zip(out_sizes, axes):
        x = _resize_axis_linear(x, sz, ax)
    return x


def _vmem_limit_bytes(C, PH, S_z, S_dec):
    phases = 4 * PH * C * 2
    gate_w = 2 * C * C * C * 2
    taps = 9 * C * C * 4 + 16 * C * C * 2 + 2 * C * 4
    out = S_dec * 4 * C * 4
    scratch = S_z * C * 4
    work = (S_z * 9 * C * 2            # conv K-concat LHS (bf16)
            + 9 * S_dec * C * 2        # cached bf16 z shifts
            + S_dec * 4 * C * 2        # deconv LHS (bf16)
            + 6 * S_dec * C * 4)       # f32 temporaries
    total = phases + gate_w + taps + out + scratch + work
    return int(min(max(2 * total + (16 << 20), 32 << 20), 100 << 20))


# ----------------------------------------------------------------------------
# Full forward
# ----------------------------------------------------------------------------
def adapter_decoder_layer(x, params, skip_connect=True):
    C = params["gamma"].shape[0]                          # embed_dim
    hidden_dim, hidden_size = x.shape
    assert hidden_dim == C, "x.size(0) must equal embed_dim"

    s = int(hidden_size ** 0.5)
    assert s % 2 == 0, "fused skip+LN path requires even spatial size (2*Ho == s)"

    # interpolate_tensor(x, (hidden_dim, s*s)) then view as (1, C, s, s).
    x_r = torch_bilinear(x, (hidden_dim, s * s), (0, 1))
    x_hwc = jnp.transpose(x_r.reshape(C, s, s), (1, 2, 0))                     # (s, s, C)
    xpad = jnp.pad(x_hwc, ((1, 1), (1, 1), (0, 0)))                            # (s+2, s+2, C)

    # Flattened-grid geometry shared by kernel and glue.
    Ho = Wo = s // 2
    G = Wo + 2                      # row stride of the zpad grid
    F = G + 1                       # front padding of the phase slabs
    S_dec = G * (Ho + 2)            # deconv-phase accumulator rows
    S_z = _round_up(S_dec + 2 * G + 2, 8)      # conv/zpad accumulator rows
    PH = _round_up(F + S_z, 8)      # phase slab rows

    def phase(pr, pc):
        ph = xpad[pr::2, pc::2, :]                                             # (Ho+1, Wo+1, C)
        ph = jnp.pad(ph, ((0, 1), (0, G - (Wo + 1)), (0, 0)))                  # (Ho+2, G, C)
        flat = ph.reshape((Ho + 2) * G, C)
        return jnp.pad(flat, ((F, PH - F - flat.shape[0]), (0, 0))).astype(jnp.bfloat16)

    pee, peo, poe, poo = phase(0, 0), phase(0, 1), phase(1, 0), phase(1, 1)

    # Weight prep: bf16 MXU operands, gate weights transposed, conv taps in the
    # transposed (C_out, 9*C_in) layout, deconv taps pre-grouped per output phase.
    w1t = params["w_lin1"].T.astype(jnp.bfloat16)                              # (C, C*C)
    w2t = params["w_lin2"].T.astype(jnp.bfloat16)                              # (C*C, C)
    wct = jnp.transpose(params["w_conv"], (0, 2, 3, 1)).reshape(C, 9 * C).astype(jnp.float32)
    wt_all = jnp.transpose(params["w_convt"], (2, 3, 0, 1)).reshape(16, C, C)  # [ky*4+kx][ci,co]
    wtp = jnp.stack([
        jnp.concatenate([wt_all[kr * 4 + kc]
                         for (_, kr) in ROW_TAPS[r] for (_, kc) in ROW_TAPS[c]], axis=0)
        for (r, c) in PHASES
    ]).astype(jnp.bfloat16)                                                    # (4, 4C, C)
    gb = jnp.stack([params["gamma"], params["beta"]]).astype(jnp.float32)      # (2, C)

    kern = partial(fused_adapter_kernel, hw=s * s, G=G, F=F,
                   S_z=S_z, S_dec=S_dec, Ho=Ho, Wo=Wo, skip=skip_connect)
    y_flat = pl.pallas_call(
        kern,
        out_shape=jax.ShapeDtypeStruct((S_dec, 4 * C), jnp.float32),
        in_specs=[_vmem()] * 9,
        out_specs=_vmem(),
        scratch_shapes=[pltpu.VMEM((S_z, C), jnp.float32)],
        compiler_params=pltpu.CompilerParams(
            vmem_limit_bytes=_vmem_limit_bytes(C, PH, S_z, S_dec)),
    )(pee, peo, poe, poo, w1t, w2t, wct, wtp, gb)

    # De-interleave the 4 sub-pixel phases back to the (s, s) grid (cheap glue).
    y = y_flat.reshape(Ho + 2, G, 4, C)[:Ho, :Wo]                              # (Ho, Wo, 4, C)
    y = y.reshape(Ho, Wo, 2, 2, C).transpose(0, 2, 1, 3, 4).reshape(s, s, C)
    out2d = jnp.transpose(y, (2, 0, 1)).reshape(C, s * s)

    # view(hidden_dim, h*w) -> interpolate back to (hidden_dim, hidden_size).
    return torch_bilinear(out2d, (hidden_dim, hidden_size), (0, 1))


# ----------------------------------------------------------------------------
# Deterministic parameter init (kaiming_normal_, mode='fan_out', relu)
# ----------------------------------------------------------------------------
def init_params(key, embed_dim):
    C = embed_dim
    Ch = C * C
    k1, k2, k3, k4 = jax.random.split(key, 4)
    return {
        "w_lin1": jax.random.normal(k1, (Ch, C), jnp.float32) * math.sqrt(2.0 / Ch),
        "w_lin2": jax.random.normal(k2, (C, Ch), jnp.float32) * math.sqrt(2.0 / C),
        "w_conv": jax.random.normal(k3, (C, C, 3, 3), jnp.float32) * math.sqrt(2.0 / (C * 9)),
        "w_convt": jax.random.normal(k4, (C, C, 4, 4), jnp.float32) * math.sqrt(2.0 / (C * 16)),
        "gamma": jnp.ones((C,), jnp.float32),
        "beta": jnp.zeros((C,), jnp.float32),
    }


if __name__ == "__main__":
    embed_dim = 8          # C = hidden_dim = embed_dim
    hidden_size = 256      # perfect square (s = 16) -> interpolate steps are identity

    key = jax.random.PRNGKey(0)
    kx, kp = jax.random.split(key)
    x = jax.random.normal(kx, (embed_dim, hidden_size), jnp.float32)
    params = init_params(kp, embed_dim)

    fwd = jax.jit(adapter_decoder_layer, static_argnames=("skip_connect",))
    out = fwd(x, params, skip_connect=True)
    out = jax.block_until_ready(out)

    assert out.shape == (embed_dim, hidden_size)
    assert bool(jnp.all(jnp.isfinite(out)))
    print("KERNEL_OK")
</pallas_src>

<mosaic_0001>
module attributes {stable_mosaic.version = 11 : i64} {
  func.func @fused_adapter_kernel(%arg0: memref<144x8xbf16, #tpu.memory_space<vmem>>, %arg1: memref<144x8xbf16, #tpu.memory_space<vmem>>, %arg2: memref<144x8xbf16, #tpu.memory_space<vmem>>, %arg3: memref<144x8xbf16, #tpu.memory_space<vmem>>, %arg4: memref<8x64xbf16, #tpu.memory_space<vmem>>, %arg5: memref<64x8xbf16, #tpu.memory_space<vmem>>, %arg6: memref<8x72xf32, #tpu.memory_space<vmem>>, %arg7: memref<4x32x8xbf16, #tpu.memory_space<vmem>>, %arg8: memref<2x8xf32, #tpu.memory_space<vmem>>, %arg9: memref<100x32xf32, #tpu.memory_space<vmem>>, %arg10: memref<128x8xf32, #tpu.memory_space<vmem>>) attributes {dimension_semantics = [], scalar_prefetch = 0 : i64, scratch_operands = 1 : i64, tpu.core_type = #tpu.core_type<tc>} {
    %c0 = arith.constant 0 : index
    %c0_0 = arith.constant 0 : index
    %0 = vector.load %arg0[%c0, %c0_0] : memref<144x8xbf16, #tpu.memory_space<vmem>>, vector<144x8xbf16>
    %1 = arith.extf %0 : vector<144x8xbf16> to vector<144x8xf32>
    %cst = arith.constant dense<0.000000e+00> : vector<8xf32>
    %2 = vector.multi_reduction <add>, %1, %cst [0] : vector<144x8xf32> to vector<8xf32>
    %3 = vector.shape_cast %2 : vector<8xf32> to vector<1x8xf32>
    %c0_1 = arith.constant 0 : index
    %c0_2 = arith.constant 0 : index
    %4 = vector.load %arg1[%c0_1, %c0_2] : memref<144x8xbf16, #tpu.memory_space<vmem>>, vector<144x8xbf16>
    %5 = arith.extf %4 : vector<144x8xbf16> to vector<144x8xf32>
    %cst_3 = arith.constant dense<0.000000e+00> : vector<8xf32>
    %6 = vector.multi_reduction <add>, %5, %cst_3 [0] : vector<144x8xf32> to vector<8xf32>
    %7 = vector.shape_cast %6 : vector<8xf32> to vector<1x8xf32>
    %8 = arith.addf %3, %7 : vector<1x8xf32>
    %c0_4 = arith.constant 0 : index
    %c0_5 = arith.constant 0 : index
    %9 = vector.load %arg2[%c0_4, %c0_5] : memref<144x8xbf16, #tpu.memory_space<vmem>>, vector<144x8xbf16>
    %10 = arith.extf %9 : vector<144x8xbf16> to vector<144x8xf32>
    %cst_6 = arith.constant dense<0.000000e+00> : vector<8xf32>
    %11 = vector.multi_reduction <add>, %10, %cst_6 [0] : vector<144x8xf32> to vector<8xf32>
    %12 = vector.shape_cast %11 : vector<8xf32> to vector<1x8xf32>
    %13 = arith.addf %8, %12 : vector<1x8xf32>
    %c0_7 = arith.constant 0 : index
    %c0_8 = arith.constant 0 : index
    %14 = vector.load %arg3[%c0_7, %c0_8] : memref<144x8xbf16, #tpu.memory_space<vmem>>, vector<144x8xbf16>
    %15 = arith.extf %14 : vector<144x8xbf16> to vector<144x8xf32>
    %cst_9 = arith.constant dense<0.000000e+00> : vector<8xf32>
    %16 = vector.multi_reduction <add>, %15, %cst_9 [0] : vector<144x8xf32> to vector<8xf32>
    %17 = vector.shape_cast %16 : vector<8xf32> to vector<1x8xf32>
    %18 = arith.addf %13, %17 : vector<1x8xf32>
    %cst_10 = arith.constant 3.906250e-03 : f32
    %19 = vector.broadcast %cst_10 : f32 to vector<1x8xf32>
    %20 = arith.mulf %18, %19 : vector<1x8xf32>
    %21 = arith.truncf %20 : vector<1x8xf32> to vector<1x8xbf16>
    %c0_11 = arith.constant 0 : index
    %c0_12 = arith.constant 0 : index
    %22 = vector.load %arg4[%c0_11, %c0_12] : memref<8x64xbf16, #tpu.memory_space<vmem>>, vector<8x64xbf16>
    %cst_13 = arith.constant dense<0.000000e+00> : vector<1x64xf32>
    %23 = tpu.matmul %21, %22, %cst_13 {dimension_numbers = #tpu.dot_dimension_numbers<[1], [0], [0], [1], [0, 0, 1, 1], [], []>} : vector<1x8xbf16>, vector<8x64xbf16>, vector<1x64xf32> -> vector<1x64xf32>
    %cst_14 = arith.constant 0.000000e+00 : f32
    %24 = vector.broadcast %cst_14 : f32 to vector<1x64xf32>
    %25 = arith.maximumf %23, %24 : vector<1x64xf32>
    %26 = arith.truncf %25 : vector<1x64xf32> to vector<1x64xbf16>
    %c0_15 = arith.constant 0 : index
    %c0_16 = arith.constant 0 : index
    %27 = vector.load %arg5[%c0_15, %c0_16] : memref<64x8xbf16, #tpu.memory_space<vmem>>, vector<64x8xbf16>
    %cst_17 = arith.constant dense<0.000000e+00> : vector<1x8xf32>
    %28 = tpu.matmul %26, %27, %cst_17 {dimension_numbers = #tpu.dot_dimension_numbers<[1], [0], [0], [1], [0, 0, 1, 1], [], []>} : vector<1x64xbf16>, vector<64x8xbf16>, vector<1x8xf32> -> vector<1x8xf32>
    %29 = arith.negf %28 : vector<1x8xf32>
    %30 = math.exp %29 : vector<1x8xf32>
    %cst_18 = arith.constant 1.000000e+00 : f32
    %31 = vector.broadcast %cst_18 : f32 to vector<1x8xf32>
    %32 = arith.addf %31, %30 : vector<1x8xf32>
    %33 = arith.divf %31, %32 : vector<1x8xf32>
    %34 = tpu.concatenate %33, %33, %33, %33, %33, %33, %33, %33, %33 in 1 : vector<1x8xf32>, vector<1x8xf32>, vector<1x8xf32>, vector<1x8xf32>, vector<1x8xf32>, vector<1x8xf32>, vector<1x8xf32>, vector<1x8xf32>, vector<1x8xf32> -> vector<1x72xf32>
    %c0_19 = arith.constant 0 : index
    %c0_20 = arith.constant 0 : index
    %35 = vector.load %arg6[%c0_19, %c0_20] : memref<8x72xf32, #tpu.memory_space<vmem>>, vector<8x72xf32>
    %36 = vector.broadcast %34 : vector<1x72xf32> to vector<8x72xf32>
    %37 = arith.mulf %35, %36 : vector<8x72xf32>
    %38 = arith.truncf %37 : vector<8x72xf32> to vector<8x72xbf16>
    %c0_21 = arith.constant 0 : index
    %c0_22 = arith.constant 0 : index
    %39 = vector.load %arg0[%c0_21, %c0_22] : memref<144x8xbf16, #tpu.memory_space<vmem>>, vector<128x8xbf16>
    %c0_23 = arith.constant 0 : index
    %c0_24 = arith.constant 0 : index
    %40 = vector.load %arg1[%c0_23, %c0_24] : memref<144x8xbf16, #tpu.memory_space<vmem>>, vector<128x8xbf16>
    %c1 = arith.constant 1 : index
    %c0_25 = arith.constant 0 : index
    %41 = vector.load %arg0[%c1, %c0_25] : memref<144x8xbf16, #tpu.memory_space<vmem>>, vector<128x8xbf16>
    %c0_26 = arith.constant 0 : index
    %c0_27 = arith.constant 0 : index
    %42 = vector.load %arg2[%c0_26, %c0_27] : memref<144x8xbf16, #tpu.memory_space<vmem>>, vector<128x8xbf16>
    %c0_28 = arith.constant 0 : index
    %c0_29 = arith.constant 0 : index
    %43 = vector.load %arg3[%c0_28, %c0_29] : memref<144x8xbf16, #tpu.memory_space<vmem>>, vector<128x8xbf16>
    %c1_30 = arith.constant 1 : index
    %c0_31 = arith.constant 0 : index
    %44 = vector.load %arg2[%c1_30, %c0_31] : memref<144x8xbf16, #tpu.memory_space<vmem>>, vector<128x8xbf16>
    %c10 = arith.constant 10 : index
    %c0_32 = arith.constant 0 : index
    %45 = vector.load %arg0[%c10, %c0_32] : memref<144x8xbf16, #tpu.memory_space<vmem>>, vector<128x8xbf16>
    %c10_33 = arith.constant 10 : index
    %c0_34 = arith.constant 0 : index
    %46 = vector.load %arg1[%c10_33, %c0_34] : memref<144x8xbf16, #tpu.memory_space<vmem>>, vector<128x8xbf16>
    %c11 = arith.constant 11 : index
    %c0_35 = arith.constant 0 : index
    %47 = vector.load %arg0[%c11, %c0_35] : memref<144x8xbf16, #tpu.memory_space<vmem>>, vector<128x8xbf16>
    %48 = tpu.concatenate %39, %40, %41, %42, %43, %44, %45, %46, %47 in 1 : vector<128x8xbf16>, vector<128x8xbf16>, vector<128x8xbf16>, vector<128x8xbf16>, vector<128x8xbf16>, vector<128x8xbf16>, vector<128x8xbf16>, vector<128x8xbf16>, vector<128x8xbf16> -> vector<128x72xbf16>
    %cst_36 = arith.constant dense<0.000000e+00> : vector<128x8xf32>
    %49 = tpu.matmul %48, %38, %cst_36 {dimension_numbers = #tpu.dot_dimension_numbers<[1], [1], [0], [0], [0, 0, 1, 0], [], []>} : vector<128x72xbf16>, vector<8x72xbf16>, vector<128x8xf32> -> vector<128x8xf32>
    %50 = tpu.iota {dimensions = array<i32: 0>} : vector<128x1xi32>
    %51 = arith.sitofp %50 : vector<128x1xi32> to vector<128x1xf32>
    %cst_37 = arith.constant 1.000000e+01 : f32
    %52 = vector.broadcast %cst_37 : f32 to vector<128x1xf32>
    %53 = arith.divf %51, %52 : vector<128x1xf32>
    %54 = math.floor %53 : vector<128x1xf32>
    %cst_38 = arith.constant 1.000000e+01 : f32
    %55 = vector.broadcast %cst_38 : f32 to vector<128x1xf32>
    %56 = arith.mulf %54, %55 : vector<128x1xf32>
    %57 = arith.subf %51, %56 : vector<128x1xf32>
    %cst_39 = arith.constant 1.000000e+00 : f32
    %58 = vector.broadcast %cst_39 : f32 to vector<128x1xf32>
    %59 = arith.cmpf oge, %54, %58 : vector<128x1xf32>
    %cst_40 = arith.constant 8.000000e+00 : f32
    %60 = vector.broadcast %cst_40 : f32 to vector<128x1xf32>
    %61 = arith.cmpf ole, %54, %60 : vector<128x1xf32>
    %62 = arith.andi %59, %61 : vector<128x1xi1>
    %cst_41 = arith.constant 1.000000e+00 : f32
    %63 = vector.broadcast %cst_41 : f32 to vector<128x1xf32>
    %64 = arith.cmpf oge, %57, %63 : vector<128x1xf32>
    %65 = arith.andi %62, %64 : vector<128x1xi1>
    %cst_42 = arith.constant 8.000000e+00 : f32
    %66 = vector.broadcast %cst_42 : f32 to vector<128x1xf32>
    %67 = arith.cmpf ole, %57, %66 : vector<128x1xf32>
    %68 = arith.andi %65, %67 : vector<128x1xi1>
    %69 = arith.extui %68 : vector<128x1xi1> to vector<128x1xi32>
    %70 = arith.sitofp %69 : vector<128x1xi32> to vector<128x1xf32>
    %cst_43 = arith.constant 0.000000e+00 : f32
    %71 = vector.broadcast %cst_43 : f32 to vector<128x8xf32>
    %72 = arith.maximumf %49, %71 : vector<128x8xf32>
    %73 = vector.broadcast %70 : vector<128x1xf32> to vector<128x8xf32>
    %74 = arith.mulf %72, %73 : vector<128x8xf32>
    %c0_44 = arith.constant 0 : index
    %c0_45 = arith.constant 0 : index
    %75 = vector.load %arg10[%c0_44, %c0_45] : memref<128x8xf32, #tpu.memory_space<vmem>>, vector<128x8xf32>
    tpu.vector_store %arg10[%c0_44, %c0_45], %74 {strides = array<i32>} : memref<128x8xf32, #tpu.memory_space<vmem>>, vector<128x8xf32>,
    %c0_46 = arith.constant 0 : index
    %c0_47 = arith.constant 0 : index
    %76 = vector.load %arg10[%c0_46, %c0_47] : memref<128x8xf32, #tpu.memory_space<vmem>>, vector<100x8xf32>
    %77 = arith.truncf %76 : vector<100x8xf32> to vector<100x8xbf16>
    %c1_48 = arith.constant 1 : index
    %c0_49 = arith.constant 0 : index
    %78 = vector.load %arg10[%c1_48, %c0_49] : memref<128x8xf32, #tpu.memory_space<vmem>>, vector<100x8xf32>
    %79 = arith.truncf %78 : vector<100x8xf32> to vector<100x8xbf16>
    %c2 = arith.constant 2 : index
    %c0_50 = arith.constant 0 : index
    %80 = vector.load %arg10[%c2, %c0_50] : memref<128x8xf32, #tpu.memory_space<vmem>>, vector<100x8xf32>
    %81 = arith.truncf %80 : vector<100x8xf32> to vector<100x8xbf16>
    %c10_51 = arith.constant 10 : index
    %c0_52 = arith.constant 0 : index
    %82 = vector.load %arg10[%c10_51, %c0_52] : memref<128x8xf32, #tpu.memory_space<vmem>>, vector<100x8xf32>
    %83 = arith.truncf %82 : vector<100x8xf32> to vector<100x8xbf16>
    %c11_53 = arith.constant 11 : index
    %c0_54 = arith.constant 0 : index
    %84 = vector.load %arg10[%c11_53, %c0_54] : memref<128x8xf32, #tpu.memory_space<vmem>>, vector<100x8xf32>
    %85 = arith.truncf %84 : vector<100x8xf32> to vector<100x8xbf16>
    %c12 = arith.constant 12 : index
    %c0_55 = arith.constant 0 : index
    %86 = vector.load %arg10[%c12, %c0_55] : memref<128x8xf32, #tpu.memory_space<vmem>>, vector<100x8xf32>
    %87 = arith.truncf %86 : vector<100x8xf32> to vector<100x8xbf16>
    %c20 = arith.constant 20 : index
    %c0_56 = arith.constant 0 : index
    %88 = vector.load %arg10[%c20, %c0_56] : memref<128x8xf32, #tpu.memory_space<vmem>>, vector<100x8xf32>
    %89 = arith.truncf %88 : vector<100x8xf32> to vector<100x8xbf16>
    %c21 = arith.constant 21 : index
    %c0_57 = arith.constant 0 : index
    %90 = vector.load %arg10[%c21, %c0_57] : memref<128x8xf32, #tpu.memory_space<vmem>>, vector<100x8xf32>
    %91 = arith.truncf %90 : vector<100x8xf32> to vector<100x8xbf16>
    %c22 = arith.constant 22 : index
    %c0_58 = arith.constant 0 : index
    %92 = vector.load %arg10[%c22, %c0_58] : memref<128x8xf32, #tpu.memory_space<vmem>>, vector<100x8xf32>
    %93 = arith.truncf %92 : vector<100x8xf32> to vector<100x8xbf16>
    %c0_59 = arith.constant 0 : index
    %c0_60 = arith.constant 0 : index
    %94 = vector.load %arg8[%c0_59, %c0_60] : memref<2x8xf32, #tpu.memory_space<vmem>>, vector<1x8xf32>
    %c1_61 = arith.constant 1 : index
    %c0_62 = arith.constant 0 : index
    %95 = vector.load %arg8[%c1_61, %c0_62] : memref<2x8xf32, #tpu.memory_space<vmem>>, vector<1x8xf32>
    %96 = tpu.concatenate %77, %79, %83, %85 in 1 : vector<100x8xbf16>, vector<100x8xbf16>, vector<100x8xbf16>, vector<100x8xbf16> -> vector<100x32xbf16>
    %c0_63 = arith.constant 0 : index
    %c0_64 = arith.constant 0 : index
    %c0_65 = arith.constant 0 : index
    %97 = vector.load %arg7[%c0_63, %c0_64, %c0_65] : memref<4x32x8xbf16, #tpu.memory_space<vmem>>, vector<1x32x8xbf16>
    %98 = vector.shape_cast %97 : vector<1x32x8xbf16> to vector<32x8xbf16>
    %cst_66 = arith.constant dense<0.000000e+00> : vector<100x8xf32>
    %99 = tpu.matmul %96, %98, %cst_66 {dimension_numbers = #tpu.dot_dimension_numbers<[1], [0], [0], [1], [0, 0, 1, 1], [], []>} : vector<100x32xbf16>, vector<32x8xbf16>, vector<100x8xf32> -> vector<100x8xf32>
    %cst_67 = arith.constant 0.000000e+00 : f32
    %100 = vector.broadcast %cst_67 : f32 to vector<100x8xf32>
    %101 = arith.maximumf %99, %100 : vector<100x8xf32>
    %c11_68 = arith.constant 11 : index
    %c0_69 = arith.constant 0 : index
    %102 = vector.load %arg3[%c11_68, %c0_69] : memref<144x8xbf16, #tpu.memory_space<vmem>>, vector<100x8xbf16>
    %103 = arith.extf %102 : vector<100x8xbf16> to vector<100x8xf32>
    %104 = arith.addf %101, %103 : vector<100x8xf32>
    %cst_70 = arith.constant dense<0.000000e+00> : vector<100xf32>
    %105 = vector.multi_reduction <add>, %104, %cst_70 [1] : vector<100x8xf32> to vector<100xf32>
    %106 = vector.shape_cast %105 : vector<100xf32> to vector<100x1xf32>
    %cst_71 = arith.constant 8.000000e+00 : f32
    %107 = vector.broadcast %cst_71 : f32 to vector<100x1xf32>
    %108 = arith.divf %106, %107 : vector<100x1xf32>
    %109 = vector.broadcast %108 : vector<100x1xf32> to vector<100x8xf32>
    %110 = arith.subf %104, %109 : vector<100x8xf32>
    %111 = arith.mulf %110, %110 : vector<100x8xf32>
    %cst_72 = arith.constant dense<0.000000e+00> : vector<100xf32>
    %112 = vector.multi_reduction <add>, %111, %cst_72 [1] : vector<100x8xf32> to vector<100xf32>
    %113 = vector.shape_cast %112 : vector<100xf32> to vector<100x1xf32>
    %cst_73 = arith.constant 8.000000e+00 : f32
    %114 = vector.broadcast %cst_73 : f32 to vector<100x1xf32>
    %115 = arith.divf %113, %114 : vector<100x1xf32>
    %116 = vector.broadcast %108 : vector<100x1xf32> to vector<100x8xf32>
    %117 = arith.subf %104, %116 : vector<100x8xf32>
    %cst_74 = arith.constant 9.99999974E-6 : f32
    %118 = vector.broadcast %cst_74 : f32 to vector<100x1xf32>
    %119 = arith.addf %115, %118 : vector<100x1xf32>
    %120 = math.rsqrt %119 : vector<100x1xf32>
    %121 = vector.broadcast %120 : vector<100x1xf32> to vector<100x8xf32>
    %122 = arith.mulf %117, %121 : vector<100x8xf32>
    %123 = vector.broadcast %94 : vector<1x8xf32> to vector<100x8xf32>
    %124 = arith.mulf %122, %123 : vector<100x8xf32>
    %125 = vector.broadcast %95 : vector<1x8xf32> to vector<100x8xf32>
    %126 = arith.addf %124, %125 : vector<100x8xf32>
    %127 = tpu.concatenate %79, %81, %85, %87 in 1 : vector<100x8xbf16>, vector<100x8xbf16>, vector<100x8xbf16>, vector<100x8xbf16> -> vector<100x32xbf16>
    %c1_75 = arith.constant 1 : index
    %c0_76 = arith.constant 0 : index
    %c0_77 = arith.constant 0 : index
    %128 = vector.load %arg7[%c1_75, %c0_76, %c0_77] : memref<4x32x8xbf16, #tpu.memory_space<vmem>>, vector<1x32x8xbf16>
    %129 = vector.shape_cast %128 : vector<1x32x8xbf16> to vector<32x8xbf16>
    %cst_78 = arith.constant dense<0.000000e+00> : vector<100x8xf32>
    %130 = tpu.matmul %127, %129, %cst_78 {dimension_numbers = #tpu.dot_dimension_numbers<[1], [0], [0], [1], [0, 0, 1, 1], [], []>} : vector<100x32xbf16>, vector<32x8xbf16>, vector<100x8xf32> -> vector<100x8xf32>
    %cst_79 = arith.constant 0.000000e+00 : f32
    %131 = vector.broadcast %cst_79 : f32 to vector<100x8xf32>
    %132 = arith.maximumf %130, %131 : vector<100x8xf32>
    %c12_80 = arith.constant 12 : index
    %c0_81 = arith.constant 0 : index
    %133 = vector.load %arg2[%c12_80, %c0_81] : memref<144x8xbf16, #tpu.memory_space<vmem>>, vector<100x8xbf16>
    %134 = arith.extf %133 : vector<100x8xbf16> to vector<100x8xf32>
    %135 = arith.addf %132, %134 : vector<100x8xf32>
    %cst_82 = arith.constant dense<0.000000e+00> : vector<100xf32>
    %136 = vector.multi_reduction <add>, %135, %cst_82 [1] : vector<100x8xf32> to vector<100xf32>
    %137 = vector.shape_cast %136 : vector<100xf32> to vector<100x1xf32>
    %cst_83 = arith.constant 8.000000e+00 : f32
    %138 = vector.broadcast %cst_83 : f32 to vector<100x1xf32>
    %139 = arith.divf %137, %138 : vector<100x1xf32>
    %140 = vector.broadcast %139 : vector<100x1xf32> to vector<100x8xf32>
    %141 = arith.subf %135, %140 : vector<100x8xf32>
    %142 = arith.mulf %141, %141 : vector<100x8xf32>
    %cst_84 = arith.constant dense<0.000000e+00> : vector<100xf32>
    %143 = vector.multi_reduction <add>, %142, %cst_84 [1] : vector<100x8xf32> to vector<100xf32>
    %144 = vector.shape_cast %143 : vector<100xf32> to vector<100x1xf32>
    %cst_85 = arith.constant 8.000000e+00 : f32
    %145 = vector.broadcast %cst_85 : f32 to vector<100x1xf32>
    %146 = arith.divf %144, %145 : vector<100x1xf32>
    %147 = vector.broadcast %139 : vector<100x1xf32> to vector<100x8xf32>
    %148 = arith.subf %135, %147 : vector<100x8xf32>
    %cst_86 = arith.constant 9.99999974E-6 : f32
    %149 = vector.broadcast %cst_86 : f32 to vector<100x1xf32>
    %150 = arith.addf %146, %149 : vector<100x1xf32>
    %151 = math.rsqrt %150 : vector<100x1xf32>
    %152 = vector.broadcast %151 : vector<100x1xf32> to vector<100x8xf32>
    %153 = arith.mulf %148, %152 : vector<100x8xf32>
    %154 = vector.broadcast %94 : vector<1x8xf32> to vector<100x8xf32>
    %155 = arith.mulf %153, %154 : vector<100x8xf32>
    %156 = vector.broadcast %95 : vector<1x8xf32> to vector<100x8xf32>
    %157 = arith.addf %155, %156 : vector<100x8xf32>
    %158 = tpu.concatenate %83, %85, %89, %91 in 1 : vector<100x8xbf16>, vector<100x8xbf16>, vector<100x8xbf16>, vector<100x8xbf16> -> vector<100x32xbf16>
    %c2_87 = arith.constant 2 : index
    %c0_88 = arith.constant 0 : index
    %c0_89 = arith.constant 0 : index
    %159 = vector.load %arg7[%c2_87, %c0_88, %c0_89] : memref<4x32x8xbf16, #tpu.memory_space<vmem>>, vector<1x32x8xbf16>
    %160 = vector.shape_cast %159 : vector<1x32x8xbf16> to vector<32x8xbf16>
    %cst_90 = arith.constant dense<0.000000e+00> : vector<100x8xf32>
    %161 = tpu.matmul %158, %160, %cst_90 {dimension_numbers = #tpu.dot_dimension_numbers<[1], [0], [0], [1], [0, 0, 1, 1], [], []>} : vector<100x32xbf16>, vector<32x8xbf16>, vector<100x8xf32> -> vector<100x8xf32>
    %cst_91 = arith.constant 0.000000e+00 : f32
    %162 = vector.broadcast %cst_91 : f32 to vector<100x8xf32>
    %163 = arith.maximumf %161, %162 : vector<100x8xf32>
    %c21_92 = arith.constant 21 : index
    %c0_93 = arith.constant 0 : index
    %164 = vector.load %arg1[%c21_92, %c0_93] : memref<144x8xbf16, #tpu.memory_space<vmem>>, vector<100x8xbf16>
    %165 = arith.extf %164 : vector<100x8xbf16> to vector<100x8xf32>
    %166 = arith.addf %163, %165 : vector<100x8xf32>
    %cst_94 = arith.constant dense<0.000000e+00> : vector<100xf32>
    %167 = vector.multi_reduction <add>, %166, %cst_94 [1] : vector<100x8xf32> to vector<100xf32>
    %168 = vector.shape_cast %167 : vector<100xf32> to vector<100x1xf32>
    %cst_95 = arith.constant 8.000000e+00 : f32
    %169 = vector.broadcast %cst_95 : f32 to vector<100x1xf32>
    %170 = arith.divf %168, %169 : vector<100x1xf32>
    %171 = vector.broadcast %170 : vector<100x1xf32> to vector<100x8xf32>
    %172 = arith.subf %166, %171 : vector<100x8xf32>
    %173 = arith.mulf %172, %172 : vector<100x8xf32>
    %cst_96 = arith.constant dense<0.000000e+00> : vector<100xf32>
    %174 = vector.multi_reduction <add>, %173, %cst_96 [1] : vector<100x8xf32> to vector<100xf32>
    %175 = vector.shape_cast %174 : vector<100xf32> to vector<100x1xf32>
    %cst_97 = arith.constant 8.000000e+00 : f32
    %176 = vector.broadcast %cst_97 : f32 to vector<100x1xf32>
    %177 = arith.divf %175, %176 : vector<100x1xf32>
    %178 = vector.broadcast %170 : vector<100x1xf32> to vector<100x8xf32>
    %179 = arith.subf %166, %178 : vector<100x8xf32>
    %cst_98 = arith.constant 9.99999974E-6 : f32
    %180 = vector.broadcast %cst_98 : f32 to vector<100x1xf32>
    %181 = arith.addf %177, %180 : vector<100x1xf32>
    %182 = math.rsqrt %181 : vector<100x1xf32>
    %183 = vector.broadcast %182 : vector<100x1xf32> to vector<100x8xf32>
    %184 = arith.mulf %179, %183 : vector<100x8xf32>
    %185 = vector.broadcast %94 : vector<1x8xf32> to vector<100x8xf32>
    %186 = arith.mulf %184, %185 : vector<100x8xf32>
    %187 = vector.broadcast %95 : vector<1x8xf32> to vector<100x8xf32>
    %188 = arith.addf %186, %187 : vector<100x8xf32>
    %189 = tpu.concatenate %85, %87, %91, %93 in 1 : vector<100x8xbf16>, vector<100x8xbf16>, vector<100x8xbf16>, vector<100x8xbf16> -> vector<100x32xbf16>
    %c3 = arith.constant 3 : index
    %c0_99 = arith.constant 0 : index
    %c0_100 = arith.constant 0 : index
    %190 = vector.load %arg7[%c3, %c0_99, %c0_100] : memref<4x32x8xbf16, #tpu.memory_space<vmem>>, vector<1x32x8xbf16>
    %191 = vector.shape_cast %190 : vector<1x32x8xbf16> to vector<32x8xbf16>
    %cst_101 = arith.constant dense<0.000000e+00> : vector<100x8xf32>
    %192 = tpu.matmul %189, %191, %cst_101 {dimension_numbers = #tpu.dot_dimension_numbers<[1], [0], [0], [1], [0, 0, 1, 1], [], []>} : vector<100x32xbf16>, vector<32x8xbf16>, vector<100x8xf32> -> vector<100x8xf32>
    %cst_102 = arith.constant 0.000000e+00 : f32
    %193 = vector.broadcast %cst_102 : f32 to vector<100x8xf32>
    %194 = arith.maximumf %192, %193 : vector<100x8xf32>
    %c22_103 = arith.constant 22 : index
    %c0_104 = arith.constant 0 : index
    %195 = vector.load %arg0[%c22_103, %c0_104] : memref<144x8xbf16, #tpu.memory_space<vmem>>, vector<100x8xbf16>
    %196 = arith.extf %195 : vector<100x8xbf16> to vector<100x8xf32>
    %197 = arith.addf %194, %196 : vector<100x8xf32>
    %cst_105 = arith.constant dense<0.000000e+00> : vector<100xf32>
    %198 = vector.multi_reduction <add>, %197, %cst_105 [1] : vector<100x8xf32> to vector<100xf32>
    %199 = vector.shape_cast %198 : vector<100xf32> to vector<100x1xf32>
    %cst_106 = arith.constant 8.000000e+00 : f32
    %200 = vector.broadcast %cst_106 : f32 to vector<100x1xf32>
    %201 = arith.divf %199, %200 : vector<100x1xf32>
    %202 = vector.broadcast %201 : vector<100x1xf32> to vector<100x8xf32>
    %203 = arith.subf %197, %202 : vector<100x8xf32>
    %204 = arith.mulf %203, %203 : vector<100x8xf32>
    %cst_107 = arith.constant dense<0.000000e+00> : vector<100xf32>
    %205 = vector.multi_reduction <add>, %204, %cst_107 [1] : vector<100x8xf32> to vector<100xf32>
    %206 = vector.shape_cast %205 : vector<100xf32> to vector<100x1xf32>
    %cst_108 = arith.constant 8.000000e+00 : f32
    %207 = vector.broadcast %cst_108 : f32 to vector<100x1xf32>
    %208 = arith.divf %206, %207 : vector<100x1xf32>
    %209 = vector.broadcast %201 : vector<100x1xf32> to vector<100x8xf32>
    %210 = arith.subf %197, %209 : vector<100x8xf32>
    %cst_109 = arith.constant 9.99999974E-6 : f32
    %211 = vector.broadcast %cst_109 : f32 to vector<100x1xf32>
    %212 = arith.addf %208, %211 : vector<100x1xf32>
    %213 = math.rsqrt %212 : vector<100x1xf32>
    %214 = vector.broadcast %213 : vector<100x1xf32> to vector<100x8xf32>
    %215 = arith.mulf %210, %214 : vector<100x8xf32>
    %216 = vector.broadcast %94 : vector<1x8xf32> to vector<100x8xf32>
    %217 = arith.mulf %215, %216 : vector<100x8xf32>
    %218 = vector.broadcast %95 : vector<1x8xf32> to vector<100x8xf32>
    %219 = arith.addf %217, %218 : vector<100x8xf32>
    %220 = tpu.concatenate %126, %157, %188, %219 in 1 : vector<100x8xf32>, vector<100x8xf32>, vector<100x8xf32>, vector<100x8xf32> -> vector<100x32xf32>
    %c0_110 = arith.constant 0 : index
    %c0_111 = arith.constant 0 : index
    %221 = vector.load %arg9[%c0_110, %c0_111] : memref<100x32xf32, #tpu.memory_space<vmem>>, vector<100x32xf32>
    tpu.vector_store %arg9[%c0_110, %c0_111], %220 {strides = array<i32>} : memref<100x32xf32, #tpu.memory_space<vmem>>, vector<100x32xf32>,
    return
  }
}

</mosaic_0001>

<bundles_post_ra>
// kernel: adapter_decoder_layer.1
= control target key start
LH: loop header
LB: loop body
LE: loop exit
PB: predicated region body
PF: predicated region fallthrough
CT: control target
= control target key end

     0   :  { %vm7754_vm0 = vcmask 1043456   ;;  %v5015_v0 = vmov 0.0   ;;  %vm7755_vm1 = vmmov 0   ;;  %vm7760_vm2 = vcmask 64512   ;;  %s5017_s17 = smov 8   ;;  %s5018_s22 = smov 16   ;;  %s7744_s4 = inlined_call_operand.vmem [shape: bf16[8,64], index: 4, kind: input, shape index: {}]   ;;  %s7745_s0 = inlined_call_operand.vmem [shape: bf16[144,8], index: 0, kind: input, shape index: {}]   ;;  %s7746_s1 = inlined_call_operand.vmem [shape: bf16[144,8], index: 1, kind: input, shape index: {}]   ;;  %s7747_s5 = inlined_call_operand.vmem [shape: bf16[64,8], index: 5, kind: input, shape index: {}]   ;;  %s7748_s2 = inlined_call_operand.vmem [shape: bf16[144,8], index: 2, kind: input, shape index: {}]   ;;  %s7749_s3 = inlined_call_operand.vmem [shape: bf16[144,8], index: 3, kind: input, shape index: {}]   ;;  %s7750_s6 = inlined_call_operand.vmem [shape: f32[8,72], index: 6, kind: input, shape index: {}]   ;;  %s7751_s7 = inlined_call_operand.vmem [shape: bf16[4,32,8], index: 7, kind: input, shape index: {}]   ;;  %s7752_s8 = inlined_call_operand.vmem [shape: f32[2,8], index: 8, kind: input, shape index: {}]   ;;  %s7753_s9 = inlined_call_operand.vmem [shape: f32[100,32], index: 9, kind: output, shape index: {}]  }
   0x1   :  { %4642 = vmatprep.subr.bf16.mxu0 %v5015_v0  ;;  %v347_v1 = vld [vmem:[%s7744_s4] sm:$0xf]  ;;  %4644 = vmatprep.mubr.msk.bf16.mxu0 %vm7755_vm1, %v5015_v0  ;;  %v5087_v3 = vld [vmem:[%s7745_s0 + $0x8] sm:$0xf]  ;;  %v5093_v6 = vld [vmem:[%s7745_s0 + $0xc] sm:$0xff]   ;;  %s5019_s25 = smov 24  }
   0x2   :  { %v4385_v2 = vld [vmem:[%s7745_s0] sm:$0xff]   ;;  %v353_v4 = vsel %vm7754_vm0, %v347_v1, 0  ;;  %4648 = vmatprep.subr.bf16.mxu1 %v5015_v0  ;;  %4656 = vmatprep.mubr.msk.bf16.mxu1 %vm7755_vm1, %v5015_v0  ;;  %v5101_v8 = vld [vmem:[%s7745_s0 + $0x14] sm:$0xff]   ;;  %v53_v9 = vunpack.c.l.bf16 %v5087_v3  ;;  %v44_v12 = vld [vmem:[%s7745_s0 + $0x2c] sm:$0xff]   ;;  %v54_v13 = vunpack.c.l.bf16 %v5093_v6  ;;  %v55_v15 = vunpack.c.h.bf16 %v5093_v6  ;;  %s5020_s11 = smov 32   ;;  %s5021_s12 = smov 40  }
   0x3   :  { %v4386_v5 = vunpack.c.l.bf16 %v4385_v2  ;;  %4643 = vmatpush3.bf16.msra.mxu0 %v353_v4  ;;  %v4387_v7 = vunpack.c.h.bf16 %v4385_v2  ;;  %v5107_v10 = vld [vmem:[%s7745_s0 + $0x1c] sm:$0xff]   ;;  %v5112_v11 = vld [vmem:[%s7745_s0 + $0x24] sm:$0xff]   ;;  %v46_v14 = vld [vmem:[%s7745_s0 + $0x34] sm:$0xff]   ;;  %v56_v16 = vunpack.c.l.bf16 %v5101_v8  ;;  %v57_v17 = vunpack.c.h.bf16 %v5101_v8  ;;  %s5023_s4 = smov 56   ;;  %s5024_s18 = smov 64  }
   0x4   :  { %v5128_v19 = vld [vmem:[%s7745_s0 + $0x3c] sm:$0xff]   ;;  %v5133_v20 = vld [vmem:[%s7745_s0 + $0x44] sm:$0xf]  ;;  %v58_v21 = vunpack.c.l.bf16 %v5107_v10  ;;  %v59_v22 = vunpack.c.h.bf16 %v5107_v10  ;;  %v73_v24 = vsel %vm7760_vm2, %v53_v9, 0.0  ;;  %v60_v25 = vunpack.c.l.bf16 %v5112_v11  ;;  %v5151_v38 = vld [vmem:[%s7746_s1 + $0x8] sm:$0xf] }
   0x5   :  { %v70_v18 = vsel %vm7760_vm2, %v4386_v5, 0.0  ;;  %v71_v23 = vsel %vm7760_vm2, %v4387_v7, 0.0  ;;  %v61_v26 = vunpack.c.h.bf16 %v5112_v11  ;;  %v62_v27 = vunpack.c.l.bf16 %v44_v12  ;;  %v4389_v37 = vld [vmem:[%s7746_s1] sm:$0xff]   ;;  %v5165_v47 = vld [vmem:[%s7746_s1 + $0xc] sm:$0xff]   ;;  %v5170_v48 = vld [vmem:[%s7746_s1 + $0x14] sm:$0xff]  }
   0x6   :  { %v72_v28 = vadd.f32 %v71_v23, %v70_v18  ;;  %v63_v29 = vunpack.c.h.bf16 %v44_v12  ;;  %v64_v30 = vunpack.c.l.bf16 %v46_v14  ;;  %v65_v31 = vunpack.c.h.bf16 %v46_v14  ;;  %v5178_v52 = vld [vmem:[%s7746_s1 + $0x1c] sm:$0xff]   ;;  %v5193_v58 = vld [vmem:[%s7746_s1 + $0x24] sm:$0xff]   ;;  %v5198_v59 = vld [vmem:[%s7746_s1 + $0x2c] sm:$0xff]  }
   0x7   :  { %v75_v32 = vsel %vm7760_vm2, %v54_v13, 0.0  ;;  %v66_v33 = vunpack.c.l.bf16 %v5128_v19  ;;  %v67_v34 = vunpack.c.h.bf16 %v5128_v19  ;;  %v68_v35 = vunpack.c.l.bf16 %v5133_v20  ;;  %v4820_v1 = vld [vmem:[%s7747_s5] sm:$0xff]  }
   0x8   :  { %v74_v36 = vadd.f32 %v73_v24, %v72_v28  ;;  %v77_v39 = vsel %vm7760_vm2, %v55_v15, 0.0  ;;  %v79_v40 = vsel %vm7760_vm2, %v56_v16, 0.0  ;;  %v81_v41 = vsel %vm7760_vm2, %v57_v17, 0.0  ;;  %4649 = vmatpush3.bf16.msra.mxu1 %v4820_v1  ;;  %v4821_v15 = vld [vmem:[%s7747_s5 + $0x8] sm:$0xff]  }
   0x9   :  { %v83_v42 = vsel %vm7760_vm2, %v58_v21, 0.0  ;;  %v85_v44 = vsel %vm7760_vm2, %v59_v22, 0.0  ;;  %v87_v45 = vsel %vm7760_vm2, %v60_v25, 0.0  ;;  %v5160_v46 = vsel %vm7760_vm2, %v61_v26, 0.0  ;;  %4650 = vmatprep.subr.bf16.mxu1 %v5015_v0  ;;  %v4552_v28 = vld [vmem:[%s7748_s2 + $0x8] sm:$0xff]  }
   0xa   :  { %v76_v43 = vadd.f32 %v75_v32, %v74_v36  ;;  %v5173_v49 = vsel %vm7760_vm2, %v62_v27, 0.0  ;;  %v4390_v50 = vunpack.c.l.bf16 %v4389_v37  ;;  %v4391_v51 = vunpack.c.h.bf16 %v4389_v37  ;;  %v4393_v27 = vld [vmem:[%s7748_s2] sm:$0xff]  }
   0xb   :  { %v131_v53 = vunpack.c.l.bf16 %v5151_v38  ;;  %v5182_v55 = vsel %vm7760_vm2, %v63_v29, 0.0  ;;  %v5185_v56 = vsel %vm7760_vm2, %v64_v30, 0.0  ;;  %v5188_v57 = vsel %vm7760_vm2, %v65_v31, 0.0  ;;  %v4822_v29 = vld [vmem:[%s7747_s5 + $0x10] sm:$0xff]  }
   0xc   :  { %v78_v54 = vadd.f32 %v77_v39, %v76_v43  ;;  %v5201_v60 = vsel %vm7760_vm2, %v66_v33, 0.0  ;;  %v132_v61 = vunpack.c.l.bf16 %v5165_v47  ;;  %v133_v62 = vunpack.c.h.bf16 %v5165_v47  ;;  %4651 = vmatpush3.bf16.msra.mxu1 %v4821_v15 }
   0xd   :  { %v134_v63 = vunpack.c.l.bf16 %v5170_v48  ;;  %v135_v4 = vunpack.c.h.bf16 %v5170_v48  ;;  %v136_v5 = vunpack.c.l.bf16 %v5178_v52  ;;  %v137_v7 = vunpack.c.h.bf16 %v5178_v52  ;;  %4652 = vmatprep.subr.bf16.mxu1 %v5015_v0 }
   0xe   :  { %v80_v2 = vadd.f32 %v79_v40, %v78_v54  ;;  %v138_v9 = vunpack.c.l.bf16 %v5193_v58  ;;  %v147_v12 = vsel %vm7760_vm2, %v4390_v50, 0.0  ;;  %v148_v13 = vsel %vm7760_vm2, %v4391_v51, 0.0  ;;  %v126_v40 = vld [vmem:[%s7746_s1 + $0x3c] sm:$0xff]  }
   0xf   :  { %v150_v14 = vsel %vm7760_vm2, %v131_v53, 0.0  ;;  %v139_v17 = vunpack.c.h.bf16 %v5193_v58  ;;  %v140_v18 = vunpack.c.l.bf16 %v5198_v59  ;;  %v149_v19 = vadd.f32 %v148_v13, %v147_v12 }
  0x10   :  { %v82_v16 = vadd.f32 %v81_v41, %v80_v2  ;;  %v5223_v20 = vsel %vm7760_vm2, %v67_v34, 0.0  ;;  %v5226_v21 = vsel %vm7760_vm2, %v68_v35, 0.0  ;;  %v152_v22 = vsel %vm7760_vm2, %v132_v61, 0.0  ;;  %v124_v35 = vld [vmem:[%s7746_s1 + $0x34] sm:$0xff]   ;;  %v128_v41 = vld [vmem:[%s7746_s1 + $0x44] sm:$0xf]  ;;  %4653 = vmatpush3.bf16.msra.mxu1 %v4822_v29 }
  0x11   :  { %v154_v23 = vsel %vm7760_vm2, %v133_v62, 0.0  ;;  %v151_v25 = vadd.f32 %v150_v14, %v149_v19  ;;  %v156_v26 = vsel %vm7760_vm2, %v134_v63, 0.0  ;;  %v158_v30 = vsel %vm7760_vm2, %v135_v4, 0.0  ;;  %v4554_v62 = vld [vmem:[%s7748_s2 + $0x18] sm:$0xff]   ;;  %4654 = vmatprep.subr.bf16.mxu1 %v5015_v0 }
  0x12   :  { %v84_v24 = vadd.f32 %v83_v42, %v82_v16  ;;  %v160_v31 = vsel %vm7760_vm2, %v136_v5, 0.0  ;;  %v162_v32 = vsel %vm7760_vm2, %v137_v7, 0.0  ;;  %v164_v33 = vsel %vm7760_vm2, %v138_v9, 0.0 }
  0x13   :  { %v153_v36 = vadd.f32 %v152_v22, %v151_v25  ;;  %v166_v37 = vsel %vm7760_vm2, %v139_v17, 0.0  ;;  %v168_v39 = vsel %vm7760_vm2, %v140_v18, 0.0  ;;  %v4394_v50 = vunpack.c.l.bf16 %v4393_v27 }
  0x14   :  { %v86_v34 = vadd.f32 %v85_v44, %v84_v24  ;;  %v4553_v44 = vld [vmem:[%s7748_s2 + $0x10] sm:$0xff]   ;;  %v4395_v51 = vunpack.c.h.bf16 %v4393_v27  ;;  %v4398_v53 = vunpack.c.l.bf16 %v4552_v28  ;;  %v141_v63 = vunpack.c.h.bf16 %v5198_v59 }
  0x15   :  { %v155_v43 = vadd.f32 %v154_v23, %v153_v36  ;;  %v142_v1 = vunpack.c.l.bf16 %v124_v35  ;;  %v143_v2 = vunpack.c.h.bf16 %v124_v35  ;;  %v4399_v4 = vunpack.c.h.bf16 %v4552_v28 }
  0x16   :  { %v88_v42 = vadd.f32 %v87_v45, %v86_v34  ;;  %v4555_v45 = vld [vmem:[%s7748_s2 + $0x20] sm:$0xff]   ;;  %v144_v5 = vunpack.c.l.bf16 %v126_v40  ;;  %v145_v7 = vunpack.c.h.bf16 %v126_v40  ;;  %v146_v9 = vunpack.c.l.bf16 %v128_v41  ;;  %v4560_v41 = vld [vmem:[%s7749_s3 + $0x8] sm:$0xff]  }
  0x17   :  { %v157_v61 = vadd.f32 %v156_v26, %v155_v43  ;;  %v4402_v12 = vunpack.c.l.bf16 %v4553_v44  ;;  %v225_v13 = vsel %vm7760_vm2, %v4394_v50, 0.0  ;;  %v226_v14 = vsel %vm7760_vm2, %v4395_v51, 0.0  ;;  %v4429_v40 = vld [vmem:[%s7749_s3] sm:$0xff]   ;;  %v4556_v50 = vld [vmem:[%s7748_s2 + $0x28] sm:$0xff]  }
  0x18   :  { %v90_v54 = vadd.f32 %v5160_v46, %v88_v42  ;;  %v228_v15 = vsel %vm7760_vm2, %v4398_v53, 0.0  ;;  %v4403_v18 = vunpack.c.h.bf16 %v4553_v44  ;;  %v227_v19 = vadd.f32 %v226_v14, %v225_v13 }
  0x19   :  { %v159_v46 = vadd.f32 %v158_v30, %v157_v61  ;;  %v4406_v59 = vunpack.c.l.bf16 %v4554_v62  ;;  %v4407_v22 = vunpack.c.h.bf16 %v4554_v62  ;;  %v4410_v23 = vunpack.c.l.bf16 %v4555_v45 }
  0x1a   :  { %v92_v16 = vadd.f32 %v5173_v49, %v90_v54  ;;  %v230_v24 = vsel %vm7760_vm2, %v4399_v4, 0.0  ;;  %v170_v26 = vsel %vm7760_vm2, %v141_v63, 0.0  ;;  %v172_v27 = vsel %vm7760_vm2, %v142_v1, 0.0  ;;  %v4561_v63 = vld [vmem:[%s7749_s3 + $0x10] sm:$0xff]  }
  0x1b   :  { %v161_v17 = vadd.f32 %v160_v31, %v159_v46  ;;  %v229_v28 = vadd.f32 %v228_v15, %v227_v19  ;;  %v174_v29 = vsel %vm7760_vm2, %v143_v2, 0.0  ;;  %v176_v30 = vsel %vm7760_vm2, %v144_v5, 0.0  ;;  %v4562_v15 = vld [vmem:[%s7749_s3 + $0x18] sm:$0xff]  }
  0x1c   :  { %v178_v49 = vsel %vm7760_vm2, %v145_v7, 0.0  ;;  %v232_v31 = vsel %vm7760_vm2, %v4402_v12, 0.0  ;;  %v94_v34 = vadd.f32 %v5182_v55, %v92_v16  ;;  %v5281_v36 = vsel %vm7760_vm2, %v146_v9, 0.0 }
  0x1d   :  { %v163_v25 = vadd.f32 %v162_v32, %v161_v17  ;;  %v231_v32 = vadd.f32 %v230_v24, %v229_v28  ;;  %v234_v42 = vsel %vm7760_vm2, %v4403_v18, 0.0  ;;  %v236_v43 = vsel %vm7760_vm2, %v4406_v59, 0.0  ;;  %v4558_v28 = vld [vmem:[%s7748_s2 + $0x38] sm:$0xff]  }
  0x1e   :  { %v238_v44 = vsel %vm7760_vm2, %v4407_v22, 0.0  ;;  %v240_v55 = vsel %vm7760_vm2, %v4410_v23, 0.0  ;;  %v96_v53 = vadd.f32 %v5185_v56, %v94_v34  ;;  %v4411_v61 = vunpack.c.h.bf16 %v4555_v45  ;;  %v4557_v56 = vld [vmem:[%s7748_s2 + $0x30] sm:$0xff]  }
  0x1f   :  { %v165_v35 = vadd.f32 %v164_v33, %v163_v25  ;;  %v233_v51 = vadd.f32 %v232_v31, %v231_v32  ;;  %v4430_v1 = vunpack.c.l.bf16 %v4429_v40  ;;  %v4431_v2 = vunpack.c.h.bf16 %v4429_v40  ;;  %v4563_v40 = vld [vmem:[%s7749_s3 + $0x20] sm:$0xff]  }
  0x20   :  { %v4434_v4 = vunpack.c.l.bf16 %v4560_v41  ;;  %v4415_v9 = vunpack.c.h.bf16 %v4556_v50  ;;  %v4435_v46 = vunpack.c.h.bf16 %v4560_v41  ;;  %v98_v12 = vadd.f32 %v5188_v57, %v96_v53 }
  0x21   :  { %v167_v33 = vadd.f32 %v166_v37, %v165_v35  ;;  %v235_v62 = vadd.f32 %v234_v42, %v233_v51  ;;  %v4414_v37 = vunpack.c.l.bf16 %v4556_v50  ;;  %v242_v45 = vsel %vm7760_vm2, %v4411_v61, 0.0  ;;  %v4559_v51 = vld [vmem:[%s7748_s2 + $0x40] sm:$0xff]  }
  0x22   :  { %v4438_v14 = vunpack.c.l.bf16 %v4561_v63  ;;  %v303_v16 = vsel %vm7760_vm2, %v4430_v1, 0.0  ;;  %v304_v17 = vsel %vm7760_vm2, %v4431_v2, 0.0  ;;  %v306_v18 = vsel %vm7760_vm2, %v4434_v4, 0.0  ;;  %v4564_v4 = vld [vmem:[%s7749_s3 + $0x28] sm:$0xff]  }
  0x23   :  { %v169_v54 = vadd.f32 %v168_v39, %v167_v33  ;;  %v237_v7 = vadd.f32 %v236_v43, %v235_v62  ;;  %v305_v59 = vadd.f32 %v304_v17, %v303_v16  ;;  %v4418_v22 = vunpack.c.l.bf16 %v4557_v56  ;;  %v4565_v16 = vld [vmem:[%s7749_s3 + $0x30] sm:$0xff]  }
  0x24   :  { %v244_v23 = vsel %vm7760_vm2, %v4414_v37, 0.0  ;;  %v4439_v24 = vunpack.c.h.bf16 %v4561_v63  ;;  %v308_v25 = vsel %vm7760_vm2, %v4435_v46, 0.0  ;;  %v4419_v35 = vunpack.c.h.bf16 %v4557_v56 }
  0x25   :  { %v171_v5 = vadd.f32 %v170_v26, %v169_v54  ;;  %v239_v39 = vadd.f32 %v238_v44, %v237_v7  ;;  %v100_v26 = vadd.f32 %v5201_v60, %v98_v12  ;;  %v307_v34 = vadd.f32 %v306_v18, %v305_v59 }
  0x26   :  { %v4442_v32 = vunpack.c.l.bf16 %v4562_v15  ;;  %v310_v41 = vsel %vm7760_vm2, %v4438_v14, 0.0  ;;  %v4422_v60 = vunpack.c.l.bf16 %v4558_v28  ;;  %v4443_v44 = vunpack.c.h.bf16 %v4562_v15 }
  0x27   :  { %v173_v13 = vadd.f32 %v172_v27, %v171_v5  ;;  %v241_v19 = vadd.f32 %v240_v55, %v239_v39  ;;  %v309_v43 = vadd.f32 %v308_v25, %v307_v34  ;;  %v312_v55 = vsel %vm7760_vm2, %v4439_v24, 0.0 }
  0x28   :  { %v102_v33 = vadd.f32 %v5223_v20, %v100_v26  ;;  %v4423_v61 = vunpack.c.h.bf16 %v4558_v28  ;;  %v250_v62 = vsel %vm7760_vm2, %v4419_v35, 0.0  ;;  %v4446_v63 = vunpack.c.l.bf16 %v4563_v40 }
  0x29   :  { %v175_v57 = vadd.f32 %v174_v29, %v173_v13  ;;  %v243_v31 = vadd.f32 %v242_v45, %v241_v19  ;;  %v246_v29 = vsel %vm7760_vm2, %v4415_v9, 0.0  ;;  %v311_v54 = vadd.f32 %v310_v41, %v309_v43 }
  0x2a   :  { %v314_v1 = vsel %vm7760_vm2, %v4442_v32, 0.0  ;;  %v4426_v20 = vunpack.c.l.bf16 %v4559_v51  ;;  %v4447_v7 = vunpack.c.h.bf16 %v4563_v40  ;;  %v316_v37 = vsel %vm7760_vm2, %v4443_v44, 0.0 }
  0x2b   :  { %v177_v27 = vadd.f32 %v176_v30, %v175_v57  ;;  %v245_v42 = vadd.f32 %v244_v23, %v243_v31  ;;  %v248_v30 = vsel %vm7760_vm2, %v4418_v22, 0.0  ;;  %v313_v5 = vadd.f32 %v312_v55, %v311_v54 }
  0x2c   :  { %v104_v9 = vadd.f32 %v5226_v21, %v102_v33  ;;  %v4427_v56 = vunpack.c.h.bf16 %v4559_v51  ;;  %v254_v39 = vsel %vm7760_vm2, %v4423_v61, 0.0  ;;  %v4450_v45 = vunpack.c.l.bf16 %v4564_v4 }
  0x2d   :  { %v179_v50 = vadd.f32 %v178_v49, %v177_v27  ;;  %v247_v53 = vadd.f32 %v246_v29, %v245_v42  ;;  %v252_v49 = vsel %vm7760_vm2, %v4422_v60, 0.0  ;;  %v315_v13 = vadd.f32 %v314_v1, %v313_v5  ;;  %v4566_v27 = vld [vmem:[%s7749_s3 + $0x38] sm:$0xff]   ;;  %v4567_v60 = vld [vmem:[%s7749_s3 + $0x40] sm:$0xff]  }
  0x2e   :  { %v318_v14 = vsel %vm7760_vm2, %v4446_v63, 0.0  ;;  %v256_v18 = vsel %vm7760_vm2, %v4426_v20, 0.0  ;;  %v4451_v57 = vunpack.c.h.bf16 %v4564_v4  ;;  %v320_v21 = vsel %vm7760_vm2, %v4447_v7, 0.0 }
  0x2f   :  { %v249_v2 = vadd.f32 %v248_v30, %v247_v53  ;;  %v181_v46 = vadd.f32 %v5281_v36, %v179_v50  ;;  %v317_v17 = vadd.f32 %v316_v37, %v315_v13  ;;  %v105_v36 = vrot.slane %v104_v9, 4 }
  0x30   :  { %v258_v23 = vsel %vm7760_vm2, %v4427_v56, 0.0  ;;  %v4454_v24 = vunpack.c.l.bf16 %v4565_v16  ;;  %v322_v25 = vsel %vm7760_vm2, %v4450_v45, 0.0  ;;  %v4455_v31 = vunpack.c.h.bf16 %v4565_v16 }
  0x31   :  { %v251_v12 = vadd.f32 %v250_v62, %v249_v2  ;;  %v182_v19 = vrot.slane %v181_v46, 4  ;;  %v319_v22 = vadd.f32 %v318_v14, %v317_v17  ;;  %v324_v34 = vsel %vm7760_vm2, %v4451_v57, 0.0 }
  0x32   :  { %v106_v35 = vadd.f32 %v105_v36, %v104_v9  ;;  %v4458_v41 = vunpack.c.l.bf16 %v4566_v27  ;;  %v326_v42 = vsel %vm7760_vm2, %v4454_v24, 0.0  ;;  %v4459_v44 = vunpack.c.h.bf16 %v4566_v27  ;;  %v4825_v27 = vld [vmem:[%s7746_s1 + $0x8] sm:$0xff]  }
  0x33   :  { %v253_v15 = vadd.f32 %v252_v49, %v251_v12  ;;  %v321_v28 = vadd.f32 %v320_v21, %v319_v22  ;;  %v183_v29 = vadd.f32 %v182_v19, %v181_v46  ;;  %v328_v55 = vsel %vm7760_vm2, %v4455_v31, 0.0  ;;  %v5377_v31 = vld [vmem:[%s7745_s0 + $0x8] sm:$0xff]   ;;  %678 = vrot.lane.b32.xlu1 %v4825_v27, %s5017_s17 }
  0x34   :  { %v107_v33 = vrot.slane %v106_v35, 2  ;;  %v4462_v54 = vunpack.c.l.bf16 %v4567_v60  ;;  %v330_v61 = vsel %vm7760_vm2, %v4458_v41, 0.0  ;;  %v4463_v63 = vunpack.c.h.bf16 %v4567_v60 }
  0x35   :  { %v255_v59 = vadd.f32 %v254_v39, %v253_v15  ;;  %v323_v40 = vadd.f32 %v322_v25, %v321_v28  ;;  %v184_v50 = vrot.slane %v183_v29, 2  ;;  %v332_v1 = vsel %vm7760_vm2, %v4459_v44, 0.0  ;;  %v4823_v25 = vld [vmem:[%s7747_s5 + $0x18] sm:$0xff]   ;;  %v5372_v28 = vld [vmem:[%s7745_s0] sm:$0xff]   ;;  %s5022_s5 = smov 48  }
  0x36   :  { %v108_v2 = vadd.f32 %v107_v33, %v106_v35  ;;  %v334_v49 = vsel %vm7760_vm2, %v4462_v54, 0.0  ;;  %v336_v37 = vsel %vm7760_vm2, %v4463_v63, 0.0  ;;  %4655 = vmatpush3.bf16.msra.mxu1 %v4823_v25  ;;  %v4829_v35 = vld [vmem:[%s7748_s2] sm:$0xff]   ;;  %v708_v41 = vshrl.u32 %v5377_v31, 16 }
  0x37   :  { %v257_v26 = vadd.f32 %v256_v18, %v255_v59  ;;  %v325_v30 = vadd.f32 %v324_v34, %v323_v40  ;;  %v185_v4 = vadd.f32 %v184_v50, %v183_v29  ;;  %v5382_v34 = vld [vmem:[%s7745_s0 + $0x10] sm:$0xff]   ;;  %v697_v29 = vshrl.u32 %v5372_v28, 16 }
  0x38   :  { %v109_v9 = vrot.slane %v108_v2, 1  ;;  %v704_v40 = vshll.u32 %v5377_v31, 16  ;;  %vm695_vm3 = vsmask.f32 7424  ;;  %vm1022_vm4 = vcmask 1046528  }
  0x39   :  { %v259_v32 = vadd.f32 %v258_v23, %v257_v26  ;;  %v327_v53 = vadd.f32 %v326_v42, %v325_v30  ;;  %v186_v46 = vrot.slane %v185_v4, 1  ;;  %v4824_v26 = vld [vmem:[%s7746_s1] sm:$0xff]   ;;  %v712_v42 = vshll.u32 %v5382_v34, 16 }
  0x3a   :  { %v110_v39 = vadd.f32 %v109_v9, %v108_v2  ;;  %676 = vrot.lane.b32.xlu0 %v4824_v26, %s5017_s17  ;;  %v706_v30 = vrot.slane %v704_v40, 1  ;;  %v593_v9 = vld [vmem:[%s7746_s1 + $0x4] sm:$0xe]  ;;  %v1102_v25 = vrot.slane %v5170_v48, 1  ;;  %vm1135_vm5 = vsmask.f32 6400 }
  0x3b   :  { %v260_v43 = vrot.slane %v259_v32, 4  ;;  %v329_v62 = vadd.f32 %v328_v55, %v327_v53  ;;  %v187_v45 = vadd.f32 %v186_v46, %v185_v4  ;;  %v5397_v44 = vrot.slane %v712_v42, 1  ;;  %v5402_v53 = vld [vmem:[%s7748_s2 + $0x10] sm:$0xff]  }
  0x3c   :  { %v898_v55 = vshll.u32 %v4829_v35, 16  ;;  %v710_v50 = vor.u32 %v708_v41, %v706_v30  ;;  %vm429_vm6 = vcmask 523264   ;;  %vm7759_vm7 = vcmask 130048  }
  0x3d   :  { %v261_v51 = vadd.f32 %v260_v43, %v259_v32  ;;  %v331_v20 = vadd.f32 %v330_v61, %v329_v62  ;;  %v188_v17 = vadd.f32 %v187_v45, %v110_v39  ;;  %v699_v32 = vshll.u32 %v5372_v28, 16  ;;  %v4830_v43 = vld [vmem:[%s7748_s2 + $0x8] sm:$0xff]  }
  0x3e   :  { %v715_v61 = vsel %vm695_vm3, %v710_v50, %v5397_v44  ;;  %v896_v62 = vshrl.u32 %v4829_v35, 16  ;;  %v900_v63 = vrot.slane %v898_v55, 1  ;;  %v907_v4 = vshrl.u32 %v4830_v43, 16 }
  0x3f   :  { %v262_v5 = vrot.slane %v261_v51, 2  ;;  %v333_v7 = vadd.f32 %v332_v1, %v331_v20  ;;  %v701_v60 = vrot.slane %v699_v32, 1  ;;  %766 = vrot.lane.b32.xlu1 %v715_v61, %s5018_s22  ;;  %v591_v1 = vld [vmem:[%s7745_s0 + $0x4] sm:$0xe]  ;;  %v4300_v39 = vcombine.low %v593_v9, %v5151_v38  ;;  %v4841_v61 = vld [vmem:[%s7746_s1 + $0x18] sm:$0xff]  }
  0x40   :  { %v4831_v20 = vld [vmem:[%s7749_s3] sm:$0xff]   ;;  %vm7758_vm8 = vcmask 195584   ;;  %vm7757_vm9 = vcmask 261120   ;;  %vm511_vm10 = vcmask 326656   ;;  %vm513_vm11 = vcmask 392192  }
  0x41   :  { %v263_v12 = vadd.f32 %v262_v5, %v261_v51  ;;  %v335_v13 = vadd.f32 %v334_v49, %v333_v7  ;;  %v702_v33 = vor.u32 %v701_v60, %v697_v29  ;;  %v903_v51 = vshll.u32 %v4830_v43, 16 }
  0x42   :  { %v911_v5 = vshll.u32 %v5402_v53, 16  ;;  %v901_v49 = vor.u32 %v900_v63, %v896_v62  ;;  %v4291_v7 = vcombine.low %v591_v1, %v5087_v3  ;;  %vm515_vm12 = vcmask 457728  }
  0x43   :  { %v337_v56 = vadd.f32 %v336_v37, %v335_v13  ;;  %v264_v14 = vrot.slane %v263_v12, 1  ;;  %v707_v54 = vsel %vm695_vm3, %v702_v33, %v706_v30  ;;  %v905_v2 = vrot.slane %v903_v51, 1  ;;  %822 = vrot.lane.b32.xlu1 %v4830_v43, %s5019_s25  ;;  %v4832_v37 = vld [vmem:[%s7749_s3 + $0x8] sm:$0xff]   ;;  %v5464_v43 = vld [vmem:[%s7745_s0 + $0x20] sm:$0xff]  }
  0x44   :  { %764 = vrot.lane.b32.xlu0 %v707_v54, %s5018_s22  ;;  %v1023_v3 = vrot.slane %v4291_v7, 1  ;;  %v1137_v45 = vshrl.u32 %v4291_v7, 16  ;;  %v716_v30 = vshrl.u32 %v5382_v34, 16  ;;  %v728_v51 = vshll.u32 %v5464_v43, 16  ;;  %v4840_v54 = vld [vmem:[%s7746_s1 + $0x10] sm:$0xff]  }
  0x45   :  { %v338_v15 = vrot.slane %v337_v56, 4  ;;  %v265_v18 = vadd.f32 %v264_v14, %v263_v12  ;;  %v909_v46 = vor.u32 %v907_v4, %v905_v2  ;;  %v5425_v12 = vrot.slane %v911_v5, 1 }
  0x46   :  { %v906_v13 = vsel %vm695_vm3, %v901_v49, %v905_v2  ;;  %v1140_v14 = vshll.u32 %v4291_v7, 16  ;;  %v718_v62 = vor.u32 %v716_v30, %v5397_v44  ;;  %v5483_v1 = vrot.slane %v728_v51, 1  ;;  %v4844_v2 = vld [vmem:[%s7748_s2 + $0x18] sm:$0xff]   ;;  %v5496_v44 = vld [vmem:[%s7748_s2 + $0x20] sm:$0xff]   ;;  %v4853_v30 = vld [vmem:[%s7746_s1 + $0x28] sm:$0xff]  }
  0x47   :  { %v339_v16 = vadd.f32 %v338_v15, %v337_v56  ;;  %v266_v36 = vadd.f32 %v265_v18, %v188_v17  ;;  %v1024_v56 = vrot.slane %v5093_v6, 1  ;;  %878 = vrot.lane.b32.xlu1 %v4832_v37, %s5020_s11  ;;  %v1145_v15 = vshrl.u32 %v5093_v6, 16 }
  0x48   :  { %820 = vrot.lane.b32.xlu0 %v4829_v35, %s5019_s25  ;;  %v914_v17 = vsel %vm695_vm3, %v909_v46, %v5425_v12  ;;  %v1026_v18 = vrot.slane %v5101_v8, 1  ;;  %v5450_v35 = vld [vmem:[%s7745_s0 + $0x18] sm:$0xff]   ;;  %v915_v49 = vshrl.u32 %v5402_v53, 16  ;;  %v923_v37 = vshrl.u32 %v4844_v2, 16  ;;  %v4845_v46 = vld [vmem:[%s7749_s3 + $0x10] sm:$0xff]  }
  0x49   :  { %v340_v57 = vrot.slane %v339_v16, 2  ;;  %v1025_v38 = vsel %vm1022_vm4, %v1023_v3, %v1024_v56  ;;  %v720_v42 = vshll.u32 %v5450_v35, 16  ;;  %v724_v50 = vshrl.u32 %v5450_v35, 16 }
  0x4a   :  { %v927_v9 = vshll.u32 %v5496_v44, 16  ;;  %v917_v3 = vor.u32 %v915_v49, %v5425_v12  ;;  %v1030_v12 = vrot.slane %v5112_v11, 1  ;;  %vm1360_vm13 = vcmask 588800  }
  0x4b   :  { %v341_v21 = vadd.f32 %v340_v57, %v339_v16  ;;  %v1148_v16 = vshll.u32 %v5093_v6, 16  ;;  %v1154_v57 = vshrl.u32 %v5101_v8, 16  ;;  %965 = vrot.lane.b32.xlu1 %v914_v17, %s5021_s12  ;;  %v1139_v6 = vrot.slane %v1137_v45, 1 }
  0x4c   :  { %876 = vrot.lane.b32.xlu0 %v4831_v20, %s5020_s11  ;;  %v722_v33 = vrot.slane %v720_v42, 1  ;;  %v919_v20 = vshll.u32 %v4844_v2, 16  ;;  %v1028_v45 = vrot.slane %v5107_v10, 1  ;;  %v1172_v17 = vshrl.u32 %v5112_v11, 16 }
  0x4d   :  { %v342_v19 = vrot.slane %v341_v21, 1  ;;  %v1156_v26 = vrot.slane %v1154_v57, 1  ;;  %v1175_v57 = vshll.u32 %v5112_v11, 16 }
  0x4e   :  { %v726_v63 = vor.u32 %v724_v50, %v722_v33  ;;  %v723_v4 = vsel %vm695_vm3, %v718_v62, %v722_v33  ;;  %v921_v7 = vrot.slane %v919_v20, 1 }
  0x4f   :  { %v343_v59 = vadd.f32 %v342_v19, %v341_v21  ;;  %v1157_v21 = vshll.u32 %v5101_v8, 16  ;;  %v1100_v19 = vrot.slane %v5165_v47, 1 }
  0x50   :  { %963 = vrot.lane.b32.xlu0 %v906_v13, %s5021_s12  ;;  %v731_v5 = vsel %vm695_vm3, %v726_v63, %v5483_v1  ;;  %v4846_v13 = vld [vmem:[%s7749_s3 + $0x18] sm:$0xff]  }
  0x51   :  { %v344_v22 = vadd.f32 %v343_v59, %v266_v36  ;;  %v1099_v36 = vrot.slane %v4300_v39, 1  ;;  %v1142_v59 = vrot.slane %v1140_v14, 2  ;;  %v1159_v27 = vrot.slane %v1157_v21, 2 }
  0x52   :  { %v1103_v40 = vsel %vm1022_vm4, %v1100_v19, %v1102_v25  ;;  %v5512_v39 = vrot.slane %v927_v9, 1  ;;  %v1163_v14 = vshrl.u32 %v5107_v10, 16  ;;  %v1029_v21 = vsel %vm1022_vm4, %v1026_v18, %v1028_v45 }
  0x53   :  { %v345_v23 = vmul.f32 0.00390625, %v344_v22  ;;  %v1147_v22 = vrot.slane %v1145_v15, 1  ;;  %v1101_v47 = vsel %vm1022_vm4, %v1099_v36, %v1100_v19  ;;  %v1143_v29 = vor.u32 %v1142_v59, %v1139_v6 }
  0x54   :  { %1040 = vrot.lane.b32.xlu0 %v1025_v38, %s5022_s5  ;;  %v5458_v41 = vor.u32 %v1159_v27, %v1156_v26  ;;  %v1166_v15 = vshll.u32 %v5107_v10, 16  ;;  %v1104_v38 = vrot.slane %v5178_v52, 1  ;;  %v1165_v10 = vrot.slane %v1163_v14, 1 }
  0x55   :  { %v346_v24 = vpack.c.bf16 %v345_v23, %v345_v23  ;;  %v1150_v23 = vrot.slane %v1148_v16, 2  ;;  %v1031_v19 = vsel %vm1022_vm4, %v1028_v45, %v1030_v12  ;;  %v1106_v6 = vrot.slane %v5193_v58, 1 }
  0x56   :  { %v1168_v36 = vrot.slane %v1166_v15, 2  ;;  %v1174_v59 = vrot.slane %v1172_v17, 1  ;;  %v1105_v8 = vsel %vm1022_vm4, %v1102_v25, %v1104_v38 }
  0x57   :  { %4645 = vmatmul.mubr.msk.bf16.vlgmr.msra.gmra.mrb[0].mxu0 %vm7760_vm2, %v346_v24  ;;  %v1027_v24 = vsel %vm1022_vm4, %v1024_v56, %v1026_v18  ;;  %v1151_v32 = vor.u32 %v1150_v23, %v1147_v22  ;;  %v925_v56 = vor.u32 %v923_v37, %v921_v7  ;;  %v1177_v22 = vrot.slane %v1175_v57, 2 }
  0x58   :  { %1042 = vrot.lane.b32.xlu1 %v1027_v24, %s5022_s5  ;;  %1116 = vrot.lane.b32.xlu0 %v1101_v47, %s5023_s4  ;;  %v1169_v18 = vor.u32 %v1168_v36, %v1165_v10  ;;  %v1107_v52 = vsel %vm1022_vm4, %v1104_v38, %v1106_v6 }
  0x59   :  { %v1152_v60 = vsel %vm1135_vm5, %v1143_v29, %v1151_v32  ;;  %v1161_v55 = vsel %vm1135_vm5, %v1151_v32, %v5458_v41  ;;  %v930_v16 = vsel %vm695_vm3, %v925_v56, %v5512_v39  ;;  %v5543_v23 = vor.u32 %v1177_v22, %v1174_v59  ;;  %v5610_v22 = vld [vmem:[%s7748_s2 + $0x30] sm:$0xff]  }
  0x5a   :  { %v1170_v24 = vsel %vm1135_vm5, %v5458_v41, %v1169_v18  ;;  %v4852_v41 = vld [vmem:[%s7746_s1 + $0x20] sm:$0xff]  }
  0x5b   :  { %v1179_v26 = vsel %vm1135_vm5, %v1169_v18, %v5543_v23 }
  0x5c   :  { %1118 = vrot.lane.b32.xlu1 %v1103_v40, %s5023_s4  ;;  %1216 = vrot.lane.b32.xlu0 %v1152_v60, %s5024_s18  ;;  %v5557_v40 = vld [vmem:[%s7745_s0 + $0x28] sm:$0xff]   ;;  %v5566_v60 = vld [vmem:[%s7745_s0 + $0x30] sm:$0xff]  }
  0x5d   :  { %v736_v42 = vshll.u32 %v5557_v40, 16  ;;  %v740_v50 = vshrl.u32 %v5557_v40, 16  ;;  %v744_v51 = vshll.u32 %v5566_v60, 16 }
  0x5f   :  { %v738_v33 = vrot.slane %v736_v42, 1  ;;  %v5577_v62 = vrot.slane %v744_v51, 1 }
  0x60   :  { %1218 = vrot.lane.b32.xlu1 %v1161_v55, %s5024_s18  ;;  %680 = vrot.lane.b32.xlu0 %v4840_v54, %s5017_s17  ;;  %v732_v55 = vshrl.u32 %v5464_v43, 16 }
  0x62   :  { %v734_v54 = vor.u32 %v732_v55, %v5483_v1 }
  0x64   :  { %682 = vrot.lane.b32.xlu1 %v4841_v61, %s5017_s17  ;;  %768 = vrot.lane.b32.xlu0 %v723_v4, %s5018_s22  ;;  %v742_v61 = vor.u32 %v740_v50, %v738_v33  ;;  %v739_v63 = vsel %vm695_vm3, %v734_v54, %v738_v33 }
  0x68   :  { %770 = vrot.lane.b32.xlu1 %v731_v5, %s5018_s22  ;;  %824 = vrot.lane.b32.xlu0 %v5402_v53, %s5019_s25  ;;  %v922_v53 = vsel %vm695_vm3, %v917_v3, %v921_v7 }
  0x6c   :  { %826 = vrot.lane.b32.xlu1 %v4844_v2, %s5019_s25  ;;  %880 = vrot.lane.b32.xlu0 %v4845_v46, %s5020_s11  ;;  %v747_v2 = vsel %vm695_vm3, %v742_v61, %v5577_v62  ;;  %v5009_v61 = vld [vmem:[%s7746_s1 + $0x2c] sm:$0xff]  }
  0x70   :  { %882 = vrot.lane.b32.xlu1 %v4846_v13, %s5020_s11  ;;  %967 = vrot.lane.b32.xlu0 %v922_v53, %s5021_s12 }
  0x74   :  { %969 = vrot.lane.b32.xlu1 %v930_v16, %s5021_s12  ;;  %1044 = vrot.lane.b32.xlu0 %v1029_v21, %s5022_s5 }
  0x78   :  { %1046 = vrot.lane.b32.xlu1 %v1031_v19, %s5022_s5  ;;  %1120 = vrot.lane.b32.xlu0 %v1105_v8, %s5023_s4  ;;  %v4856_v19 = vld [vmem:[%s7748_s2 + $0x28] sm:$0xff]  }
  0x79   :  { %v935_v59 = vshll.u32 %v4856_v19, 16 }
  0x7b   :  { %v937_v18 = vrot.slane %v935_v59, 1 }
  0x7c   :  { %1122 = vrot.lane.b32.xlu1 %v1107_v52, %s5023_s4  ;;  %1220 = vrot.lane.b32.xlu0 %v1170_v24, %s5024_s18  ;;  %v939_v52 = vshrl.u32 %v4856_v19, 16  ;;  %v943_v24 = vshll.u32 %v5610_v22, 16 }
  0x80   :  { %1222 = vrot.lane.b32.xlu1 %v1179_v26, %s5024_s18  ;;  %684 = vrot.lane.b32.xlu0 %v4852_v41, %s5017_s17  ;;  %v931_v26 = vshrl.u32 %v5496_v44, 16  ;;  %v5007_v41 = vld [vmem:[%s7745_s0 + $0x2c] sm:$0xff]  }
  0x81   :  { %v1184_v55 = vshll.u32 %v5007_v41, 16  ;;  %v1032_v51 = vrot.slane %v5007_v41, 1 }
  0x84   :  { %686 = vrot.lane.b32.xlu1 %v4853_v30, %s5017_s17  ;;  %772 = vrot.lane.b32.xlu0 %v739_v63, %s5018_s22  ;;  %v1181_v30 = vshrl.u32 %v5007_v41, 16  ;;  %v5660_v63 = vld [vmem:[%s7746_s1 + $0x34] sm:$0xff]  }
  0x85   :  { %v4869_v41 = vld [vmem:[%s7749_s3 + $0x38] sm:$0xff]  }
  0x88   :  { %774 = vrot.lane.b32.xlu1 %v747_v2, %s5018_s22 }
  0xa5   :  { %v5616_v8 = vpop.permute.xlu1 %678 }
  0xac   :  { %v677_v4 = vpop.permute.xlu0 %676 }
  0xad   :  { %v1233_v20 = vsel %vm7760_vm2, %v5372_v28, %v677_v4  ;;  %v1183_v4 = vrot.slane %v1181_v30, 1  ;;  %v4870_v30 = vld [vmem:[%s7749_s3 + $0x30] sm:$0xff]  }
  0xb6   :  { %v765_v5 = vpop.permute.xlu0 %764 }
  0xb7   :  { %v1249_v1 = vsel %vm7759_vm7, %v1233_v20, %v765_v5  ;;  %v1186_v5 = vrot.slane %v1184_v55, 2 }
  0xba   :  { %v821_v49 = vpop.permute.xlu0 %820 }
  0xbb   :  { %v1265_v37 = vsel %vm7758_vm8, %v1249_v1, %v821_v49 }
  0xbe   :  { %v877_v7 = vpop.permute.xlu0 %876 }
  0xbf   :  { %v1281_v46 = vsel %vm7757_vm9, %v1265_v37, %v877_v7  ;;  %v1033_v7 = vsel %vm1022_vm4, %v1030_v12, %v1032_v51  ;;  %v1108_v37 = vrot.slane %v5009_v61, 1 }
  0xc1   :  { %v1109_v12 = vsel %vm1022_vm4, %v1106_v6, %v1108_v37 }
  0xc2   :  { %v964_v9 = vpop.permute.xlu0 %963 }
  0xc3   :  { %v1297_v13 = vsel %vm511_vm10, %v1281_v46, %v964_v9  ;;  %v1110_v9 = vrot.slane %v5660_v63, 1  ;;  %v5676_v46 = vld [vmem:[%s7745_s0 + $0x38] sm:$0xff]  }
  0xc4   :  { %v756_v58 = vshrl.u32 %v5676_v46, 16 }
  0xc5   :  { %v1111_v11 = vsel %vm1022_vm4, %v1108_v37, %v1110_v9 }
  0xc6   :  { %v1041_v3 = vpop.permute.xlu0 %1040 }
  0xc7   :  { %v1313_v56 = vsel %vm513_vm11, %v1297_v13, %v1041_v3  ;;  %v1187_v3 = vor.u32 %v1186_v5, %v1183_v4 }
  0xca   :  { %v1117_v28 = vpop.permute.xlu0 %1116 }
  0xcb   :  { %v1329_v53 = vsel %vm515_vm12, %v1313_v56, %v1117_v28  ;;  %v4867_v28 = vld [vmem:[%s7745_s0 + $0x40] ss:$0 sps:$4 sm:$0x11]  }
  0xcc   :  { %v760_v6 = vshll.u32 %v4867_v28, 16 }
  0xce   :  { %v1217_v45 = vpop.permute.xlu0 %1216 }
  0xcf   :  { %v1345_v14 = vsel %vm429_vm6, %v1329_v53, %v1217_v45  ;;  %v752_v53 = vshll.u32 %v5676_v46, 16 }
  0xd0   :  { %4662 = vmatprep.mubr.msk.bf16.mxu0 %vm1360_vm13, %v1345_v14  ;;  %v1188_v14 = vsel %vm1135_vm5, %v5543_v23, %v1187_v3  ;;  %v4864_v23 = vld [vmem:[%s7746_s1 + $0x38] sm:$0xff]  }
 0x12a   :  { %v389_v48 = vpop.f32.mrb[0].mxu0 }
 0x12b   :  { %v395_v25 = vmax.f32 %v389_v48, 0.0  ;;  %v4646_v27 = vpop.f32.mrb[1].mxu0  ;;  %v941_v48 = vor.u32 %v939_v52, %v937_v18 }
 0x12c   :  { %v392_v47 = vpop.f32.mrb[2].mxu0  ;;  %v933_v27 = vor.u32 %v931_v26, %v5512_v39  ;;  %v5644_v39 = vld [vmem:[%s7745_s0 + $0x34] sm:$0xff]  }
 0x12d   :  { %v396_v29 = vpack.c.bf16 %v395_v25, %v395_v25  ;;  %v4647_v32 = vpop.f32.mrb[3].mxu0  ;;  %v5624_v25 = vrot.slane %v943_v24, 1  ;;  %v4857_v47 = vld [vmem:[%s7749_s3 + $0x28] sm:$0xff]   ;;  %v1190_v33 = vshrl.u32 %v5644_v39, 16  ;;  %v1193_v50 = vshll.u32 %v5644_v39, 16 }
 0x12e   :  { %v5636_v32 = vpop.permute.xlu1 %766  ;;  %v938_v42 = vsel %vm695_vm3, %v933_v27, %v937_v18  ;;  %v1034_v54 = vrot.slane %v5644_v39, 1  ;;  %v4871_v18 = vld [vmem:[%s7748_s2 + $0x40] ss:$0 sps:$4 sm:$0x11]  }
 0x12f   :  { %4657 = vmatmul.mubr.msk.bf16.vlgmr.msra.gmra.mrb[0].mxu1 %vm429_vm6, %v396_v29  ;;  %v4858_v29 = vld [vmem:[%s7749_s3 + $0x20] sm:$0xff]   ;;  %v1192_v20 = vrot.slane %v1190_v33, 1  ;;  %v1195_v49 = vrot.slane %v1193_v50, 2 }
 0x130   :  { %v1035_v1 = vsel %vm1022_vm4, %v1032_v51, %v1034_v54  ;;  %v5011_v33 = vld [vmem:[%s7745_s0 + $0x3c] sm:$0xff]   ;;  %v4873_v50 = vld [vmem:[%s7745_s0 + $0x44] ss:$0 sps:$4 sm:$0x11]  }
 0x131   :  { %v5682_v56 = vor.u32 %v1195_v49, %v1192_v20  ;;  %v4876_v51 = vld [vmem:[%s7745_s0 + $0x44] ss:$0 sps:$4 sm:$0x33]   ;;  %v1036_v4 = vrot.slane %v5011_v33, 1  ;;  %v1038_v5 = vrot.slane %v4873_v50, 1  ;;  %v5012_v20 = vld [vmem:[%s7746_s1 + $0x3c] sm:$0xff]  }
 0x132   :  { %v5662_v2 = vpop.permute.xlu1 %822  ;;  %v4875_v49 = vld [vmem:[%s7746_s1 + $0x44] ss:$0 sps:$4 sm:$0x11]   ;;  %v1208_v37 = vshrl.u32 %v4876_v51, 16  ;;  %v1112_v28 = vrot.slane %v5012_v20, 1 }
 0x133   :  { %v1197_v45 = vsel %vm1135_vm5, %v1187_v3, %v5682_v56  ;;  %v1211_v3 = vshll.u32 %v4876_v51, 16  ;;  %v519_v51 = vlaneseq }
 0x134   :  { %v1113_v39 = vsel %vm1022_vm4, %v1110_v9, %v1112_v28 }
 0x136   :  { %v5680_v13 = vpop.permute.xlu1 %878 }
 0x202   :  { %v467_v15 = vpop.f32.mrb[0].mxu1 }
 0x203   :  { %v4256_v16 = vmul.f32 -1.442695, %v467_v15  ;;  %v4658_v17 = vpop.f32.mrb[1].mxu1  ;;  %v754_v15 = vrot.slane %v752_v53, 1  ;;  %v1114_v53 = vrot.slane %v4875_v49, 1  ;;  %v1235_v49 = vsel %vm7760_vm2, %v5377_v31, %v5616_v8 }
 0x204   :  { %v470_v57 = vpop.f32.mrb[2].mxu1  ;;  %v5702_v17 = vpop.permute.xlu1 %965 }
 0x205   :  { %4899 = vpow2.f32 %v4256_v16  ;;  %v4659_v21 = vpop.f32.mrb[3].mxu1  ;;  %v748_v16 = vshrl.u32 %v5566_v60, 16  ;;  %v4868_v57 = vld [vmem:[%s7748_s2 + $0x38] sm:$0xff]  }
 0x206   :  { %v4865_v21 = vld [vmem:[%s7746_s1 + $0x30] sm:$0xff]   ;;  %v951_v59 = vshll.u32 %v4868_v57, 16  ;;  %v955_v27 = vshrl.u32 %v4868_v57, 16 }
 0x208   :  { %v5721_v52 = vpop.permute.xlu1 %1042 }
 0x20f   :  { %v4900_v38 = vpop.eup %4899 }
 0x210   :  { %v476_v10 = vadd.f32 1.0, %v4900_v38  ;;  %v758_v38 = vor.u32 %v756_v58, %v754_v15  ;;  %v1213_v58 = vrot.slane %v1211_v3, 2 }
 0x212   :  { %4901 = vrcp.f32 %v476_v10  ;;  %v762_v10 = vrot.slane %v760_v6, 1  ;;  %v681_v6 = vpop.permute.xlu0 %680 }
 0x214   :  { %v763_v24 = vsel %vm695_vm3, %v758_v38, %v762_v10 }
 0x21c   :  { %v5594_v36 = vpop.eup %4901 }
 0x21d   :  { %486 = vrot.lane.b32.xlu1 %v5594_v36, %s5019_s25  ;;  %480 = vrot.lane.b32.xlu0 %v5594_v36, %s5017_s17 }
 0x221   :  { %489 = vrot.lane.b32.xlu1 %v5594_v36, %s5020_s11  ;;  %483 = vrot.lane.b32.xlu0 %v5594_v36, %s5018_s22 }
 0x225   :  { %495 = vrot.lane.b32.xlu1 %v5594_v36, %s5022_s5  ;;  %492 = vrot.lane.b32.xlu0 %v5594_v36, %s5021_s12 }
 0x229   :  { %501 = vrot.lane.b32.xlu1 %v5594_v36, %s5024_s18  ;;  %498 = vrot.lane.b32.xlu0 %v5594_v36, %s5023_s4 }
 0x22d   :  { %830 = vrot.lane.b32.xlu1 %v4856_v19, %s5019_s25  ;;  %828 = vrot.lane.b32.xlu0 %v5496_v44, %s5019_s25  ;;  %v946_v44 = vsel %vm695_vm3, %v941_v48, %v5624_v25  ;;  %v750_v19 = vor.u32 %v748_v16, %v5577_v62  ;;  %v953_v48 = vrot.slane %v951_v59, 1  ;;  %v947_v62 = vshrl.u32 %v5610_v22, 16 }
 0x22f   :  { %v755_v26 = vsel %vm695_vm3, %v750_v19, %v754_v15  ;;  %v949_v55 = vor.u32 %v947_v62, %v5624_v25  ;;  %v1210_v15 = vrot.slane %v1208_v37, 1  ;;  %v1237_v37 = vsel %vm7760_vm2, %v5382_v34, %v681_v6 }
 0x231   :  { %886 = vrot.lane.b32.xlu1 %v4857_v47, %s5020_s11  ;;  %884 = vrot.lane.b32.xlu0 %v4858_v29, %s5020_s11  ;;  %v959_v47 = vshll.u32 %v4871_v18, 16  ;;  %v5728_v29 = vpop.permute.xlu1 %1118  ;;  %v954_v25 = vsel %vm695_vm3, %v949_v55, %v953_v48 }
 0x235   :  { %973 = vrot.lane.b32.xlu1 %v946_v44, %s5021_s12  ;;  %971 = vrot.lane.b32.xlu0 %v938_v42, %s5021_s12  ;;  %v957_v44 = vor.u32 %v955_v27, %v953_v48  ;;  %v961_v42 = vrot.slane %v959_v47, 1  ;;  %v5750_v61 = vpop.permute.xlu1 %1218 }
 0x239   :  { %1050 = vrot.lane.b32.xlu1 %v1035_v1, %s5022_s5  ;;  %1048 = vrot.lane.b32.xlu0 %v1033_v7, %s5022_s5  ;;  %v1199_v1 = vshrl.u32 %v5011_v33, 16  ;;  %v1202_v7 = vshll.u32 %v5011_v33, 16  ;;  %v683_v16 = vpop.permute.xlu1 %682 }
 0x23a   :  { %v1239_v6 = vsel %vm7760_vm2, %v5450_v35, %v683_v16 }
 0x23d   :  { %1126 = vrot.lane.b32.xlu1 %v1111_v11, %s5023_s4  ;;  %1124 = vrot.lane.b32.xlu0 %v1109_v12, %s5023_s4  ;;  %v1039_v11 = vsel %vm1022_vm4, %v1036_v4, %v1038_v5  ;;  %v1037_v12 = vsel %vm1022_vm4, %v1034_v54, %v1036_v4  ;;  %v1214_v54 = vor.u32 %v1213_v58, %v1210_v15  ;;  %v771_v38 = vpop.permute.xlu1 %770  ;;  %v518_v58 = vld [vmem:[%s7750_s6] sm:$0xff] }
 0x241   :  { %1226 = vrot.lane.b32.xlu1 %v1197_v45, %s5024_s18  ;;  %1224 = vrot.lane.b32.xlu0 %v1188_v14, %s5024_s18  ;;  %v1201_v45 = vrot.slane %v1199_v1, 1  ;;  %v1204_v14 = vrot.slane %v1202_v7, 2  ;;  %v827_v59 = vpop.permute.xlu1 %826  ;;  %v5808_v7 = vshrl.u32 %v519_v51, 7 }
 0x245   :  { %690 = vrot.lane.b32.xlu1 %v4864_v23, %s5017_s17  ;;  %688 = vrot.lane.b32.xlu0 %v4865_v21, %s5017_s17  ;;  %v1205_v23 = vor.u32 %v1204_v14, %v1201_v45  ;;  %v769_v21 = vpop.permute.xlu0 %768  ;;  %v5780_v18 = vpop.permute.xlu1 %882 }
 0x247   :  { %v1215_v10 = vsel %vm1135_vm5, %v1205_v23, %v1214_v54  ;;  %v1206_v19 = vsel %vm1135_vm5, %v5682_v56, %v1205_v23 }
 0x249   :  { %778 = vrot.lane.b32.xlu1 %v763_v24, %s5018_s22  ;;  %776 = vrot.lane.b32.xlu0 %v755_v26, %s5018_s22  ;;  %v825_v63 = vpop.permute.xlu0 %824  ;;  %v5782_v26 = vpop.permute.xlu1 %969 }
 0x24d   :  { %834 = vrot.lane.b32.xlu1 %v4868_v57, %s5019_s25  ;;  %832 = vrot.lane.b32.xlu0 %v5610_v22, %s5019_s25  ;;  %v962_v22 = vsel %vm695_vm3, %v957_v44, %v961_v42  ;;  %v1115_v57 = vsel %vm1022_vm4, %v1112_v28, %v1114_v53  ;;  %v881_v9 = vpop.permute.xlu0 %880  ;;  %v5784_v27 = vpop.permute.xlu1 %1046  ;;  %v1253_v28 = vsel %vm7759_vm7, %v1237_v37, %v769_v21  ;;  %v521_v53 = vsub.s32 0, %v5808_v7 }
 0x24e   :  { %v1269_v15 = vsel %vm7758_vm8, %v1253_v28, %v825_v63 }
 0x251   :  { %890 = vrot.lane.b32.xlu1 %v4869_v41, %s5020_s11  ;;  %888 = vrot.lane.b32.xlu0 %v4870_v30, %s5020_s11  ;;  %v968_v24 = vpop.permute.xlu0 %967  ;;  %v5788_v62 = vpop.permute.xlu1 %1122 }
 0x255   :  { %977 = vrot.lane.b32.xlu1 %v962_v22, %s5021_s12  ;;  %975 = vrot.lane.b32.xlu0 %v954_v25, %s5021_s12  ;;  %v1045_v48 = vpop.permute.xlu0 %1044  ;;  %v5792_v41 = vpop.permute.xlu1 %1222 }
 0x259   :  { %1054 = vrot.lane.b32.xlu1 %v1039_v11, %s5022_s5  ;;  %1052 = vrot.lane.b32.xlu0 %v1037_v12, %s5022_s5  ;;  %v5786_v47 = vpop.permute.xlu0 %1120  ;;  %v5794_v42 = vpop.permute.xlu1 %686  ;;  %v1251_v12 = vsel %vm7759_vm7, %v1235_v49, %v5636_v32 }
 0x25a   :  { %v1267_v14 = vsel %vm7758_vm8, %v1251_v12, %v5662_v2  ;;  %v1285_v2 = vsel %vm7757_vm9, %v1269_v15, %v881_v9 }
 0x25d   :  { %1130 = vrot.lane.b32.xlu1 %v1115_v57, %s5023_s4  ;;  %1128 = vrot.lane.b32.xlu0 %v1113_v39, %s5023_s4  ;;  %v5790_v56 = vpop.permute.xlu0 %1220  ;;  %v5798_v55 = vpop.permute.xlu1 %774  ;;  %v1283_v39 = vsel %vm7757_vm9, %v1267_v14, %v5680_v13 }
 0x261   :  { %1230 = vrot.lane.b32.xlu1 %v1215_v10, %s5024_s18  ;;  %1228 = vrot.lane.b32.xlu0 %v1206_v19, %s5024_s18  ;;  %v685_v44 = vpop.permute.xlu0 %684  ;;  %v1255_v10 = vsel %vm7759_vm7, %v1239_v6, %v771_v38  ;;  %v1299_v19 = vsel %vm511_vm10, %v1283_v39, %v5702_v17 }
 0x262   :  { %v1271_v35 = vsel %vm7758_vm8, %v1255_v10, %v827_v59  ;;  %v1315_v16 = vsel %vm513_vm11, %v1299_v19, %v5721_v52 }
 0x263   :  { %v1287_v38 = vsel %vm7757_vm9, %v1271_v35, %v5780_v18 }
 0x264   :  { %v1303_v52 = vsel %vm511_vm10, %v1287_v38, %v5782_v26 }
 0x265   :  { %v5796_v30 = vpop.permute.xlu0 %772 }
 0x28f   :  { %v487_v33 = vpop.permute.xlu1 %486  ;;  %v481_v50 = vpop.permute.xlu0 %480 }
 0x290   :  { %v504_v22 = vsel %vm7760_vm2, %v5594_v36, %v481_v50 }
 0x293   :  { %v490_v25 = vpop.permute.xlu1 %489  ;;  %v484_v4 = vpop.permute.xlu0 %483 }
 0x294   :  { %v506_v5 = vsel %vm7759_vm7, %v504_v22, %v484_v4 }
 0x295   :  { %v508_v20 = vsel %vm7758_vm8, %v506_v5, %v487_v33  ;;  %v1301_v33 = vsel %vm511_vm10, %v1285_v2, %v968_v24  ;;  %v1331_v24 = vsel %vm515_vm12, %v1315_v16, %v5728_v29  ;;  %v1319_v29 = vsel %vm513_vm11, %v1303_v52, %v5784_v27 }
 0x296   :  { %v510_v1 = vsel %vm7757_vm9, %v508_v20, %v490_v25  ;;  %v1317_v17 = vsel %vm513_vm11, %v1301_v33, %v1045_v48  ;;  %v1347_v48 = vsel %vm429_vm6, %v1331_v24, %v5750_v61  ;;  %v1241_v25 = vsel %vm7760_vm2, %v5464_v43, %v685_v44 }
 0x297   :  { %v496_v3 = vpop.permute.xlu1 %495  ;;  %v493_v11 = vpop.permute.xlu0 %492  ;;  %v1333_v22 = vsel %vm515_vm12, %v1317_v17, %v5786_v47  ;;  %v1257_v26 = vsel %vm7759_vm7, %v1241_v25, %v5796_v30  ;;  %v1335_v43 = vsel %vm515_vm12, %v1319_v29, %v5788_v62  ;;  %v1243_v27 = vsel %vm7760_vm2, %v5557_v40, %v5794_v42 }
 0x298   :  { %v512_v36 = vsel %vm511_vm10, %v510_v1, %v493_v11  ;;  %v1349_v18 = vsel %vm429_vm6, %v1333_v22, %v5790_v56  ;;  %v1351_v30 = vsel %vm429_vm6, %v1335_v43, %v5792_v41  ;;  %v1259_v62 = vsel %vm7759_vm7, %v1243_v27, %v5798_v55 }
 0x299   :  { %v514_v31 = vsel %vm513_vm11, %v512_v36, %v496_v3  ;;  %v1480_v24 = vadd.s32 16, %v5808_v7  ;;  %v1481_v52 = vadd.s32 24, %v5808_v7 }
 0x29b   :  { %v502_v45 = vpop.permute.xlu1 %501  ;;  %v499_v8 = vpop.permute.xlu0 %498  ;;  %v1496_v22 = vcvt.s32.f32 %v1480_v24 }
 0x29c   :  { %v516_v34 = vsel %vm515_vm12, %v514_v31, %v499_v8 }
 0x29d   :  { %v517_v32 = vsel %vm429_vm6, %v516_v34, %v502_v45  ;;  %v1513_v25 = vmul.f32 0.1, %v1496_v22 }
 0x29e   :  { %v522_v57 = vrot.slane %v517_v32, %v521_v53 }
 0x29f   :  { %v831_v23 = vpop.permute.xlu1 %830  ;;  %v829_v54 = vpop.permute.xlu0 %828 }
 0x2a0   :  { %v523_v21 = vmul.f32 %v522_v57, %v518_v58  ;;  %v1273_v61 = vsel %vm7758_vm8, %v1257_v26, %v829_v54  ;;  %v1275_v40 = vsel %vm7758_vm8, %v1259_v62, %v831_v23  ;;  %v1482_v26 = vadd.s32 32, %v5808_v7 }
 0x2a1   :  { %v5922_v62 = vadd.s32 40, %v5808_v7 }
 0x2a2   :  { %v524_v63 = vpack.c.bf16 %v523_v21, %v523_v21 }
 0x2a3   :  { %v887_v50 = vpop.permute.xlu1 %886  ;;  %v885_v51 = vpop.permute.xlu0 %884 }
 0x2a4   :  { %4808 = vmatprep.subr.msk.bf16.mxu0 %vm1360_vm13, %v524_v63  ;;  %4809 = vmatprep.subr.msk.bf16.mxu1 %vm1360_vm13, %v524_v63  ;;  %v1378_v13 = vsel %vm1360_vm13, %v524_v63, 0  ;;  %v1289_v44 = vsel %vm7757_vm9, %v1273_v61, %v885_v51  ;;  %v1291_v42 = vsel %vm7757_vm9, %v1275_v40, %v887_v50  ;;  %v1529_v61 = vfloor.f32 %v1513_v25 }
 0x2a5   :  { %4661 = vmatpush3.bf16.xpose.msra.mxu0 %v1378_v13  ;;  %4807 = vmatpush3.bf16.xpose.msra.mxu1 %v1378_v13  ;;  %v5925_v40 = vadd.s32 80, %v5808_v7 }
 0x2a6   :  { %4678 = vmatprep.subr.bf16.mxu1 %v5015_v0  ;;  %4710 = vmatprep.subr.bf16.mxu0 %v5015_v0  ;;  %v1545_v27 = vmul.f32 10.0, %v1529_v61  ;;  %vm1577_vm14 = vcmp.ge.f32.partialorder %v1529_v61, 1.0  ;;  %vm1593_vm15 = vcmp.le.f32.partialorder %v1529_v61, 8.0 }
 0x2a7   :  { %v974_v59 = vpop.permute.xlu1 %973  ;;  %v972_v9 = vpop.permute.xlu0 %971  ;;  %vm1609_vm5 = vmand %vm1577_vm14, %vm1593_vm15 }
 0x2a8   :  { %v1305_v56 = vsel %vm511_vm10, %v1289_v44, %v972_v9  ;;  %v1307_v41 = vsel %vm511_vm10, %v1291_v42, %v974_v59  ;;  %v1561_v42 = vsub.f32 %v1496_v22, %v1545_v27 }
 0x2aa   :  { %vm1657_vm14 = vcmp.le.f32.partialorder %v1561_v42, 8.0 }
 0x2ab   :  { %v1051_v4 = vpop.permute.xlu1 %1050  ;;  %v1049_v5 = vpop.permute.xlu0 %1048 }
 0x2ac   :  { %4663 = vmatmul.mubr.msk.bf16.vlgmr.msra.gmra.mrb[4].mxu0 %vm1360_vm13, %v1347_v48  ;;  %v1321_v49 = vsel %vm513_vm11, %v1305_v56, %v1049_v5  ;;  %v1323_v28 = vsel %vm513_vm11, %v1307_v41, %v1051_v4  ;;  %v1494_v48 = vcvt.s32.f32 %v5808_v7  ;;  %v1497_v4 = vcvt.s32.f32 %v1481_v52 }
 0x2ad   :  { %4666 = vmatprep.mubr.msk.bf16.mxu0 %vm1360_vm13, %v1349_v18  ;;  %v1479_v5 = vadd.s32 8, %v5808_v7  ;;  %v1484_v18 = vadd.s32 48, %v5808_v7  ;;  %v1498_v56 = vcvt.s32.f32 %v1482_v26  ;;  %v7797_v26 = vmov 0 }
 0x2ae   :  { %v1511_v29 = vmul.f32 0.1, %v1494_v48 }
 0x2af   :  { %v1127_v47 = vpop.permute.xlu1 %1126  ;;  %v1125_v20 = vpop.permute.xlu0 %1124  ;;  %v1500_v43 = vcvt.s32.f32 %v1484_v18  ;;  %v7795_v18 = vmov 0 }
 0x2b0   :  { %v1337_v1 = vsel %vm515_vm12, %v1321_v49, %v1125_v20  ;;  %v1339_v53 = vsel %vm515_vm12, %v1323_v28, %v1127_v47  ;;  %v1514_v47 = vmul.f32 0.1, %v1497_v4  ;;  %v1495_v20 = vcvt.s32.f32 %v1479_v5 }
 0x2b1   :  { %v1527_v44 = vfloor.f32 %v1511_v29 }
 0x2b2   :  { %v1530_v49 = vfloor.f32 %v1514_v47 }
 0x2b3   :  { %v1227_v37 = vpop.permute.xlu1 %1226  ;;  %v1225_v3 = vpop.permute.xlu0 %1224  ;;  %vm1575_vm3 = vcmp.ge.f32.partialorder %v1527_v44, 1.0  ;;  %vm1591_vm4 = vcmp.le.f32.partialorder %v1527_v44, 8.0 }
 0x2b4   :  { %v1353_v11 = vsel %vm429_vm6, %v1337_v1, %v1225_v3  ;;  %4667 = vmatmul.mubr.msk.bf16.gmra.mrb[8].mxu0 %vm1360_vm13, %v1351_v30  ;;  %v1355_v45 = vsel %vm429_vm6, %v1339_v53, %v1227_v37  ;;  %v1512_v30 = vmul.f32 0.1, %v1495_v20  ;;  %v1517_v1 = vmul.f32 0.1, %v1500_v43 }
 0x2b5   :  { %4670 = vmatprep.mubr.msk.bf16.mxu0 %vm1360_vm13, %v1353_v11  ;;  %v5919_v37 = vadd.s32 56, %v5808_v7  ;;  %v1543_v3 = vmul.f32 10.0, %v1527_v44  ;;  %v1515_v11 = vmul.f32 0.1, %v1498_v56 }
 0x2b6   :  { %v1533_v41 = vfloor.f32 %v1517_v1 }
 0x2b7   :  { %v691_v36 = vpop.permute.xlu1 %690  ;;  %v689_v12 = vpop.permute.xlu0 %688  ;;  %v1501_v28 = vcvt.s32.f32 %v5919_v37  ;;  %v1559_v53 = vsub.f32 %v1494_v48, %v1543_v3 }
 0x2b8   :  { %v1247_v39 = vsel %vm7760_vm2, %v5676_v46, %v691_v36  ;;  %v1245_v23 = vsel %vm7760_vm2, %v5566_v60, %v689_v12  ;;  %v1546_v36 = vmul.f32 10.0, %v1530_v49  ;;  %v1528_v12 = vfloor.f32 %v1512_v30 }
 0x2b9   :  { %vm1655_vm15 = vcmp.le.f32.partialorder %v1559_v53, 8.0 }
 0x2bb   :  { %v779_v31 = vpop.permute.xlu1 %778  ;;  %v777_v8 = vpop.permute.xlu0 %776 }
 0x2bc   :  { %4671 = vmatmul.mubr.msk.bf16.gmra.mrb[12].mxu0 %vm1360_vm13, %v1355_v45  ;;  %v1263_v54 = vsel %vm7759_vm7, %v1247_v39, %v779_v31  ;;  %v1261_v2 = vsel %vm7759_vm7, %v1245_v23, %v777_v8  ;;  %v1531_v45 = vfloor.f32 %v1515_v11  ;;  %v1499_v31 = vcvt.s32.f32 %v5922_v62 }
 0x2bd   :  { %4714 = vmatprep.mubr.msk.bf16.mxu0 %vm7755_vm1, %v5015_v0  ;;  %v1504_v8 = vcvt.s32.f32 %v5925_v40  ;;  %v5944_v23 = vadd.s32 88, %v5808_v7 }
 0x2bf   :  { %v835_v55 = vpop.permute.xlu1 %834  ;;  %v833_v14 = vpop.permute.xlu0 %832  ;;  %v1521_v39 = vmul.f32 0.1, %v1504_v8 }
 0x2c0   :  { %v1279_v21 = vsel %vm7758_vm8, %v1263_v54, %v835_v55  ;;  %v1277_v10 = vsel %vm7758_vm8, %v1261_v2, %v833_v14  ;;  %v1562_v55 = vsub.f32 %v1497_v4, %v1546_v36  ;;  %v1544_v14 = vmul.f32 10.0, %v1528_v12 }
 0x2c1   :  { %vm1595_vm8 = vcmp.le.f32.partialorder %v1531_v45, 8.0 }
 0x2c2   :  { %v1560_v2 = vsub.f32 %v1495_v20, %v1544_v14  ;;  %v4878_v20 = vld [vmem:[%s7751_s7 + $0x8] sm:$0xff]  }
 0x2c3   :  { %v891_v34 = vpop.permute.xlu1 %890  ;;  %v889_v15 = vpop.permute.xlu0 %888 }
 0x2c4   :  { %v1295_v33 = vsel %vm7757_vm9, %v1279_v21, %v891_v34  ;;  %v1293_v50 = vsel %vm7757_vm9, %v1277_v10, %v889_v15  ;;  %v1549_v34 = vmul.f32 10.0, %v1533_v41  ;;  %v1518_v15 = vmul.f32 0.1, %v1501_v28 }
 0x2c5   :  { %v5952_v21 = vadd.s32 72, %v5808_v7  ;;  %vm1581_vm9 = vcmp.ge.f32.partialorder %v1533_v41, 1.0 }
 0x2c7   :  { %v978_v58 = vpop.permute.xlu1 %977  ;;  %v976_v32 = vpop.permute.xlu0 %975 }
 0x2c8   :  { %v1311_v51 = vsel %vm511_vm10, %v1295_v33, %v978_v58  ;;  %v1309_v46 = vsel %vm511_vm10, %v1293_v50, %v976_v32  ;;  %vm1578_vm10 = vcmp.ge.f32.partialorder %v1530_v49, 1.0  ;;  %v5933_v58 = vadd.s32 64, %v5808_v7 }
 0x2c9   :  { %v1547_v32 = vmul.f32 10.0, %v1531_v45 }
 0x2ca   :  { %v1502_v33 = vcvt.s32.f32 %v5933_v58 }
 0x2cb   :  { %v1055_v6 = vpop.permute.xlu1 %1054  ;;  %v1053_v57 = vpop.permute.xlu0 %1052  ;;  %v1563_v50 = vsub.f32 %v1498_v56, %v1547_v32 }
 0x2cc   :  { %v1327_v60 = vsel %vm513_vm11, %v1311_v51, %v1055_v6  ;;  %v1325_v35 = vsel %vm513_vm11, %v1309_v46, %v1053_v57  ;;  %vm1594_vm11 = vcmp.le.f32.partialorder %v1530_v49, 8.0  ;;  %v1516_v6 = vmul.f32 0.1, %v1499_v31 }
 0x2cd   :  { %v7784_v46 = vmov 0 }
 0x2ce   :  { %v1532_v51 = vfloor.f32 %v1516_v6 }
 0x2cf   :  { %v1131_v19 = vpop.permute.xlu1 %1130  ;;  %v1129_v63 = vpop.permute.xlu0 %1128 }
 0x2d0   :  { %v1343_v13 = vsel %vm515_vm12, %v1327_v60, %v1131_v19  ;;  %v1341_v16 = vsel %vm515_vm12, %v1325_v35, %v1129_v63  ;;  %vm1607_vm12 = vmand %vm1575_vm3, %vm1591_vm4  ;;  %vm1626_vm3 = vcmp.ge.f32.partialorder %v1562_v55, 1.0  ;;  %vm1576_vm4 = vcmp.ge.f32.partialorder %v1528_v12, 1.0 }
 0x2d1   :  { %v1565_v19 = vsub.f32 %v1500_v43, %v1549_v34  ;;  %v1534_v63 = vfloor.f32 %v1518_v15  ;;  %v7786_v60 = vmov 0  ;;  %v1537_v35 = vfloor.f32 %v1521_v39 }
 0x2d2   :  { %v6072_v15 = vadd.s32 112, %v5808_v7 }
 0x2d3   :  { %v1231_v17 = vpop.permute.xlu1 %1230  ;;  %v1229_v38 = vpop.permute.xlu0 %1228  ;;  %v1553_v22 = vmul.f32 10.0, %v1537_v35 }
 0x2d4   :  { %v1359_v59 = vsel %vm429_vm6, %v1343_v13, %v1231_v17  ;;  %v1357_v9 = vsel %vm429_vm6, %v1341_v16, %v1229_v38  ;;  %vm1625_vm6 = vcmp.ge.f32.partialorder %v1561_v42, 1.0  ;;  %v1505_v13 = vcvt.s32.f32 %v5944_v23 }
 0x2d5   :  { %4674 = vmatprep.mubr.msk.bf16.mxu1 %vm1360_vm13, %v1357_v9  ;;  %vm5937_vm0 = vmand %vm1609_vm5, %vm1625_vm6  ;;  %vm1592_vm6 = vcmp.le.f32.partialorder %v1528_v12, 8.0  ;;  %v1503_v17 = vcvt.s32.f32 %v5952_v21  ;;  %v1550_v38 = vmul.f32 10.0, %v1534_v63  ;;  %v1548_v9 = vmul.f32 10.0, %v1532_v51 }
 0x2d6   :  { %4675 = vmatmul.mubr.msk.bf16.vlgmr.msra.gmra.mrb[4].mxu1 %vm1360_vm13, %v1359_v59  ;;  %vm1623_vm13 = vcmp.ge.f32.partialorder %v1559_v53, 1.0  ;;  %v1519_v59 = vmul.f32 0.1, %v1502_v33  ;;  %v1522_v52 = vmul.f32 0.1, %v1505_v13  ;;  %v1569_v61 = vsub.f32 %v1504_v8, %v1553_v22 }
 0x2d7   :  { %4682 = vmatprep.mubr.msk.bf16.mxu1 %vm7755_vm1, %v5015_v0  ;;  %vm5947_vm1 = vmand %vm1578_vm10, %vm1594_vm11  ;;  %vm1597_vm10 = vcmp.le.f32.partialorder %v1533_v41, 8.0  ;;  %v1520_v25 = vmul.f32 0.1, %v1503_v17  ;;  %v1566_v4 = vsub.f32 %v1501_v28, %v1550_v38  ;;  %v1564_v29 = vsub.f32 %v1499_v31, %v1548_v9 }
 0x2d8   :  { %vm5954_vm5 = vmand %vm1607_vm12, %vm1623_vm13  ;;  %vm1579_vm13 = vcmp.ge.f32.partialorder %v1531_v45, 1.0  ;;  %v1535_v5 = vfloor.f32 %v1519_v59  ;;  %v1538_v47 = vfloor.f32 %v1522_v52  ;;  %v1508_v21 = vcvt.s32.f32 %v6072_v15 }
 0x2d9   :  { %vm5962_vm11 = vmand %vm5937_vm0, %vm1657_vm14  ;;  %vm1624_vm14 = vcmp.ge.f32.partialorder %v1560_v2, 1.0  ;;  %v1536_v44 = vfloor.f32 %v1520_v25  ;;  %v6141_v9 = vadd.s32 96, %v5808_v7  ;;  %v6149_v25 = vadd.s32 120, %v5808_v7 }
 0x2da   :  { %v7785_v46 = vsel %vm5962_vm11, 4294967295, %v7784_v46  ;;  %vm5968_vm12 = vmand %vm5947_vm1, %vm1626_vm3  ;;  %vm1629_vm3 = vcmp.ge.f32.partialorder %v1565_v19, 1.0  ;;  %vm1627_vm11 = vcmp.ge.f32.partialorder %v1563_v50, 1.0  ;;  %v1551_v27 = vmul.f32 10.0, %v1535_v5 }
 0x2db   :  { %v7787_v60 = vsel %vm5968_vm12, 4294967295, %v7786_v60  ;;  %vm5976_vm7 = vmand %vm5954_vm5, %vm1655_vm15  ;;  %vm1658_vm12 = vcmp.le.f32.partialorder %v1562_v55, 8.0  ;;  %v1554_v62 = vmul.f32 10.0, %v1538_v47  ;;  %v1552_v41 = vmul.f32 10.0, %v1536_v44 }
 0x2dc   :  { %vm1608_vm0 = vmand %vm1576_vm4, %vm1592_vm6  ;;  %vm1656_vm4 = vcmp.le.f32.partialorder %v1560_v2, 8.0  ;;  %vm1659_vm6 = vcmp.le.f32.partialorder %v1563_v50, 8.0  ;;  %v4318_v37 = vsel %vm5976_vm7, 1.0, %v5015_v0  ;;  %vm1662_vm7 = vcmp.le.f32.partialorder %v1566_v4, 8.0 }
 0x2dd   :  { %vm1613_vm1 = vmand %vm1581_vm9, %vm1597_vm10  ;;  %vm7794_vm10 = vnez %v7787_v60  ;;  %v1567_v31 = vsub.f32 %v1502_v33, %v1551_v27  ;;  %v1570_v57 = vsub.f32 %v1505_v13, %v1554_v62  ;;  %v1568_v2 = vsub.f32 %v1503_v17, %v1552_v41 }
 0x2de   :  { %vm1611_vm2 = vmand %vm1579_vm13, %vm1595_vm8  ;;  %vm1661_vm8 = vcmp.le.f32.partialorder %v1565_v19, 8.0  ;;  %v1525_v48 = vmul.f32 0.1, %v1508_v21  ;;  %v1509_v27 = vcvt.s32.f32 %v6149_v25 }
 0x2df   :  { %vm5985_vm15 = vmand %vm1608_vm0, %vm1624_vm14  ;;  %vm1582_vm0 = vcmp.ge.f32.partialorder %v1534_v63, 1.0  ;;  %vm1598_vm14 = vcmp.le.f32.partialorder %v1534_v63, 8.0 }
 0x2e0   :  { %vm5991_vm5 = vmand %vm1613_vm1, %vm1629_vm3  ;;  %v1541_v56 = vfloor.f32 %v1525_v48 }
 0x2e1   :  { %vm1643_vm9 = vmand %vm1611_vm2, %vm1627_vm11  ;;  %vm1580_vm2 = vcmp.ge.f32.partialorder %v1532_v51, 1.0  ;;  %vm1596_vm11 = vcmp.le.f32.partialorder %v1532_v51, 8.0 }
 0x2e2   :  { %vm6001_vm13 = vmand %vm7794_vm10, %vm1658_vm12 }
 0x2e3   :  { %v7796_v18 = vsel %vm6001_vm13, 4294967295, %v7795_v18  ;;  %vm6009_vm1 = vmand %vm5985_vm15, %vm1656_vm4  ;;  %vm1585_vm15 = vcmp.ge.f32.partialorder %v1537_v35, 1.0  ;;  %vm1601_vm4 = vcmp.le.f32.partialorder %v1537_v35, 8.0  ;;  %vm7805_vm13 = vnez %v7785_v46 }
 0x2e4   :  { %v7798_v26 = vsel %vm6009_vm1, 4294967295, %v7797_v26  ;;  %vm6017_vm12 = vmand %vm5991_vm5, %vm1661_vm8  ;;  %vm1630_vm1 = vcmp.ge.f32.partialorder %v1566_v4, 1.0  ;;  %v4320_v49 = vsel %vm7805_vm13, 1.0, %v5015_v0  ;;  %vm1628_vm8 = vcmp.ge.f32.partialorder %v1564_v29, 1.0 }
 0x2e5   :  { %vm6021_vm3 = vmand %vm1643_vm9, %vm1659_vm6  ;;  %vm7808_vm9 = vnez %v7796_v18  ;;  %vm7811_vm13 = vnez %v7798_v26  ;;  %v4324_v33 = vsel %vm6017_vm12, 1.0, %v5015_v0  ;;  %v6155_v18 = vadd.s32 104, %v5808_v7 }
 0x2e6   :  { %vm6025_vm10 = vmand %vm1582_vm0, %vm1598_vm14  ;;  %v4321_v3 = vsel %vm7808_vm9, 1.0, %v5015_v0  ;;  %vm1633_vm0 = vcmp.ge.f32.partialorder %v1569_v61, 1.0  ;;  %v4319_v36 = vsel %vm7811_vm13, 1.0, %v5015_v0  ;;  %v4322_v50 = vsel %vm6021_vm3, 1.0, %v5015_v0 }
 0x2e7   :  { %vm6032_vm5 = vmand %vm1580_vm2, %vm1596_vm11  ;;  %vm1660_vm11 = vcmp.le.f32.partialorder %v1564_v29, 8.0  ;;  %vm1632_vm3 = vcmp.ge.f32.partialorder %v1568_v2, 1.0  ;;  %v1506_v7 = vcvt.s32.f32 %v6141_v9 }
 0x2e8   :  { %vm6042_vm6 = vmand %vm1585_vm15, %vm1601_vm4  ;;  %vm1583_vm15 = vcmp.ge.f32.partialorder %v1535_v5, 1.0  ;;  %vm1665_vm4 = vcmp.le.f32.partialorder %v1569_v61, 8.0 }
 0x2e9   :  { %vm6051_vm14 = vmand %vm6025_vm10, %vm1630_vm1 }
 0x2ea   :  { %vm6058_vm2 = vmand %vm6032_vm5, %vm1628_vm8  ;;  %vm1599_vm5 = vcmp.le.f32.partialorder %v1535_v5, 8.0  ;;  %vm7820_vm8 = vcmask 64512  }
 0x2eb   :  { %vm6067_vm1 = vmand %vm6042_vm6, %vm1633_vm0  ;;  %vm1602_vm0 = vcmp.le.f32.partialorder %v1538_v47, 8.0  ;;  %vm1631_vm6 = vcmp.ge.f32.partialorder %v1567_v31, 1.0 }
 0x2ec   :  { %vm6077_vm10 = vmand %vm6051_vm14, %vm1662_vm7  ;;  %vm1584_vm7 = vcmp.ge.f32.partialorder %v1536_v44, 1.0 }
 0x2ed   :  { %vm6087_vm9 = vmand %vm6058_vm2, %vm1660_vm11  ;;  %vm1600_vm2 = vcmp.le.f32.partialorder %v1536_v44, 8.0  ;;  %v4325_v35 = vsel %vm6077_vm10, 1.0, %v5015_v0  ;;  %vm1666_vm10 = vcmp.le.f32.partialorder %v1570_v57, 8.0 }
 0x2ee   :  { %vm7823_vm13 = vmmov %vm7820_vm8  ;;  %v4323_v38 = vsel %vm6087_vm9, 1.0, %v5015_v0 }
 0x2ef   :  { %vm6097_vm14 = vmand %vm6067_vm1, %vm1665_vm4  ;;  %vm7830_vm1 = vcmp.ge.f32.partialorder %v1538_v47, 1.0  ;;  %vm1634_vm4 = vcmp.ge.f32.partialorder %v1570_v57, 1.0 }
 0x2f0   :  { %vm7826_vm11 = vmmov %vm7820_vm8  ;;  %v4328_v30 = vsel %vm6097_vm14, 1.0, %v5015_v0 }
 0x2f1   :  { %vm6126_vm12 = vmand %vm1584_vm7, %vm1600_vm2 }
 0x2f2   :  { %vm1648_vm9 = vmand %vm6126_vm12, %vm1632_vm3 }
 0x2f3   :  { %vm7837_vm2 = vmmov %vm7826_vm11 }
 0x37f   :  { %v4664_v1 = vpop.f32.mrb[4].mxu0 }
 0x380   :  { %v1721_v40 = vmax.f32 %v4664_v1, 0.0  ;;  %v1414_v42 = vpop.f32.mrb[5].mxu0 }
 0x381   :  { %v1719_v28 = vmax.f32 %v1414_v42, 0.0  ;;  %v4665_v53 = vpop.f32.mrb[6].mxu0 }
 0x382   :  { %v1737_v8 = vmul.f32 %v4320_v49, %v1721_v40  ;;  %v1722_v55 = vmax.f32 %v4665_v53, 0.0  ;;  %v1417_v14 = vpop.f32.mrb[7].mxu0  ;;  %v1523_v53 = vmul.f32 0.1, %v1506_v7 }
 0x383   :  { %v1735_v32 = vmul.f32 %v4318_v37, %v1719_v28  ;;  %v1720_v6 = vmax.f32 %v1417_v14, 0.0  ;;  %v1507_v37 = vcvt.s32.f32 %v6155_v18  ;;  %v1526_v14 = vmul.f32 0.1, %v1509_v27 }
 0x384   :  { %1753 = vst.msk [vmem:[#allocation2 + $0x10] sm:$0xff] %vm7820_vm8, %v1737_v8  ;;  %v1738_v39 = vmul.f32 %v4321_v3, %v1722_v55  ;;  %vm6103_vm8 = vmand %vm1583_vm15, %vm1599_vm5  ;;  %vm1663_vm5 = vcmp.le.f32.partialorder %v1567_v31, 8.0  ;;  %v1557_v55 = vmul.f32 10.0, %v1541_v56 }
 0x385   :  { %1751 = vst.msk [vmem:[#allocation2] sm:$0xff] %vm7823_vm13, %v1735_v32  ;;  %v1736_v10 = vmul.f32 %v4319_v36, %v1720_v6  ;;  %vm7829_vm13 = vmmov %vm7826_vm11  ;;  %v1524_v58 = vmul.f32 0.1, %v1507_v37  ;;  %v1542_v19 = vfloor.f32 %v1526_v14 }
 0x386   :  { %1754 = vst.msk [vmem:[#allocation2 + $0x18] sm:$0xff] %vm7826_vm11, %v1738_v39  ;;  %vm6117_vm15 = vmand %vm7830_vm1, %vm1602_vm0  ;;  %v1573_v23 = vsub.f32 %v1508_v21, %v1557_v55 }
 0x387   :  { %1752 = vst.msk [vmem:[#allocation2 + $0x8] sm:$0xff] %vm7829_vm13, %v1736_v10  ;;  %v4668_v63 = vpop.f32.mrb[8].mxu0  ;;  %vm6136_vm0 = vmand %vm6103_vm8, %vm1631_vm6  ;;  %vm1664_vm6 = vcmp.le.f32.partialorder %v1568_v2, 8.0  ;;  %v1539_v10 = vfloor.f32 %v1523_v53  ;;  %v1558_v51 = vmul.f32 10.0, %v1542_v19 }
 0x388   :  { %v1725_v46 = vmax.f32 %v4668_v63, 0.0  ;;  %v1430_v60 = vpop.f32.mrb[9].mxu0  ;;  %vm1650_vm7 = vmand %vm6117_vm15, %vm1634_vm4 }
 0x389   :  { %v1723_v16 = vmax.f32 %v1430_v60, 0.0  ;;  %v4669_v17 = vpop.f32.mrb[10].mxu0  ;;  %vm6161_vm11 = vmand %vm6136_vm0, %vm1663_vm5  ;;  %vm1589_vm0 = vcmp.ge.f32.partialorder %v1541_v56, 1.0  ;;  %v1574_v21 = vsub.f32 %v1509_v27, %v1558_v51 }
 0x38a   :  { %v1741_v24 = vmul.f32 %v4324_v33, %v1725_v46  ;;  %v1726_v22 = vmax.f32 %v4669_v17, 0.0  ;;  %v1433_v52 = vpop.f32.mrb[11].mxu0  ;;  %vm7840_vm8 = vmmov %vm7837_vm2  ;;  %v4326_v62 = vsel %vm6161_vm11, 1.0, %v5015_v0  ;;  %v1540_v33 = vfloor.f32 %v1524_v58 }
 0x38b   :  { %v1739_v4 = vmul.f32 %v4322_v50, %v1723_v16  ;;  %v1724_v5 = vmax.f32 %v1433_v52, 0.0  ;;  %vm6169_vm13 = vmand %vm1650_vm7, %vm1666_vm10  ;;  %vm1605_vm10 = vcmp.le.f32.partialorder %v1541_v56, 8.0  ;;  %v1555_v50 = vmul.f32 10.0, %v1539_v10 }
 0x38c   :  { %1757 = vst.msk [vmem:[#allocation2 + $0x30] sm:$0xff] %vm7837_vm2, %v1741_v24  ;;  %v1742_v29 = vmul.f32 %v4325_v35, %v1726_v22  ;;  %vm7843_vm1 = vmmov %vm7837_vm2  ;;  %v4329_v41 = vsel %vm6169_vm13, 1.0, %v5015_v0  ;;  %v1556_v46 = vmul.f32 10.0, %v1540_v33  ;;  %vm1669_vm2 = vcmp.le.f32.partialorder %v1573_v23, 8.0 }
 0x38d   :  { %1755 = vst.msk [vmem:[#allocation2 + $0x20] sm:$0xff] %vm7840_vm8, %v1739_v4  ;;  %v1740_v61 = vmul.f32 %v4323_v38, %v1724_v5  ;;  %v6166_v47 = vld [vmem:[#allocation2 + $0x12] sm:$0xff]  ;;  %vm6177_vm15 = vmand %vm1648_vm9, %vm1664_vm6  ;;  %vm1637_vm9 = vcmp.ge.f32.partialorder %v1573_v23, 1.0  ;;  %v1571_v15 = vsub.f32 %v1506_v7, %v1555_v50  ;;  %vm1587_vm11 = vcmp.ge.f32.partialorder %v1539_v10, 1.0 }
 0x38e   :  { %1758 = vst.msk [vmem:[#allocation2 + $0x38] sm:$0xff] %vm7843_vm1, %v1742_v29  ;;  %v6175_v43 = vld [vmem:[#allocation2 + $0xa] sm:$0xff]  ;;  %vm7846_vm4 = vmmov %vm7843_vm1  ;;  %v1837_v42 = vld [vmem:[#allocation2 + $0x13] sm:$0xff]  ;;  %v4327_v28 = vsel %vm6177_vm15, 1.0, %v5015_v0  ;;  %vm1603_vm8 = vcmp.le.f32.partialorder %v1539_v10, 8.0  ;;  %vm1590_vm13 = vcmp.ge.f32.partialorder %v1542_v19, 1.0  ;;  %v1572_v60 = vsub.f32 %v1507_v37, %v1556_v46 }
 0x38f   :  { %1756 = vst.msk [vmem:[#allocation2 + $0x28] sm:$0xff] %vm7846_vm4, %v1740_v61  ;;  %v4672_v49 = vpop.f32.mrb[12].mxu0  ;;  %v6188_v1 = vpack.c.bf16 %v6166_v47, %v6175_v43  ;;  %v1836_v40 = vld [vmem:[#allocation2 + $0xb] sm:$0xff]  ;;  %vm7847_vm14 = vmmov %vm7843_vm1  ;;  %v6205_v54 = vld [vmem:[#allocation2 + $0x14] sm:$0xff]  ;;  %v7851_v35 = vmov 0  ;;  %vm1588_vm4 = vcmp.ge.f32.partialorder %v1540_v33, 1.0 }
 0x390   :  { %v1729_v3 = vmax.f32 %v4672_v49, 0.0  ;;  %v1446_v11 = vpop.f32.mrb[13].mxu0  ;;  %v6202_v6 = vpack.c.bf16 %v1837_v42, %v1836_v40  ;;  %v1856_v39 = vld [vmem:[#allocation2 + $0xc] sm:$0xff]  ;;  %vm7848_vm5 = vmmov %vm7843_vm1  ;;  %v4877_v61 = vld [vmem:[%s7751_s7] sm:$0xff]  }
 0x391   :  { %v1727_v36 = vmax.f32 %v1446_v11, 0.0  ;;  %1955 = vrot.lane.b32.xlu1 %v6188_v1, %s5018_s22  ;;  %v4673_v12 = vpop.f32.mrb[14].mxu0  ;;  %vm7849_vm12 = vmmov %vm7843_vm1  ;;  %v6215_v63 = vpack.c.bf16 %v6205_v54, %v1856_v39  ;;  %4679 = vmatpush3.bf16.msra.mxu1 %v4877_v61  ;;  %v4879_v7 = vld [vmem:[%s7751_s7 + $0x10] sm:$0xff]   ;;  %v4880_v11 = vld [vmem:[%s7751_s7 + $0x18] sm:$0xff]  }
 0x392   :  { %v1745_v45 = vmul.f32 %v4328_v30, %v1729_v3  ;;  %v1730_v31 = vmax.f32 %v4673_v12, 0.0  ;;  %v1449_v8 = vpop.f32.mrb[15].mxu0  ;;  %vm7850_vm3 = vmmov %vm7843_vm1  ;;  %vm1606_vm1 = vcmp.le.f32.partialorder %v1542_v19, 8.0  ;;  %4680 = vmatprep.subr.bf16.mxu1 %v5015_v0  ;;  %4711 = vmatpush3.bf16.msra.mxu0 %v4879_v7  ;;  %v1788_v40 = vld [vmem:[#allocation2 + $0x9] sm:$0xff]  ;;  %v1885_v55 = vld [vmem:[#allocation2 + $0x15] sm:$0xff] }
 0x393   :  { %v1743_v34 = vmul.f32 %v4326_v62, %v1727_v36  ;;  %v1728_v32 = vmax.f32 %v1449_v8, 0.0  ;;  %vm1621_vm7 = vmand %vm1589_vm0, %vm1605_vm10  ;;  %vm1638_vm0 = vcmp.ge.f32.partialorder %v1574_v21, 1.0  ;;  %4712 = vmatprep.subr.bf16.mxu0 %v5015_v0  ;;  %v1787_v62 = vld [vmem:[#allocation2 + $0x1] sm:$0xff]  ;;  %v1789_v19 = vld [vmem:[#allocation2 + $0x11] sm:$0xff] }
 0x394   :  { %1761 = vst.msk [vmem:[#allocation2 + $0x50] sm:$0xff] %vm7847_vm14, %v1745_v45  ;;  %v1746_v57 = vmul.f32 %v4329_v41, %v1730_v31  ;;  %vm1653_vm6 = vmand %vm1621_vm7, %vm1637_vm9  ;;  %vm1604_vm14 = vcmp.le.f32.partialorder %v1540_v33, 8.0  ;;  %vm1636_vm7 = vcmp.ge.f32.partialorder %v1572_v60, 1.0  ;;  %v6262_v12 = vpack.c.bf16 %v1788_v40, %v1787_v62  ;;  %v1807_v41 = vld [vmem:[#allocation2 + $0x2] sm:$0xff]  ;;  %v1790_v10 = vld [vmem:[#allocation2 + $0x19] sm:$0xff] }
 0x395   :  { %1759 = vst.msk [vmem:[#allocation2 + $0x40] sm:$0xff] %vm7848_vm5, %v1743_v34  ;;  %v1744_v2 = vmul.f32 %v4327_v28, %v1728_v32  ;;  %1976 = vrot.lane.b32.xlu1 %v6202_v6, %s5019_s25  ;;  %vm6219_vm15 = vmand %vm1653_vm6, %vm1669_vm2  ;;  %vm1667_vm2 = vcmp.le.f32.partialorder %v1571_v15, 8.0  ;;  %4681 = vmatpush3.bf16.msra.mxu1 %v4878_v20  ;;  %v1858_v53 = vld [vmem:[#allocation2 + $0x1c] sm:$0xff]  ;;  %v1820_v45 = vpack.c.bf16 %v6175_v43, %v1807_v41  ;;  %v1793_v20 = vld [vmem:[#allocation2 + $0x31] sm:$0xff] }
 0x396   :  { %1762 = vst.msk [vmem:[#allocation2 + $0x58] sm:$0xff] %vm7849_vm12, %v1746_v57  ;;  %v7852_v35 = vsel %vm6219_vm15, 4294967295, %v7851_v35  ;;  %vm1619_vm5 = vmand %vm1587_vm11, %vm1603_vm8  ;;  %vm1635_vm12 = vcmp.ge.f32.partialorder %v1571_v15, 1.0  ;;  %vm1670_vm15 = vcmp.le.f32.partialorder %v1574_v21, 8.0  ;;  %vm1668_vm11 = vcmp.le.f32.partialorder %v1572_v60, 8.0  ;;  %4742 = vmatprep.subr.bf16.mxu1 %v5015_v0  ;;  %4713 = vmatpush3.bf16.msra.mxu0 %v4880_v11  ;;  %v1886_v8 = vld [vmem:[#allocation2 + $0x1d] sm:$0xff] }
 0x397   :  { %1760 = vst.msk [vmem:[#allocation2 + $0x48] sm:$0xff] %vm7850_vm3, %v1744_v2  ;;  %vm1622_vm3 = vmand %vm1590_vm13, %vm1606_vm1  ;;  %4774 = vmatprep.subr.bf16.mxu0 %v5015_v0  ;;  %v1878_v31 = vpack.c.bf16 %v1858_v53, %v6205_v54  ;;  %v1898_v14 = vpack.c.bf16 %v1886_v8, %v1885_v55  ;;  %v1906_v34 = vld [vmem:[#allocation2 + $0x1e] sm:$0xff]  ;;  %v1905_v32 = vld [vmem:[#allocation2 + $0x16] sm:$0xff]  ;;  %v6294_v50 = vpack.c.bf16 %v1790_v10, %v1789_v19 }
 0x398   :  { %vm1620_vm10 = vmand %vm1588_vm4, %vm1604_vm14  ;;  %vm7853_vm4 = vnez %v7852_v35  ;;  %v1918_v43 = vpack.c.bf16 %v1906_v34, %v1905_v32  ;;  %v1811_v58 = vld [vmem:[#allocation2 + $0x22] sm:$0xff]  ;;  %v1810_v57 = vld [vmem:[#allocation2 + $0x1a] sm:$0xff] }
 0x399   :  { %2508 = vrot.lane.b32.xlu1 %v6215_v63, %s5019_s25  ;;  %vm1651_vm9 = vmand %vm1619_vm5, %vm1635_vm12  ;;  %v4332_v16 = vsel %vm7853_vm4, 1.0, %v5015_v0  ;;  %v6282_v39 = vpack.c.bf16 %v1811_v58, %v1810_v57  ;;  %v1839_v54 = vld [vmem:[#allocation2 + $0x23] sm:$0xff]  ;;  %v1838_v2 = vld [vmem:[#allocation2 + $0x1b] sm:$0xff] }
 0x39a   :  { %vm1654_vm6 = vmand %vm1622_vm3, %vm1638_vm0  ;;  %v6288_v23 = vpack.c.bf16 %v1839_v54, %v1838_v2  ;;  %v6290_v33 = vld [vmem:[#allocation2 + $0x24] sm:$0xff]  ;;  %v1813_v15 = vld [vmem:[#allocation2 + $0x32] sm:$0xff] }
 0x39b   :  { %vm1652_vm8 = vmand %vm1620_vm10, %vm1636_vm7  ;;  %v6299_v51 = vpack.c.bf16 %v6290_v33, %v1858_v53  ;;  %v1812_v46 = vld [vmem:[#allocation2 + $0x2a] sm:$0xff]  ;;  %v1841_v35 = vld [vmem:[#allocation2 + $0x33] sm:$0xff]  ;;  %vm7859_vm10 = vcmask 130048   ;;  %vm7860_vm7 = vcmask 195584  }
 0x39c   :  { %vm1683_vm1 = vmand %vm1651_vm9, %vm1667_vm2  ;;  %v6305_v21 = vpack.c.bf16 %v1813_v15, %v1812_v46  ;;  %v1840_v60 = vld [vmem:[#allocation2 + $0x2b] sm:$0xff]  ;;  %v1842_v11 = vld [vmem:[#allocation2 + $0x3b] sm:$0xff]  ;;  %vm7861_vm9 = vcmask 261120   ;;  %vm7862_vm2 = vmmov 0  }
 0x39d   :  { %vm1686_vm13 = vmand %vm1654_vm6, %vm1670_vm15  ;;  %v4330_v59 = vsel %vm1683_vm1, 1.0, %v5015_v0  ;;  %vm7854_vm15 = vcmask 64512   ;;  %v1817_v8 = vld [vmem:[#allocation2 + $0x52] sm:$0xff] }
 0x39e   :  { %vm1684_vm14 = vmand %vm1652_vm8, %vm1668_vm11  ;;  %v4333_v22 = vsel %vm1686_vm13, 1.0, %v5015_v0  ;;  %v1815_v7 = vld [vmem:[#allocation2 + $0x42] sm:$0xff]  ;;  %v1816_v55 = vld [vmem:[#allocation2 + $0x4a] sm:$0xff] }
 0x39f   :  { %v4331_v4 = vsel %vm1684_vm14, 1.0, %v5015_v0  ;;  %vm7855_vm5 = vmmov %vm7854_vm15  ;;  %v6362_v41 = vld [vmem:[#allocation2 + $0x44] sm:$0xff]  ;;  %v6376_v34 = vpack.c.bf16 %v1817_v8, %v1816_v55  ;;  %v1865_v54 = vld [vmem:[#allocation2 + $0x54] sm:$0xff] }
 0x3a0   :  { %vm7856_vm12 = vmmov %vm7855_vm5  ;;  %v1844_v32 = vld [vmem:[#allocation2 + $0x4b] sm:$0xff]  ;;  %v1795_v2 = vld [vmem:[#allocation2 + $0x41] sm:$0xff] }
 0x3a1   :  { %vm7857_vm3 = vmmov %vm7855_vm5  ;;  %v1796_v10 = vld [vmem:[#allocation2 + $0x49] sm:$0xff] }
 0x3a2   :  { %vm7858_vm0 = vmmov %vm7857_vm3 }
 0x3a3   :  { %vm7863_vm6 = vmmov %vm7858_vm0 }
 0x3a4   :  { %vm7864_vm8 = vmmov %vm7859_vm10 }
 0x3a5   :  { %vm7865_vm11 = vmmov %vm7860_vm7 }
 0x3a6   :  { %vm7866_vm1 = vmmov %vm7861_vm9 }
 0x3a7   :  { %vm7867_vm13 = vmmov %vm7858_vm0 }
 0x3a8   :  { %vm7868_vm4 = vmmov %vm7864_vm8 }
 0x3a9   :  { %v4676_v13 = vpop.f32.mrb[4].mxu1  ;;  %vm7869_vm14 = vmmov %vm7860_vm7 }
 0x3aa   :  { %v1733_v17 = vmax.f32 %v4676_v13, 0.0  ;;  %v1462_v38 = vpop.f32.mrb[5].mxu1  ;;  %v6310_v13 = vpack.c.bf16 %v1841_v35, %v1840_v60  ;;  %v1888_v60 = vld [vmem:[#allocation2 + $0x2d] sm:$0xff]  ;;  %v1824_v35 = vpack.c.bf16 %v1816_v55, %v1815_v7 }
 0x3ab   :  { %v1731_v9 = vmax.f32 %v1462_v38, 0.0  ;;  %v4677_v24 = vpop.f32.mrb[6].mxu1  ;;  %v1792_v38 = vld [vmem:[#allocation2 + $0x29] sm:$0xff] }
 0x3ac   :  { %v1749_v52 = vmul.f32 %v4332_v16, %v1733_v17  ;;  %v1734_v48 = vmax.f32 %v4677_v24, 0.0  ;;  %v1465_v25 = vpop.f32.mrb[7].mxu1  ;;  %v6312_v16 = vld [vmem:[#allocation2 + $0x2c] sm:$0xff]  ;;  %v6314_v17 = vld [vmem:[#allocation2 + $0x34] sm:$0xff] }
 0x3ad   :  { %v1747_v5 = vmul.f32 %v4330_v59, %v1731_v9  ;;  %v1732_v18 = vmax.f32 %v1465_v25, 0.0  ;;  %v6322_v59 = vpack.c.bf16 %v6314_v17, %v6312_v16  ;;  %v1822_v25 = vpack.c.bf16 %v1812_v46, %v1811_v58 }
 0x3ae   :  { %1765 = vst.msk [vmem:[#allocation2 + $0x70] sm:$0xff] %vm7854_vm15, %v1749_v52  ;;  %v1750_v29 = vmul.f32 %v4333_v22, %v1734_v48  ;;  %v6395_v46 = vpack.c.bf16 %v1796_v10, %v1795_v2  ;;  %v1891_v2 = vld [vmem:[#allocation2 + $0x45] sm:$0xff]  ;;  %v1892_v10 = vld [vmem:[#allocation2 + $0x4d] sm:$0xff]  ;;  %vm7870_vm15 = vmmov %vm7866_vm1 }
 0x3af   :  { %1763 = vst.msk [vmem:[#allocation2 + $0x60] sm:$0xff] %vm7855_vm5, %v1747_v5  ;;  %v1748_v26 = vmul.f32 %v4331_v4, %v1732_v18  ;;  %vm7871_vm5 = vmmov %vm7858_vm0 }
 0x3b0   :  { %1766 = vst.msk [vmem:[#allocation2 + $0x78] sm:$0xff] %vm7856_vm12, %v1750_v29  ;;  %vm7872_vm12 = vmmov %vm7868_vm4 }
 0x3b1   :  { %1764 = vst.msk [vmem:[#allocation2 + $0x68] sm:$0xff] %vm7857_vm3, %v1748_v26  ;;  %v1794_v26 = vld [vmem:[#allocation2 + $0x39] sm:$0xff]  ;;  %vm7873_vm3 = vmmov %vm7860_vm7 }
 0x3b6   :  { %v1799_v44 = vld [vmem:[#allocation2 + $0x61] sm:$0xf]  ;;  %v1798_v62 = vld [vmem:[#allocation2 + $0x59] sm:$0xff] }
 0x3b7   :  { %v6243_v56 = vpack.c.bf16 %v1799_v44, %v1799_v44  ;;  %v1819_v49 = vld [vmem:[#allocation2 + $0x62] sm:$0xf]  ;;  %v1818_v22 = vld [vmem:[#allocation2 + $0x5a] sm:$0xff]  ;;  %v6351_v44 = vpack.c.bf16 %v1794_v26, %v1793_v20 }
 0x3b8   :  { %v1828_v27 = vld [vmem:[#allocation2 + $0x6a] sm:$0xf]  ;;  %v1826_v3 = vpack.c.bf16 %v1819_v49, %v1819_v49  ;;  %v1827_v9 = vld [vmem:[#allocation2 + $0x62] sm:$0xff]  ;;  %v1909_v20 = vld [vmem:[#allocation2 + $0x36] sm:$0xff] }
 0x3b9   :  { %1946 = vrot.lane.b32.xlu0 %v6243_v56, %s5017_s17  ;;  %v6249_v30 = vpack.c.bf16 %v1828_v27, %v1828_v27  ;;  %v1848_v37 = vld [vmem:[#allocation2 + $0x6b] sm:$0xf]  ;;  %v6330_v52 = vpack.c.bf16 %v1827_v9, %v1818_v22  ;;  %v1847_v48 = vld [vmem:[#allocation2 + $0x63] sm:$0xff]  ;;  %v1846_v4 = vld [vmem:[#allocation2 + $0x5b] sm:$0xff] }
 0x3ba   :  { %v6257_v42 = vpack.c.bf16 %v1848_v37, %v1848_v37  ;;  %v1868_v36 = vld [vmem:[#allocation2 + $0x6c] sm:$0xf]  ;;  %v6335_v5 = vpack.c.bf16 %v1847_v48, %v1846_v4  ;;  %v6337_v18 = vld [vmem:[#allocation2 + $0x64] sm:$0xff]  ;;  %v6341_v29 = vld [vmem:[#allocation2 + $0x5c] sm:$0xff] }
 0x3bb   :  { %1967 = vrot.lane.b32.xlu1 %v6249_v30, %s5018_s22  ;;  %v6266_v28 = vpack.c.bf16 %v1868_v36, %v1868_v36  ;;  %v6347_v61 = vpack.c.bf16 %v6337_v18, %v6341_v29  ;;  %v1814_v27 = vld [vmem:[#allocation2 + $0x3a] sm:$0xff]  ;;  %v1843_v37 = vld [vmem:[#allocation2 + $0x43] sm:$0xff]  ;;  %v1797_v36 = vld [vmem:[#allocation2 + $0x51] sm:$0xff] }
 0x3bc   :  { %v6355_v49 = vpack.c.bf16 %v1815_v7, %v1814_v27  ;;  %v6360_v40 = vpack.c.bf16 %v1843_v37, %v1842_v11  ;;  %v6366_v53 = vpack.c.bf16 %v1798_v62, %v1797_v36  ;;  %v1908_v9 = vld [vmem:[#allocation2 + $0x2e] sm:$0xff]  ;;  %v1910_v26 = vld [vmem:[#allocation2 + $0x3e] sm:$0xff] }
 0x3bd   :  { %2485 = vrot.lane.b32.xlu0 %v1826_v3, %s5017_s17  ;;  %v1823_v3 = vpack.c.bf16 %v1814_v27, %v1813_v15  ;;  %v1879_v15 = vpack.c.bf16 %v6312_v16, %v6290_v33  ;;  %v1890_v16 = vld [vmem:[#allocation2 + $0x3d] sm:$0xff]  ;;  %v1889_v48 = vld [vmem:[#allocation2 + $0x35] sm:$0xff]  ;;  %v1920_v7 = vpack.c.bf16 %v1910_v26, %v1909_v20 }
 0x3be   :  { %v1900_v4 = vpack.c.bf16 %v1890_v16, %v1889_v48  ;;  %v1894_v37 = vld [vmem:[#allocation2 + $0x5d] sm:$0xff] }
 0x3bf   :  { %1988 = vrot.lane.b32.xlu1 %v6257_v42, %s5019_s25  ;;  %v1914_v62 = vld [vmem:[#allocation2 + $0x5e] sm:$0xff] }
 0x3c1   :  { %1934 = vrot.lane.b32.xlu0 %v6262_v12, %s5017_s17 }
 0x3c3   :  { %2520 = vrot.lane.b32.xlu1 %v6266_v28, %s5019_s25 }
 0x3c5   :  { %2473 = vrot.lane.b32.xlu0 %v1820_v45, %s5017_s17  ;;  %v1862_v45 = vld [vmem:[#allocation2 + $0x3c] sm:$0xff] }
 0x3c6   :  { %v1880_v33 = vpack.c.bf16 %v1862_v45, %v6314_v17  ;;  %v1882_v17 = vpack.c.bf16 %v6341_v29, %v1865_v54 }
 0x3c7   :  { %3009 = vrot.lane.b32.xlu1 %v1878_v31, %s5018_s22  ;;  %v6371_v31 = vpack.c.bf16 %v6362_v41, %v1862_v45  ;;  %v1913_v45 = vld [vmem:[#allocation2 + $0x56] sm:$0xff] }
 0x3c8   :  { %v1922_v29 = vpack.c.bf16 %v1914_v62, %v1913_v45  ;;  %v1916_v45 = vld [vmem:[#allocation2 + $0x6e] sm:$0xff] }
 0x3c9   :  { %2487 = vrot.lane.b32.xlu0 %v6202_v6, %s5018_s22 }
 0x3cb   :  { %3030 = vrot.lane.b32.xlu1 %v1898_v14, %s5019_s25 }
 0x3cd   :  { %2499 = vrot.lane.b32.xlu0 %v6257_v42, %s5018_s22 }
 0x3cf   :  { %3551 = vrot.lane.b32.xlu1 %v1918_v43, %s5019_s25  ;;  %v1845_v43 = vld [vmem:[#allocation2 + $0x53] sm:$0xff] }
 0x3d0   :  { %v6382_v58 = vpack.c.bf16 %v1845_v43, %v1844_v32 }
 0x3d1   :  { %2988 = vrot.lane.b32.xlu0 %v6202_v6, %s5017_s17 }
 0x3d3   :  { %1957 = vrot.lane.b32.xlu1 %v6282_v39, %s5018_s22 }
 0x3d5   :  { %3516 = vrot.lane.b32.xlu0 %v6215_v63, %s5017_s17  ;;  %v1821_v63 = vpack.c.bf16 %v1810_v57, %v6166_v47  ;;  %v1791_v47 = vld [vmem:[#allocation2 + $0x21] sm:$0xff]  ;;  %v6384_v57 = vld [vmem:[#allocation2 + $0x4c] sm:$0xff] }
 0x3d6   :  { %v6326_v24 = vpack.c.bf16 %v1792_v38, %v1791_v47  ;;  %v6391_v19 = vpack.c.bf16 %v1865_v54, %v6384_v57  ;;  %v1907_v38 = vld [vmem:[#allocation2 + $0x26] sm:$0xff]  ;;  %v1881_v43 = vpack.c.bf16 %v6384_v57, %v6362_v41  ;;  %v1901_v41 = vpack.c.bf16 %v1892_v10, %v1891_v2  ;;  %v1770_v2 = vld [vmem:[#allocation2 + $0x18] sm:$0xff] }
 0x3d7   :  { %1978 = vrot.lane.b32.xlu1 %v6288_v23, %s5019_s25 }
 0x3d9   :  { %1936 = vrot.lane.b32.xlu0 %v6294_v50, %s5017_s17 }
 0x3db   :  { %2510 = vrot.lane.b32.xlu1 %v6299_v51, %s5019_s25 }
 0x3dd   :  { %2475 = vrot.lane.b32.xlu0 %v1821_v63, %s5017_s17  ;;  %v1887_v63 = vld [vmem:[#allocation2 + $0x25] sm:$0xff] }
 0x3de   :  { %v1899_v47 = vpack.c.bf16 %v1888_v60, %v1887_v63  ;;  %v4882_v60 = vld [vmem:[%s7751_s7 + $0x20] sm:$0xff]  }
 0x3df   :  { %1959 = vrot.lane.b32.xlu1 %v6305_v21, %s5018_s22 }
 0x3e1   :  { %3530 = vrot.lane.b32.xlu0 %v1898_v14, %s5018_s22  ;;  %v1825_v14 = vpack.c.bf16 %v1818_v22, %v1817_v8  ;;  %v1919_v22 = vpack.c.bf16 %v1908_v9, %v1907_v38  ;;  %v1911_v38 = vld [vmem:[#allocation2 + $0x46] sm:$0xff]  ;;  %v1912_v9 = vld [vmem:[#allocation2 + $0x4e] sm:$0xff] }
 0x3e2   :  { %v1921_v48 = vpack.c.bf16 %v1912_v9, %v1911_v38 }
 0x3e3   :  { %1980 = vrot.lane.b32.xlu1 %v6310_v13, %s5019_s25 }
 0x3e5   :  { %2489 = vrot.lane.b32.xlu0 %v6288_v23, %s5018_s22 }
 0x3e7   :  { %2512 = vrot.lane.b32.xlu1 %v6322_v59, %s5019_s25 }
 0x3e9   :  { %1938 = vrot.lane.b32.xlu0 %v6326_v24, %s5017_s17 }
 0x3eb   :  { %1965 = vrot.lane.b32.xlu1 %v6330_v52, %s5018_s22 }
 0x3ed   :  { %2477 = vrot.lane.b32.xlu0 %v1822_v25, %s5017_s17 }
 0x3ef   :  { %1986 = vrot.lane.b32.xlu1 %v6335_v5, %s5019_s25 }
 0x3f1   :  { %2491 = vrot.lane.b32.xlu0 %v6310_v13, %s5018_s22 }
 0x3f3   :  { %2518 = vrot.lane.b32.xlu1 %v6347_v61, %s5019_s25 }
 0x3f5   :  { %1940 = vrot.lane.b32.xlu0 %v6351_v44, %s5017_s17 }
 0x3f7   :  { %1961 = vrot.lane.b32.xlu1 %v6355_v49, %s5018_s22 }
 0x3f9   :  { %2479 = vrot.lane.b32.xlu0 %v1823_v3, %s5017_s17 }
 0x3fb   :  { %1982 = vrot.lane.b32.xlu1 %v6360_v40, %s5019_s25 }
 0x3fd   :  { %1944 = vrot.lane.b32.xlu0 %v6366_v53, %s5017_s17 }
 0x3ff   :  { %2514 = vrot.lane.b32.xlu1 %v6371_v31, %s5019_s25 }
 0x401   :  { %2483 = vrot.lane.b32.xlu0 %v1825_v14, %s5017_s17  ;;  %v1768_v14 = vld [vmem:[#allocation2 + $0x8] sm:$0xff] }
 0x403   :  { %1963 = vrot.lane.b32.xlu1 %v6376_v34, %s5018_s22  ;;  %v1956_v25 = vpop.permute.xlu1 %1955 }
 0x405   :  { %2497 = vrot.lane.b32.xlu0 %v6335_v5, %s5018_s22 }
 0x407   :  { %1984 = vrot.lane.b32.xlu1 %v6382_v58, %s5019_s25  ;;  %v1977_v27 = vpop.permute.xlu1 %1976 }
 0x409   :  { %2493 = vrot.lane.b32.xlu0 %v6360_v40, %s5018_s22 }
 0x40b   :  { %2516 = vrot.lane.b32.xlu1 %v6391_v19, %s5019_s25  ;;  %v2509_v3 = vpop.permute.xlu1 %2508 }
 0x40d   :  { %1942 = vrot.lane.b32.xlu0 %v6395_v46, %s5017_s17 }
 0x40f   :  { %3011 = vrot.lane.b32.xlu1 %v1879_v15, %s5018_s22 }
 0x411   :  { %2481 = vrot.lane.b32.xlu0 %v1824_v35, %s5017_s17 }
 0x413   :  { %3032 = vrot.lane.b32.xlu1 %v1899_v47, %s5019_s25 }
 0x415   :  { %2495 = vrot.lane.b32.xlu0 %v6382_v58, %s5018_s22 }
 0x417   :  { %3553 = vrot.lane.b32.xlu1 %v1919_v22, %s5019_s25 }
 0x419   :  { %2990 = vrot.lane.b32.xlu0 %v6288_v23, %s5017_s17 }
 0x41b   :  { %3013 = vrot.lane.b32.xlu1 %v1880_v33, %s5018_s22  ;;  %v4884_v33 = vld [vmem:[%s7751_s7 + $0x28] sm:$0xff]  }
 0x41d   :  { %3518 = vrot.lane.b32.xlu0 %v6299_v51, %s5017_s17  ;;  %v1893_v51 = vld [vmem:[#allocation2 + $0x55] sm:$0xff] }
 0x41e   :  { %v1902_v11 = vpack.c.bf16 %v1894_v37, %v1893_v51  ;;  %v1896_v51 = vld [vmem:[#allocation2 + $0x6d] sm:$0xff] }
 0x41f   :  { %3034 = vrot.lane.b32.xlu1 %v1900_v4, %s5019_s25 }
 0x421   :  { %3532 = vrot.lane.b32.xlu0 %v1899_v47, %s5018_s22 }
 0x423   :  { %3555 = vrot.lane.b32.xlu1 %v1920_v7, %s5019_s25  ;;  %v4881_v7 = vld [vmem:[%s7751_s7 + $0x30] sm:$0xff]  }
 0x425   :  { %2992 = vrot.lane.b32.xlu0 %v6310_v13, %s5017_s17 }
 0x427   :  { %3017 = vrot.lane.b32.xlu1 %v1882_v17, %s5018_s22 }
 0x429   :  { %3520 = vrot.lane.b32.xlu0 %v6322_v59, %s5017_s17  ;;  %v1767_v59 = vld [vmem:[#allocation2] sm:$0xff] }
 0x42a   :  { %v1780_v54 = vpack.c.bf16 %v1768_v14, %v1767_v59 }
 0x42b   :  { %v6422_v36 = vpop.permute.xlu0 %1946  ;;  %3038 = vrot.lane.b32.xlu1 %v1902_v11, %s5019_s25 }
 0x42d   :  { %v6425_v8 = vpop.permute.xlu1 %1967  ;;  %3534 = vrot.lane.b32.xlu0 %v1900_v4, %s5018_s22 }
 0x42f   :  { %v6428_v55 = vpop.permute.xlu0 %2485  ;;  %3559 = vrot.lane.b32.xlu1 %v1922_v29, %s5019_s25 }
 0x431   :  { %v6431_v32 = vpop.permute.xlu1 %1988  ;;  %3538 = vrot.lane.b32.xlu0 %v1902_v11, %s5018_s22 }
 0x433   :  { %v1935_v15 = vpop.permute.xlu0 %1934  ;;  %3015 = vrot.lane.b32.xlu1 %v1881_v43, %s5018_s22  ;;  %v1877_v43 = vld [vmem:[#allocation2 + $0x74] sm:$0xf] }
 0x434   :  { %v1992_v63 = vsel %vm7858_vm0, %v1780_v54, %v1935_v15  ;;  %v1769_v15 = vld [vmem:[#allocation2 + $0x10] sm:$0xff]  ;;  %vm7874_vm0 = vmmov %vm7866_vm1 }
 0x435   :  { %v2012_v35 = vsel %vm7859_vm10, %v1992_v63, %v1956_v25  ;;  %v6442_v47 = vpop.permute.xlu1 %2520  ;;  %2998 = vrot.lane.b32.xlu0 %v6335_v5, %s5017_s17  ;;  %v1876_v25 = vld [vmem:[#allocation2 + $0x6c] sm:$0xff]  ;;  %v1884_v63 = vpack.c.bf16 %v1877_v43, %v1877_v43  ;;  %vm7875_vm10 = vmmov %vm7871_vm5 }
 0x436   :  { %v2026_v57 = vsel %vm7860_vm7, %v2012_v35, %v1977_v27  ;;  %v1883_v37 = vpack.c.bf16 %v1876_v25, %v6337_v18  ;;  %v1897_v35 = vld [vmem:[#allocation2 + $0x75] sm:$0xf]  ;;  %vm7876_vm7 = vmmov %vm7868_vm4 }
 0x437   :  { %v2474_v22 = vpop.permute.xlu0 %2473  ;;  %4683 = vmatmul.mubr.msk.bf16.vlgmr.msra.gmra.mrb[8].mxu1 %vm7861_vm9, %v2026_v57  ;;  %3036 = vrot.lane.b32.xlu1 %v1901_v41, %s5019_s25  ;;  %vm7877_vm9 = vmmov %vm7873_vm3 }
 0x438   :  { %4686 = vmatprep.mubr.msk.bf16.mxu1 %vm7862_vm2, %v5015_v0  ;;  %4743 = vmatpush3.bf16.msra.mxu1 %v4882_v60  ;;  %v2524_v4 = vsel %vm7863_vm6, %v6262_v12, %v2474_v22  ;;  %v1895_v12 = vld [vmem:[#allocation2 + $0x65] sm:$0xff]  ;;  %v1781_v60 = vpack.c.bf16 %v1770_v2, %v1769_v15  ;;  %v1904_v22 = vpack.c.bf16 %v1897_v35, %v1897_v35  ;;  %vm7878_vm6 = vmmov %vm7874_vm0  ;;  %v1774_v35 = vld [vmem:[#allocation2 + $0x38] sm:$0xff] }
 0x439   :  { %v6454_v16 = vpop.permute.xlu1 %3009  ;;  %2994 = vrot.lane.b32.xlu0 %v6360_v40, %s5017_s17  ;;  %4744 = vmatprep.subr.bf16.mxu1 %v5015_v0  ;;  %v1903_v18 = vpack.c.bf16 %v1896_v51, %v1895_v12 }
 0x43b   :  { %v2488_v26 = vpop.permute.xlu0 %2487  ;;  %3557 = vrot.lane.b32.xlu1 %v1921_v48, %s5019_s25  ;;  %v1917_v48 = vld [vmem:[#allocation2 + $0x76] sm:$0xf] }
 0x43c   :  { %v2544_v20 = vsel %vm7864_vm8, %v2524_v4, %v2488_v26  ;;  %4745 = vmatpush3.bf16.msra.mxu1 %v4884_v33  ;;  %v1924_v4 = vpack.c.bf16 %v1917_v48, %v1917_v48  ;;  %vm7879_vm8 = vmmov %vm7871_vm5 }
 0x43d   :  { %v2558_v27 = vsel %vm7865_vm11, %v2544_v20, %v2509_v3  ;;  %v6467_v17 = vpop.permute.xlu1 %3030  ;;  %3522 = vrot.lane.b32.xlu0 %v6371_v31, %s5017_s17  ;;  %v4883_v3 = vld [vmem:[%s7751_s7 + $0x38] sm:$0xff]   ;;  %v1915_v31 = vld [vmem:[#allocation2 + $0x66] sm:$0xff]  ;;  %vm7880_vm11 = vmmov %vm7868_vm4 }
 0x43e   :  { %4715 = vmatmul.mubr.msk.bf16.vlgmr.msra.gmra.mrb[16].mxu0 %vm7866_vm1, %v2558_v27  ;;  %v1923_v59 = vpack.c.bf16 %v1916_v45, %v1915_v31  ;;  %v1772_v27 = vld [vmem:[#allocation2 + $0x28] sm:$0xff]  ;;  %vm7881_vm1 = vmmov %vm7873_vm3 }
 0x43f   :  { %v6473_v11 = vpop.permute.xlu0 %2499  ;;  %3019 = vrot.lane.b32.xlu1 %v1883_v37, %s5018_s22  ;;  %4718 = vmatprep.mubr.msk.bf16.mxu0 %vm7862_vm2, %v5015_v0 }
 0x440   :  { %4775 = vmatpush3.bf16.msra.mxu0 %v4881_v7 }
 0x441   :  { %v6481_v62 = vpop.permute.xlu1 %3551  ;;  %3536 = vrot.lane.b32.xlu0 %v1901_v41, %s5018_s22  ;;  %4776 = vmatprep.subr.bf16.mxu0 %v5015_v0 }
 0x443   :  { %v6485_v29 = vpop.permute.xlu0 %2988  ;;  %3040 = vrot.lane.b32.xlu1 %v1903_v18, %s5019_s25 }
 0x444   :  { %4777 = vmatpush3.bf16.msra.mxu0 %v4883_v3  ;;  %v1771_v3 = vld [vmem:[#allocation2 + $0x20] sm:$0xff] }
 0x445   :  { %v1958_v14 = vpop.permute.xlu1 %1957  ;;  %2996 = vrot.lane.b32.xlu0 %v6382_v58, %s5017_s17 }
 0x447   :  { %v6490_v54 = vpop.permute.xlu0 %3516  ;;  %3561 = vrot.lane.b32.xlu1 %v1923_v59, %s5019_s25 }
 0x449   :  { %v1979_v10 = vpop.permute.xlu1 %1978  ;;  %3524 = vrot.lane.b32.xlu0 %v6391_v19, %s5017_s17 }
 0x44b   :  { %v1937_v41 = vpop.permute.xlu0 %1936  ;;  %3021 = vrot.lane.b32.xlu1 %v1884_v63, %s5018_s22 }
 0x44c   :  { %v1995_v57 = vsel %vm7867_vm13, %v1781_v60, %v1937_v41  ;;  %vm7882_vm13 = vmmov %vm7874_vm0  ;;  %v1773_v41 = vld [vmem:[#allocation2 + $0x30] sm:$0xff] }
 0x44d   :  { %v2014_v38 = vsel %vm7868_vm4, %v1995_v57, %v1958_v14  ;;  %v2511_v9 = vpop.permute.xlu1 %2510  ;;  %3526 = vrot.lane.b32.xlu0 %v6347_v61, %s5017_s17  ;;  %vm7883_vm4 = vmmov %vm7871_vm5 }
 0x44e   :  { %v2028_v33 = vsel %vm7869_vm14, %v2014_v38, %v1979_v10  ;;  %v1783_v38 = vpack.c.bf16 %v1774_v35, %v1773_v41  ;;  %vm7884_vm14 = vmmov %vm7876_vm7 }
 0x44f   :  { %v2476_v19 = vpop.permute.xlu0 %2475  ;;  %4687 = vmatmul.mubr.msk.bf16.gmra.mrb[12].mxu1 %vm7870_vm15, %v2028_v33  ;;  %3042 = vrot.lane.b32.xlu1 %v1904_v22, %s5019_s25  ;;  %vm7885_vm15 = vmmov %vm7881_vm1 }
 0x450   :  { %4690 = vmatprep.mubr.msk.bf16.mxu1 %vm7862_vm2, %v5015_v0  ;;  %v2527_v20 = vsel %vm7871_vm5, %v6294_v50, %v2476_v19  ;;  %vm7886_vm5 = vmmov %vm7874_vm0 }
 0x451   :  { %v1960_v25 = vpop.permute.xlu1 %1959  ;;  %3540 = vrot.lane.b32.xlu0 %v1903_v18, %s5018_s22  ;;  %v1782_v18 = vpack.c.bf16 %v1772_v27, %v1771_v3 }
 0x453   :  { %v6506_v26 = vpop.permute.xlu0 %3530  ;;  %3563 = vrot.lane.b32.xlu1 %v1924_v4, %s5019_s25 }
 0x455   :  { %v1981_v61 = vpop.permute.xlu1 %1980  ;;  %3000 = vrot.lane.b32.xlu0 %v6257_v42, %s5017_s17 }
 0x457   :  { %v2490_v7 = vpop.permute.xlu0 %2489 }
 0x458   :  { %v2546_v37 = vsel %vm7872_vm12, %v2527_v20, %v2490_v7  ;;  %vm7887_vm12 = vmmov %vm7883_vm4 }
 0x459   :  { %v2513_v12 = vpop.permute.xlu1 %2512  ;;  %3528 = vrot.lane.b32.xlu0 %v6266_v28, %s5017_s17  ;;  %v2560_v51 = vsel %vm7873_vm3, %v2546_v37, %v2511_v9  ;;  %vm7888_vm3 = vmmov %vm7876_vm7 }
 0x45a   :  { %4719 = vmatmul.mubr.msk.bf16.gmra.mrb[20].mxu0 %vm7874_vm0, %v2560_v51  ;;  %v1776_v51 = vld [vmem:[#allocation2 + $0x48] sm:$0xff]  ;;  %vm7889_vm0 = vmmov %vm7881_vm1 }
 0x45b   :  { %v1939_v31 = vpop.permute.xlu0 %1938  ;;  %4722 = vmatprep.mubr.msk.bf16.mxu0 %vm7862_vm2, %v5015_v0 }
 0x45c   :  { %v1998_v50 = vsel %vm7875_vm10, %v1782_v18, %v1939_v31  ;;  %vm7890_vm10 = vmmov %vm7886_vm5 }
 0x45d   :  { %v2016_v45 = vsel %vm7876_vm7, %v1998_v50, %v1960_v25  ;;  %v1966_v14 = vpop.permute.xlu1 %1965  ;;  %3542 = vrot.lane.b32.xlu0 %v1904_v22, %s5018_s22  ;;  %v1775_v50 = vld [vmem:[#allocation2 + $0x40] sm:$0xff]  ;;  %vm7891_vm7 = vmmov %vm7883_vm4 }
 0x45e   :  { %v2030_v59 = vsel %vm7877_vm9, %v2016_v45, %v1981_v61  ;;  %v1784_v45 = vpack.c.bf16 %v1776_v51, %v1775_v50  ;;  %vm7892_vm9 = vmmov %vm7888_vm3 }
 0x45f   :  { %v2478_v28 = vpop.permute.xlu0 %2477  ;;  %4691 = vmatmul.mubr.msk.bf16.gmra.mrb[16].mxu1 %vm7878_vm6, %v2030_v59  ;;  %v1778_v59 = vld [vmem:[#allocation2 + $0x58] sm:$0xff]  ;;  %vm7893_vm6 = vmmov %vm7889_vm0 }
 0x460   :  { %4694 = vmatprep.mubr.msk.bf16.mxu1 %vm7862_vm2, %v5015_v0  ;;  %v2530_v2 = vsel %vm7879_vm8, %v6326_v24, %v2478_v28  ;;  %vm7894_vm8 = vmmov %vm7886_vm5 }
 0x461   :  { %v1987_v43 = vpop.permute.xlu1 %1986 }
 0x463   :  { %v2492_v10 = vpop.permute.xlu0 %2491 }
 0x464   :  { %v2548_v15 = vsel %vm7880_vm11, %v2530_v2, %v2492_v10  ;;  %v1777_v10 = vld [vmem:[#allocation2 + $0x50] sm:$0xff]  ;;  %vm7895_vm11 = vmmov %vm7883_vm4 }
 0x465   :  { %v6530_v63 = vpop.permute.xlu1 %2518  ;;  %v2562_v60 = vsel %vm7881_vm1, %v2548_v15, %v2513_v12  ;;  %vm7896_vm1 = vmmov %vm7888_vm3 }
 0x466   :  { %4723 = vmatmul.mubr.msk.bf16.gmra.mrb[24].mxu0 %vm7882_vm13, %v2562_v60  ;;  %v1785_v60 = vpack.c.bf16 %v1778_v59, %v1777_v10  ;;  %vm7897_vm13 = vmmov %vm7883_vm4 }
 0x467   :  { %v1941_v57 = vpop.permute.xlu0 %1940  ;;  %4726 = vmatprep.mubr.msk.bf16.mxu0 %vm7862_vm2, %v5015_v0 }
 0x468   :  { %v2001_v22 = vsel %vm7883_vm4, %v1783_v38, %v1941_v57  ;;  %vm7898_vm4 = vmmov %vm7896_vm1 }
 0x469   :  { %v1962_v9 = vpop.permute.xlu1 %1961 }
 0x46a   :  { %v2018_v33 = vsel %vm7884_vm14, %v2001_v22, %v1962_v9  ;;  %vm7899_vm14 = vmmov %vm7889_vm0 }
 0x46b   :  { %v2480_v24 = vpop.permute.xlu0 %2479 }
 0x46c   :  { %v2533_v37 = vsel %vm7887_vm12, %v6351_v44, %v2480_v24  ;;  %vm7902_vm12 = vmmov %vm7894_vm8 }
 0x46d   :  { %v1983_v48 = vpop.permute.xlu1 %1982 }
 0x46e   :  { %v2032_v19 = vsel %vm7885_vm15, %v2018_v33, %v1983_v48  ;;  %v1779_v48 = vld [vmem:[#allocation2 + $0x60] sm:$0xf]  ;;  %vm7900_vm15 = vmmov %vm7886_vm5 }
 0x46f   :  { %v1945_v25 = vpop.permute.xlu0 %1944  ;;  %4695 = vmatmul.mubr.msk.bf16.gmra.mrb[20].mxu1 %vm7886_vm5, %v2032_v19  ;;  %vm7901_vm5 = vmmov %vm7889_vm0 }
 0x470   :  { %4698 = vmatprep.mubr.msk.bf16.mxu1 %vm7862_vm2, %v5015_v0  ;;  %v2007_v57 = vsel %vm7895_vm11, %v1785_v60, %v1945_v25  ;;  %vm7909_vm11 = vmmov %vm7894_vm8 }
 0x471   :  { %v2515_v4 = vpop.permute.xlu1 %2514  ;;  %v2022_v9 = vsel %vm7896_vm1, %v2007_v57, %v1966_v14  ;;  %v1786_v14 = vpack.c.bf16 %v1779_v48, %v1779_v48 }
 0x472   :  { %v2036_v25 = vsel %vm7901_vm5, %v2022_v9, %v1987_v43 }
 0x473   :  { %v2484_v61 = vpop.permute.xlu0 %2483 }
 0x475   :  { %v1964_v20 = vpop.permute.xlu1 %1963 }
 0x477   :  { %v2498_v7 = vpop.permute.xlu0 %2497 }
 0x479   :  { %v1985_v27 = vpop.permute.xlu1 %1984 }
 0x47b   :  { %v2494_v12 = vpop.permute.xlu0 %2493 }
 0x47c   :  { %v2550_v3 = vsel %vm7888_vm3, %v2533_v37, %v2494_v12  ;;  %vm7903_vm3 = vmmov %vm7891_vm7 }
 0x47d   :  { %v2517_v18 = vpop.permute.xlu1 %2516  ;;  %v2564_v31 = vsel %vm7889_vm0, %v2550_v3, %v2515_v4  ;;  %vm7904_vm0 = vmmov %vm7903_vm3 }
 0x47e   :  { %4727 = vmatmul.mubr.msk.bf16.gmra.mrb[28].mxu0 %vm7890_vm10, %v2564_v31  ;;  %v2010_v37 = vsel %vm7904_vm0, %v1786_v14, %v6422_v36  ;;  %vm7905_vm10 = vmmov %vm7896_vm1 }
 0x47f   :  { %v1943_v28 = vpop.permute.xlu0 %1942  ;;  %4730 = vmatprep.mubr.msk.bf16.mxu0 %vm7862_vm2, %v5015_v0 }
 0x480   :  { %v2004_v2 = vsel %vm7891_vm7, %v1784_v45, %v1943_v28  ;;  %vm7906_vm7 = vmmov %vm7896_vm1 }
 0x481   :  { %v2020_v44 = vsel %vm7892_vm9, %v2004_v2, %v1964_v20  ;;  %v3012_v15 = vpop.permute.xlu1 %3011  ;;  %v2024_v51 = vsel %vm7906_vm7, %v2010_v37, %v6425_v8  ;;  %vm7907_vm9 = vmmov %vm7901_vm5 }
 0x482   :  { %v2034_v35 = vsel %vm7893_vm6, %v2020_v44, %v1985_v27  ;;  %vm7908_vm6 = vmmov %vm7901_vm5 }
 0x483   :  { %v2482_v41 = vpop.permute.xlu0 %2481  ;;  %4699 = vmatmul.mubr.msk.bf16.gmra.mrb[24].mxu1 %vm7894_vm8, %v2034_v35  ;;  %v2038_v31 = vsel %vm7908_vm6, %v2024_v51, %v6431_v32  ;;  %vm7910_vm1 = vmmov %vm7904_vm0 }
 0x484   :  { %4702 = vmatprep.mubr.msk.bf16.mxu1 %vm7862_vm2, %v5015_v0  ;;  %v2536_v22 = vsel %vm7897_vm13, %v6395_v46, %v2482_v41  ;;  %v2539_v46 = vsel %vm7903_vm3, %v6366_v53, %v2484_v61  ;;  %v3046_v36 = vsel %vm7910_vm1, %v6188_v1, %v6485_v29  ;;  %vm7911_vm13 = vmmov %vm7904_vm0 }
 0x485   :  { %v3033_v38 = vpop.permute.xlu1 %3032  ;;  %v2554_v12 = vsel %vm7905_vm10, %v2539_v46, %v2498_v7  ;;  %v2542_v8 = vsel %vm7911_vm13, %v6243_v56, %v6428_v55  ;;  %vm7915_vm3 = vmmov %vm7894_vm8 }
 0x486   :  { %vm7916_vm10 = vmmov %vm7904_vm0 }
 0x487   :  { %v2496_v24 = vpop.permute.xlu0 %2495  ;;  %v3567_v55 = vsel %vm7916_vm10, %v6202_v6, %v6490_v54  ;;  %vm7917_vm7 = vmmov %vm7898_vm4 }
 0x488   :  { %v2552_v33 = vsel %vm7898_vm4, %v2536_v22, %v2496_v24  ;;  %vm7919_vm6 = vmmov %vm7901_vm5 }
 0x489   :  { %v3554_v19 = vpop.permute.xlu1 %3553  ;;  %v2566_v4 = vsel %vm7899_vm14, %v2552_v33, %v2517_v18  ;;  %v2568_v18 = vsel %vm7907_vm9, %v2554_v12, %v6530_v63  ;;  %v2556_v63 = vsel %vm7898_vm4, %v2542_v8, %v6473_v11  ;;  %vm7912_vm14 = vmmov %vm7898_vm4 }
 0x48a   :  { %4731 = vmatmul.mubr.msk.bf16.gmra.mrb[32].mxu0 %vm7900_vm15, %v2566_v4  ;;  %v3066_v61 = vsel %vm7912_vm14, %v3046_v36, %v6454_v16  ;;  %vm7913_vm15 = vmmov %vm7901_vm5  ;;  %v3587_v16 = vsel %vm7917_vm7, %v3567_v55, %v6506_v26  ;;  %v2170_v55 = vld [vmem:[%s7749_s3 + $0x4] sm:$0xe] }
 0x48b   :  { %v2991_v20 = vpop.permute.xlu0 %2990  ;;  %4703 = vmatmul.mubr.msk.bf16.gmra.mrb[28].mxu1 %vm7902_vm12, %v2036_v25  ;;  %4734 = vmatprep.mubr.msk.bf16.mxu0 %vm7862_vm2, %v5015_v0  ;;  %v2570_v45 = vsel %vm7913_vm15, %v2556_v63, %v6442_v47  ;;  %v3080_v1 = vsel %vm7901_vm5, %v3066_v61, %v6467_v17  ;;  %vm7914_vm12 = vmmov %vm7894_vm8  ;;  %v3601_v59 = vsel %vm7919_vm6, %v3587_v16, %v6481_v62  ;;  %v2183_v16 = vunpack.c.l.bf16 %v2170_v55 }
 0x48c   :  { %4706 = vmatprep.mubr.msk.bf16.mxu1 %vm7862_vm2, %v5015_v0  ;;  %v3049_v56 = vsel %vm7904_vm0, %v6282_v39, %v2991_v20  ;;  %vm7918_vm9 = vmmov %vm7898_vm4 }
 0x48d   :  { %v3014_v27 = vpop.permute.xlu1 %3013  ;;  %v3068_v17 = vsel %vm7918_vm9, %v3049_v56, %v3012_v15  ;;  %vm7922_vm1 = vmmov %vm7915_vm3 }
 0x48e   :  { %vm7923_vm13 = vmmov %vm7904_vm0 }
 0x48f   :  { %v3519_v43 = vpop.permute.xlu0 %3518  ;;  %vm7924_vm4 = vmmov %vm7904_vm0 }
 0x490   :  { %v3570_v62 = vsel %vm7924_vm4, %v6288_v23, %v3519_v43  ;;  %vm7925_vm14 = vmmov %vm7917_vm7 }
 0x491   :  { %v3035_v3 = vpop.permute.xlu1 %3034  ;;  %vm7926_vm15 = vmmov %vm7917_vm7 }
 0x492   :  { %4735 = vmatmul.mubr.msk.bf16.gmra.mrb[36].mxu0 %vm7894_vm8, %v2568_v18  ;;  %vm7920_vm8 = vmmov %vm7915_vm3 }
 0x493   :  { %v3533_v53 = vpop.permute.xlu0 %3532  ;;  %4707 = vmatmul.mubr.msk.bf16.gmra.mrb[32].mxu1 %vm7909_vm11, %v2038_v31  ;;  %4738 = vmatprep.mubr.msk.bf16.mxu0 %vm7862_vm2, %v5015_v0  ;;  %vm7921_vm11 = vmmov %vm7901_vm5 }
 0x494   :  { %4746 = vmatprep.mubr.msk.bf16.mxu1 %vm7862_vm2, %v5015_v0  ;;  %v3082_v39 = vsel %vm7921_vm11, %v3068_v17, %v3033_v38  ;;  %v3589_v26 = vsel %vm7925_vm14, %v3570_v62, %v3533_v53  ;;  %vm7929_vm0 = vmmov %vm7922_vm1  ;;  %v2210_v17 = vrot.slane %v2183_v16, 3 }
 0x495   :  { %v3556_v32 = vpop.permute.xlu1 %3555  ;;  %v3603_v60 = vsel %vm7901_vm5, %v3589_v26, %v3554_v19  ;;  %vm7930_vm10 = vmmov %vm7924_vm4 }
 0x496   :  { %vm7931_vm7 = vmmov %vm7924_vm4 }
 0x497   :  { %v2993_v7 = vpop.permute.xlu0 %2992  ;;  %vm7932_vm6 = vmmov %vm7918_vm9 }
 0x498   :  { %v3052_v6 = vsel %vm7923_vm13, %v6305_v21, %v2993_v7  ;;  %vm7934_vm11 = vmmov %vm7929_vm0 }
 0x499   :  { %v3018_v50 = vpop.permute.xlu1 %3017  ;;  %v3070_v10 = vsel %vm7926_vm15, %v3052_v6, %v3014_v27  ;;  %vm7936_vm13 = vmmov %vm7929_vm0 }
 0x49a   :  { %4739 = vmatmul.mubr.msk.bf16.gmra.mrb[40].mxu0 %vm7914_vm12, %v2570_v45  ;;  %vm7927_vm12 = vmmov %vm7922_vm1 }
 0x49b   :  { %v3521_v29 = vpop.permute.xlu0 %3520  ;;  %4747 = vmatmul.mubr.msk.bf16.vlgmr.msra.gmra.mrb[36].mxu1 %vm7915_vm3, %v3080_v1  ;;  %4778 = vmatprep.mubr.msk.bf16.mxu0 %vm7862_vm2, %v5015_v0  ;;  %vm7928_vm3 = vmmov %vm7901_vm5 }
 0x49c   :  { %4750 = vmatprep.mubr.msk.bf16.mxu1 %vm7862_vm2, %v5015_v0  ;;  %v3084_v35 = vsel %vm7928_vm3, %v3070_v10, %v3035_v3  ;;  %v3573_v41 = vsel %vm7931_vm7, %v6310_v13, %v3521_v29  ;;  %vm7937_vm14 = vmmov %vm7932_vm6 }
 0x49d   :  { %v3039_v47 = vpop.permute.xlu1 %3038  ;;  %vm7938_vm15 = vmmov %vm7924_vm4 }
 0x49e   :  { %vm7939_vm5 = vmmov %vm7932_vm6 }
 0x49f   :  { %v3535_v11 = vpop.permute.xlu0 %3534  ;;  %vm7944_vm7 = vmmov %vm7924_vm4 }
 0x4a0   :  { %v3591_v38 = vsel %vm7918_vm9, %v3573_v41, %v3535_v11  ;;  %vm7945_vm9 = vmmov %vm7939_vm5  ;;  %v2703_v11 = vld [vmem:[%s7748_s2 + $0x4] sm:$0xc] }
 0x4a1   :  { %v3560_v28 = vpop.permute.xlu1 %3559 }
 0x4a2   :  { %4779 = vmatmul.mubr.msk.bf16.vlgmr.msra.gmra.mrb[44].mxu0 %vm7920_vm8, %v3601_v59  ;;  %vm7933_vm8 = vmmov %vm7928_vm3  ;;  %v4574_v59 = vld [vmem:[%s7748_s2 + $0x8] sm:$0xff]  }
 0x4a3   :  { %v3539_v2 = vpop.permute.xlu0 %3538  ;;  %4751 = vmatmul.mubr.msk.bf16.gmra.mrb[40].mxu1 %vm7922_vm1, %v3082_v39  ;;  %4782 = vmatprep.mubr.msk.bf16.mxu0 %vm7862_vm2, %v5015_v0  ;;  %v3605_v33 = vsel %vm7933_vm8, %v3591_v38, %v3556_v32  ;;  %vm7935_vm1 = vmmov %vm7928_vm3  ;;  %v2716_v39 = vunpack.c.l.bf16 %v2703_v11  ;;  %v4491_v10 = vunpack.c.h.bf16 %v4574_v59  ;;  %v4576_v11 = vld [vmem:[%s7748_s2 + $0x18] sm:$0xff]  }
 0x4a4   :  { %4754 = vmatprep.mubr.msk.bf16.mxu1 %vm7862_vm2, %v5015_v0  ;;  %vm7941_vm3 = vmmov %vm7929_vm0 }
 0x4a5   :  { %v3016_v54 = vpop.permute.xlu1 %3015  ;;  %vm7947_vm8 = vmmov %vm7939_vm5 }
 0x4a7   :  { %v2999_v44 = vpop.permute.xlu0 %2998 }
 0x4a9   :  { %v3037_v15 = vpop.permute.xlu1 %3036 }
 0x4aa   :  { %4783 = vmatmul.mubr.msk.bf16.gmra.mrb[48].mxu0 %vm7927_vm12, %v3603_v60  ;;  %vm7940_vm12 = vmmov %vm7935_vm1 }
 0x4ab   :  { %v2995_v21 = vpop.permute.xlu0 %2994  ;;  %4755 = vmatmul.mubr.msk.bf16.gmra.mrb[44].mxu1 %vm7929_vm0, %v3084_v35  ;;  %4786 = vmatprep.mubr.msk.bf16.mxu0 %vm7862_vm2, %v5015_v0  ;;  %vm7942_vm0 = vmmov %vm7935_vm1  ;;  %v2742_v35 = vrot.slane %v2716_v39, 4 }
 0x4ac   :  { %v3055_v23 = vsel %vm7930_vm10, %v6355_v49, %v2995_v21  ;;  %4758 = vmatprep.mubr.msk.bf16.mxu1 %vm7862_vm2, %v5015_v0  ;;  %vm7943_vm10 = vmmov %vm7941_vm3 }
 0x4ad   :  { %v3558_v57 = vpop.permute.xlu1 %3557  ;;  %v3072_v9 = vsel %vm7932_vm6, %v3055_v23, %v3016_v54  ;;  %vm7946_vm6 = vmmov %vm7924_vm4 }
 0x4ae   :  { %v3086_v48 = vsel %vm7935_vm1, %v3072_v9, %v3037_v15  ;;  %v3061_v51 = vsel %vm7946_vm6, %v6330_v52, %v2999_v44  ;;  %vm7949_vm1 = vmmov %vm7942_vm0 }
 0x4af   :  { %v3523_v22 = vpop.permute.xlu0 %3522 }
 0x4b0   :  { %v3576_v13 = vsel %vm7924_vm4, %v6360_v40, %v3523_v22  ;;  %vm7951_vm4 = vmmov %vm7941_vm3 }
 0x4b1   :  { %v3020_v24 = vpop.permute.xlu1 %3019 }
 0x4b2   :  { %4787 = vmatmul.mubr.msk.bf16.gmra.mrb[52].mxu0 %vm7934_vm11, %v3605_v33  ;;  %v3076_v3 = vsel %vm7947_vm8, %v3061_v51, %v3020_v24  ;;  %vm7948_vm11 = vmmov %vm7942_vm0 }
 0x4b3   :  { %v3537_v49 = vpop.permute.xlu0 %3536  ;;  %4759 = vmatmul.mubr.msk.bf16.gmra.mrb[48].mxu1 %vm7936_vm13, %v3086_v48  ;;  %4790 = vmatprep.mubr.msk.bf16.mxu0 %vm7862_vm2, %v5015_v0  ;;  %vm7950_vm13 = vmmov %vm7941_vm3 }
 0x4b4   :  { %4762 = vmatprep.mubr.msk.bf16.mxu1 %vm7862_vm2, %v5015_v0  ;;  %v3593_v19 = vsel %vm7937_vm14, %v3576_v13, %v3537_v49  ;;  %vm7952_vm14 = vmmov %vm7946_vm6 }
 0x4b5   :  { %v3041_v4 = vpop.permute.xlu1 %3040  ;;  %v3607_v46 = vsel %vm7940_vm12, %v3593_v19, %v3558_v57  ;;  %vm7955_vm12 = vmmov %vm7947_vm8  ;;  %v2745_v57 = vrot.slane %v4491_v10, 4 }
 0x4b6   :  { %v3090_v31 = vsel %vm7949_vm1, %v3076_v3, %v3041_v4 }
 0x4b7   :  { %v2997_v25 = vpop.permute.xlu0 %2996 }
 0x4b8   :  { %v3058_v20 = vsel %vm7938_vm15, %v6376_v34, %v2997_v25  ;;  %vm7953_vm15 = vmmov %vm7939_vm5 }
 0x4b9   :  { %v3074_v14 = vsel %vm7939_vm5, %v3058_v20, %v3018_v50  ;;  %v3562_v34 = vpop.permute.xlu1 %3561  ;;  %vm7954_vm5 = vmmov %vm7946_vm6 }
 0x4ba   :  { %4791 = vmatmul.mubr.msk.bf16.gmra.mrb[56].mxu0 %vm7941_vm3, %v3607_v46  ;;  %v3088_v27 = vsel %vm7942_vm0, %v3074_v14, %v3039_v47  ;;  %vm7956_vm3 = vmmov %vm7942_vm0  ;;  %v4568_v47 = vld [vmem:[%s7749_s3 + $0x8] sm:$0xff]  }
 0x4bb   :  { %v3525_v37 = vpop.permute.xlu0 %3524  ;;  %4763 = vmatmul.mubr.msk.bf16.gmra.mrb[52].mxu1 %vm7943_vm10, %v3088_v27  ;;  %4794 = vmatprep.mubr.msk.bf16.mxu0 %vm7862_vm2, %v5015_v0  ;;  %vm7957_vm0 = vmmov %vm7951_vm4  ;;  %v4467_v26 = vunpack.c.h.bf16 %v4568_v47  ;;  %v4569_v27 = vld [vmem:[%s7749_s3 + $0x10] sm:$0xff]  }
 0x4bc   :  { %v3579_v40 = vsel %vm7944_vm7, %v6382_v58, %v3525_v37  ;;  %4766 = vmatprep.mubr.msk.bf16.mxu1 %vm7862_vm2, %v5015_v0  ;;  %vm7958_vm10 = vmmov %vm7949_vm1 }
 0x4bd   :  { %v3595_v12 = vsel %vm7945_vm9, %v3579_v40, %v3539_v2  ;;  %v3022_v53 = vpop.permute.xlu1 %3021  ;;  %vm7959_vm7 = vmmov %vm7957_vm0  ;;  %v2213_v23 = vrot.slane %v4467_v26, 3 }
 0x4be   :  { %v3609_v18 = vsel %vm7948_vm11, %v3595_v12, %v3560_v28  ;;  %vm7960_vm9 = vmmov %vm7954_vm5  ;;  %v4490_v28 = vunpack.c.l.bf16 %v4574_v59  ;;  %v4471_v12 = vunpack.c.h.bf16 %v4569_v27 }
 0x4bf   :  { %v3527_v43 = vpop.permute.xlu0 %3526  ;;  %vm7961_vm6 = vmmov %vm7947_vm8 }
 0x4c0   :  { %v3582_v52 = vsel %vm7952_vm14, %v6335_v5, %v3527_v43  ;;  %vm7962_vm8 = vmmov %vm7949_vm1  ;;  %v2743_v21 = vrot.slane %v4490_v28, 4  ;;  %v2217_v51 = vrot.slane %v4471_v12, 3 }
 0x4c1   :  { %v3043_v63 = vpop.permute.xlu1 %3042  ;;  %vm7963_vm11 = vmmov %vm7957_vm0 }
 0x4c2   :  { %4795 = vmatmul.mubr.msk.bf16.gmra.mrb[60].mxu0 %vm7950_vm13, %v3609_v18  ;;  %vm7964_vm1 = vmmov %vm7954_vm5  ;;  %vm7965_vm13 = vcmask 1043456  }
 0x4c3   :  { %v3541_v58 = vpop.permute.xlu0 %3540  ;;  %4767 = vmatmul.mubr.msk.bf16.gmra.mrb[56].mxu1 %vm7951_vm4, %v3090_v31  ;;  %4798 = vmatprep.mubr.msk.bf16.mxu0 %vm7862_vm2, %v5015_v0  ;;  %v2744_v9 = vsel %vm7965_vm13, %v2742_v35, %v2743_v21  ;;  %vm7966_vm4 = vmmov %vm7965_vm13  ;;  %v4575_v31 = vld [vmem:[%s7748_s2 + $0x10] sm:$0xff]  }
 0x4c4   :  { %4770 = vmatprep.mubr.msk.bf16.mxu1 %vm7862_vm2, %v5015_v0  ;;  %v3597_v36 = vsel %vm7953_vm15, %v3582_v52, %v3541_v58  ;;  %v2746_v13 = vsel %vm7966_vm4, %v2743_v21, %v2745_v57  ;;  %vm7967_vm14 = vmmov %vm7964_vm1 }
 0x4c5   :  { %v3611_v7 = vsel %vm7956_vm3, %v3597_v36, %v3562_v34  ;;  %vm7968_vm15 = vmmov %vm7964_vm1  ;;  %v4470_v34 = vunpack.c.l.bf16 %v4569_v27 }
 0x4c6   :  { %vm7971_vm3 = vmmov %vm7964_vm1 }
 0x4c7   :  { %v3001_v8 = vpop.permute.xlu0 %3000  ;;  %v2215_v43 = vrot.slane %v4470_v34, 3  ;;  %vm7980_vm13 = vmmov %vm7971_vm3 }
 0x4c8   :  { %v3064_v32 = vsel %vm7954_vm5, %v6249_v30, %v3001_v8  ;;  %v3564_v30 = vpop.permute.xlu1 %3563  ;;  %vm7969_vm5 = vmmov %vm7964_vm1 }
 0x4c9   :  { %v3078_v61 = vsel %vm7955_vm12, %v3064_v32, %v3022_v53  ;;  %vm7970_vm12 = vmmov %vm7964_vm1 }
 0x4ca   :  { %4799 = vmatmul.mubr.msk.bf16.gmra.mrb[64].mxu0 %vm7957_vm0, %v3611_v7  ;;  %v3092_v50 = vsel %vm7958_vm10, %v3078_v61, %v3043_v63  ;;  %v4494_v61 = vunpack.c.l.bf16 %v4575_v31  ;;  %vm7972_vm0 = vmmov %vm7966_vm4 }
 0x4cb   :  { %v3529_v45 = vpop.permute.xlu0 %3528  ;;  %4771 = vmatmul.mubr.msk.bf16.gmra.mrb[60].mxu1 %vm7959_vm7, %v3092_v50  ;;  %4802 = vmatprep.mubr.msk.bf16.mxu0 %vm7862_vm2, %v5015_v0  ;;  %v4466_v0 = vunpack.c.l.bf16 %v4568_v47  ;;  %vm2209_vm2 = vcmask 1044480   ;;  %vm7973_vm10 = vmmov %vm7972_vm0 }
 0x4cc   :  { %v3585_v5 = vsel %vm7960_vm9, %v6257_v42, %v3529_v45  ;;  %v2216_v18 = vsel %vm2209_vm2, %v2213_v23, %v2215_v43  ;;  %v2218_v36 = vsel %vm2209_vm2, %v2215_v43, %v2217_v51  ;;  %v4495_v45 = vunpack.c.h.bf16 %v4575_v31  ;;  %vm7974_vm7 = vmmov %vm7964_vm1 }
 0x4cd   :  { %v2211_v42 = vrot.slane %v4466_v0, 3  ;;  %vm7975_vm9 = vmmov %vm7964_vm1 }
 0x4ce   :  { %vm7981_vm4 = vmmov %vm7971_vm3 }
 0x4cf   :  { %v3543_v1 = vpop.permute.xlu0 %3542  ;;  %v2212_v6 = vsel %vm2209_vm2, %v2210_v17, %v2211_v42  ;;  %v2214_v48 = vsel %vm2209_vm2, %v2211_v42, %v2213_v23  ;;  %v4499_v23 = vunpack.c.h.bf16 %v4576_v11 }
 0x4d0   :  { %v3599_v29 = vsel %vm7961_vm6, %v3585_v5, %v3543_v1  ;;  %v4570_v5 = vld [vmem:[%s7749_s3 + $0x18] sm:$0xff]   ;;  %v2747_v1 = vrot.slane %v4494_v61, 4  ;;  %vm7976_vm6 = vmmov %vm7964_vm1 }
 0x4d1   :  { %v3613_v56 = vsel %vm7962_vm8, %v3599_v29, %v3564_v30  ;;  %v4474_v30 = vunpack.c.l.bf16 %v4570_v5  ;;  %v4475_v55 = vunpack.c.h.bf16 %v4570_v5  ;;  %vm7977_vm8 = vmmov %vm7972_vm0 }
 0x4d2   :  { %4803 = vmatmul.mubr.msk.bf16.gmra.mrb[68].mxu0 %vm7963_vm11, %v3613_v56  ;;  %v2749_v56 = vrot.slane %v4495_v45, 4  ;;  %v2748_v0 = vsel %vm7972_vm0, %v2745_v57, %v2747_v1  ;;  %vm7978_vm11 = vmmov %vm7964_vm1 }
 0x4d3   :  { %v2219_v42 = vrot.slane %v4474_v30, 3 }
 0x4d4   :  { %v2750_v28 = vsel %vm7973_vm10, %v2747_v1, %v2749_v56 }
 0x50a   :  { %v2103_v2 = vpop.f32.mrb[8].mxu1 }
 0x50b   :  { %v2157_v62 = vmax.f32 %v2103_v2, 0.0  ;;  %v4684_v54 = vpop.f32.mrb[9].mxu1 }
 0x50c   :  { %v2106_v44 = vpop.f32.mrb[10].mxu1  ;;  %v4498_v54 = vunpack.c.l.bf16 %v4576_v11  ;;  %v4572_v11 = vld [vmem:[%s7749_s3 + $0x28] sm:$0xff]  }
 0x50d   :  { %v6708_v15 = vadd.f32 %v2212_v6, %v2157_v62  ;;  %v4685_v60 = vpop.f32.mrb[11].mxu1  ;;  %v2158_v22 = vmax.f32 %v2106_v44, 0.0  ;;  %v2221_v62 = vrot.slane %v4475_v55, 3  ;;  %v2220_v44 = vsel %vm2209_vm2, %v2217_v51, %v2219_v42  ;;  %v4577_v55 = vld [vmem:[%s7748_s2 + $0x20] sm:$0xff]  }
 0x50f   :  { %v2261_v41 = vsel %vm7964_vm1, %v6708_v15, 0.0  ;;  %v6717_v20 = vadd.f32 %v2214_v48, %v2158_v22  ;;  %v2222_v57 = vsel %vm2209_vm2, %v2219_v42, %v2221_v62  ;;  %vm7979_vm1 = vmmov %vm7972_vm0  ;;  %v4503_v42 = vunpack.c.h.bf16 %v4577_v55 }
 0x510   :  { %2262 = vadd.xlane.f32.xlu0 %v2261_v41 }
 0x511   :  { %v2636_v38 = vpop.f32.mrb[16].mxu0  ;;  %v2264_v40 = vsel %vm7969_vm5, %v6717_v20, 0.0  ;;  %vm7984_vm5 = vmmov %vm7972_vm0 }
 0x512   :  { %v2690_v24 = vmax.f32 %v2636_v38, 0.0  ;;  %v4716_v33 = vpop.f32.mrb[17].mxu0 }
 0x513   :  { %v2639_v49 = vpop.f32.mrb[18].mxu0  ;;  %v2751_v33 = vrot.slane %v4498_v54, 4 }
 0x514   :  { %v6715_v19 = vadd.f32 %v2744_v9, %v2690_v24  ;;  %v2691_v4 = vmax.f32 %v2639_v49, 0.0  ;;  %v4717_v25 = vpop.f32.mrb[19].mxu0 }
 0x516   :  { %v6719_v14 = vadd.f32 %v2746_v13, %v2691_v4  ;;  %v2793_v46 = vsel %vm7967_vm14, %v6715_v19, 0.0  ;;  %v2753_v13 = vrot.slane %v4499_v23, 4  ;;  %v4571_v4 = vld [vmem:[%s7749_s3 + $0x20] sm:$0xff]   ;;  %vm7982_vm14 = vmmov %vm7971_vm3 }
 0x517   :  { %2794 = vadd.xlane.f32.xlu1 %v2793_v46  ;;  %v2752_v46 = vsel %vm7977_vm8, %v2749_v56, %v2751_v33  ;;  %v4478_v34 = vunpack.c.l.bf16 %v4571_v4  ;;  %v4479_v31 = vunpack.c.h.bf16 %v4571_v4 }
 0x518   :  { %v2796_v37 = vsel %vm7968_vm15, %v6719_v14, 0.0  ;;  %v2754_v43 = vsel %vm7979_vm1, %v2751_v33, %v2753_v13  ;;  %vm7983_vm15 = vmmov %vm7971_vm3 }
 0x519   :  { %2797 = vadd.xlane.f32.xlu0 %v2796_v37 }
 0x51b   :  { %2265 = vadd.xlane.f32.xlu1 %v2264_v40 }
 0x522   :  { %v2111_v3 = vpop.f32.mrb[12].mxu1 }
 0x523   :  { %v2159_v53 = vmax.f32 %v2111_v3, 0.0  ;;  %v4688_v58 = vpop.f32.mrb[13].mxu1 }
 0x524   :  { %v2114_v52 = vpop.f32.mrb[14].mxu1 }
 0x525   :  { %v6735_v8 = vadd.f32 %v2216_v18, %v2159_v53  ;;  %v2160_v32 = vmax.f32 %v2114_v52, 0.0  ;;  %v4689_v63 = vpop.f32.mrb[15].mxu1  ;;  %v2223_v52 = vrot.slane %v4478_v34, 3 }
 0x527   :  { %v6737_v7 = vadd.f32 %v2218_v36, %v2160_v32  ;;  %v2267_v50 = vsel %vm7970_vm12, %v6735_v8, 0.0  ;;  %v2225_v32 = vrot.slane %v4479_v31, 3  ;;  %v2224_v61 = vsel %vm2209_vm2, %v2221_v62, %v2223_v52  ;;  %vm7985_vm12 = vmmov %vm7972_vm0 }
 0x528   :  { %2268 = vadd.xlane.f32.xlu0 %v2267_v50  ;;  %vm7986_vm0 = vmmov %vm7971_vm3 }
 0x529   :  { %v2270_v29 = vsel %vm7971_vm3, %v6737_v7, 0.0  ;;  %v2226_v1 = vsel %vm2209_vm2, %v2223_v52, %v2225_v32  ;;  %vm7987_vm10 = vmmov %vm7986_vm0 }
 0x52a   :  { %vm7991_vm8 = vmmov %vm7986_vm0 }
 0x52c   :  { %2271 = vadd.xlane.f32.xlu0 %v2270_v29 }
 0x52d   :  { %v2644_v47 = vpop.f32.mrb[20].mxu0 }
 0x52e   :  { %v2692_v16 = vmax.f32 %v2644_v47, 0.0  ;;  %v4720_v17 = vpop.f32.mrb[21].mxu0 }
 0x52f   :  { %v2647_v59 = vpop.f32.mrb[22].mxu0  ;;  %v4502_v17 = vunpack.c.l.bf16 %v4577_v55 }
 0x530   :  { %v6751_v39 = vadd.f32 %v2748_v0, %v2692_v16  ;;  %v2693_v2 = vmax.f32 %v2647_v59, 0.0  ;;  %v4721_v6 = vpop.f32.mrb[23].mxu0 }
 0x531   :  { %v2755_v59 = vrot.slane %v4502_v17, 4  ;;  %v4483_v6 = vunpack.c.h.bf16 %v4572_v11 }
 0x532   :  { %v6753_v26 = vadd.f32 %v2750_v28, %v2693_v2  ;;  %v2119_v10 = vpop.f32.mrb[16].mxu1  ;;  %v2799_v60 = vsel %vm7974_vm7, %v6751_v39, 0.0  ;;  %v4482_v28 = vunpack.c.l.bf16 %v4572_v11  ;;  %v2757_v2 = vrot.slane %v4503_v42, 4  ;;  %vm7988_vm7 = vmmov %vm7979_vm1 }
 0x533   :  { %v2161_v35 = vmax.f32 %v2119_v10, 0.0  ;;  %v4692_v21 = vpop.f32.mrb[17].mxu1  ;;  %2800 = vadd.xlane.f32.xlu1 %v2799_v60  ;;  %v2756_v54 = vsel %vm7984_vm5, %v2753_v13, %v2755_v59  ;;  %vm7998_vm5 = vmmov %vm7986_vm0 }
 0x534   :  { %v2122_v41 = vpop.f32.mrb[18].mxu1  ;;  %v2802_v38 = vsel %vm7975_vm9, %v6753_v26, 0.0  ;;  %v2227_v60 = vrot.slane %v4482_v28, 3  ;;  %v2758_v23 = vsel %vm7985_vm12, %v2755_v59, %v2757_v2  ;;  %vm7989_vm9 = vmmov %vm7986_vm0  ;;  %vm3267_vm12 = vcmask 1042432  }
 0x535   :  { %v6761_v9 = vadd.f32 %v2220_v44, %v2161_v35  ;;  %v2162_v22 = vmax.f32 %v2122_v41, 0.0  ;;  %v4693_v24 = vpop.f32.mrb[19].mxu1  ;;  %2803 = vadd.xlane.f32.xlu0 %v2802_v38  ;;  %v4578_v35 = vld [vmem:[%s7748_s2 + $0x28] sm:$0xff]  }
 0x536   :  { %v4573_v24 = vld [vmem:[%s7749_s3 + $0x30] sm:$0xff]   ;;  %v4506_v33 = vunpack.c.l.bf16 %v4578_v35  ;;  %v2228_v4 = vsel %vm2209_vm2, %v2225_v32, %v2227_v60 }
 0x537   :  { %v6763_v48 = vadd.f32 %v2222_v57, %v2162_v22  ;;  %v2273_v49 = vsel %vm7976_vm6, %v6761_v9, 0.0  ;;  %v2229_v22 = vrot.slane %v4483_v6, 3  ;;  %v4487_v52 = vunpack.c.h.bf16 %v4573_v24  ;;  %vm7990_vm6 = vmmov %vm7979_vm1 }
 0x538   :  { %2274 = vadd.xlane.f32.xlu1 %v2273_v49 }
 0x539   :  { %v2652_v25 = vpop.f32.mrb[24].mxu0  ;;  %v2276_v27 = vsel %vm7978_vm11, %v6763_v48, 0.0  ;;  %vm7992_vm11 = vmmov %vm7986_vm0 }
 0x53a   :  { %v2694_v37 = vmax.f32 %v2652_v25, 0.0  ;;  %v4724_v40 = vpop.f32.mrb[25].mxu0  ;;  %2277 = vadd.xlane.f32.xlu0 %v2276_v27 }
 0x53b   :  { %v2655_v12 = vpop.f32.mrb[26].mxu0  ;;  %v4507_v40 = vunpack.c.h.bf16 %v4578_v35 }
 0x53c   :  { %v6774_v51 = vadd.f32 %v2752_v46, %v2694_v37  ;;  %v2695_v3 = vmax.f32 %v2655_v12, 0.0  ;;  %v4725_v18 = vpop.f32.mrb[27].mxu0  ;;  %v4486_v37 = vunpack.c.l.bf16 %v4573_v24  ;;  %v2230_v12 = vsel %vm2209_vm2, %v2227_v60, %v2229_v22 }
 0x53e   :  { %v6776_v53 = vadd.f32 %v2754_v43, %v2695_v3  ;;  %v2805_v58 = vsel %vm7980_vm13, %v6774_v51, 0.0 }
 0x53f   :  { %2806 = vadd.xlane.f32.xlu1 %v2805_v58  ;;  %v2759_v58 = vrot.slane %v4506_v33, 4 }
 0x540   :  { %v2808_v36 = vsel %vm7981_vm4, %v6776_v53, 0.0  ;;  %vm7996_vm4 = vmmov %vm7986_vm0 }
 0x541   :  { %2809 = vadd.xlane.f32.xlu0 %v2808_v36  ;;  %v4579_v36 = vld [vmem:[%s7748_s2 + $0x30] sm:$0xff]  }
 0x542   :  { %v2127_v63 = vpop.f32.mrb[20].mxu1  ;;  %v4511_v6 = vunpack.c.h.bf16 %v4579_v36 }
 0x543   :  { %v2163_v50 = vmax.f32 %v2127_v63, 0.0  ;;  %v4696_v45 = vpop.f32.mrb[21].mxu1 }
 0x544   :  { %v2130_v5 = vpop.f32.mrb[22].mxu1 }
 0x545   :  { %v6784_v30 = vadd.f32 %v2224_v61, %v2163_v50  ;;  %v2164_v29 = vmax.f32 %v2130_v5, 0.0  ;;  %v4697_v56 = vpop.f32.mrb[23].mxu1  ;;  %v2231_v61 = vrot.slane %v4486_v37, 3  ;;  %v2761_v50 = vrot.slane %v4507_v40, 4 }
 0x546   :  { %v2760_v5 = vsel %vm7988_vm7, %v2757_v2, %v2759_v58  ;;  %v4510_v56 = vunpack.c.l.bf16 %v4579_v36  ;;  %vm8000_vm7 = vmmov %vm7986_vm0 }
 0x547   :  { %v6789_v47 = vadd.f32 %v2226_v1, %v2164_v29  ;;  %v2279_v0 = vsel %vm7982_vm14, %v6784_v30, 0.0  ;;  %v2233_v29 = vrot.slane %v4487_v52, 3  ;;  %v2232_v42 = vsel %vm2209_vm2, %v2229_v22, %v2231_v61  ;;  %vm7997_vm14 = vmmov %vm7986_vm0 }
 0x548   :  { %2280 = vadd.xlane.f32.xlu1 %v2279_v0  ;;  %v2762_v28 = vsel %vm7990_vm6, %v2759_v58, %v2761_v50  ;;  %v2765_v22 = vrot.slane %v4511_v6, 4  ;;  %vm8002_vm6 = vmmov %vm7986_vm0 }
 0x549   :  { %v2282_v16 = vsel %vm7983_vm15, %v6789_v47, 0.0  ;;  %v2234_v60 = vsel %vm2209_vm2, %v2231_v61, %v2233_v29  ;;  %vm7993_vm2 = vmmov %vm7979_vm1  ;;  %vm2297_vm15 = vcmask 60416  }
 0x54a   :  { %2283 = vadd.xlane.f32.xlu0 %v2282_v16  ;;  %vm7994_vm1 = vmmov %vm7986_vm0 }
 0x54b   :  { %vm7995_vm13 = vmmov %vm7993_vm2 }
 0x551   :  { %v2660_v62 = vpop.f32.mrb[28].mxu0 }
 0x552   :  { %v2696_v10 = vmax.f32 %v2660_v62, 0.0  ;;  %v4728_v44 = vpop.f32.mrb[29].mxu0 }
 0x553   :  { %v2663_v21 = vpop.f32.mrb[30].mxu0 }
 0x554   :  { %v6803_v41 = vadd.f32 %v2756_v54, %v2696_v10  ;;  %v2697_v57 = vmax.f32 %v2663_v21, 0.0  ;;  %v4729_v38 = vpop.f32.mrb[31].mxu0  ;;  %v2763_v21 = vrot.slane %v4510_v56, 4 }
 0x556   :  { %v6808_v49 = vadd.f32 %v2758_v23, %v2697_v57  ;;  %v2135_v13 = vpop.f32.mrb[24].mxu1  ;;  %v2811_v25 = vsel %vm7971_vm3, %v6803_v41, 0.0  ;;  %vm3788_vm3 = vcmask 1041408  }
 0x557   :  { %v2165_v46 = vmax.f32 %v2135_v13, 0.0  ;;  %2812 = vadd.xlane.f32.xlu1 %v2811_v25  ;;  %v4700_v27 = vpop.f32.mrb[25].mxu1  ;;  %v3225_v13 = vld [vmem:[%s7746_s1 + $0x8] sm:$0xc] }
 0x558   :  { %v2138_v34 = vpop.f32.mrb[26].mxu1  ;;  %v2814_v43 = vsel %vm7986_vm0, %v6808_v49, 0.0  ;;  %v3239_v58 = vunpack.c.l.bf16 %v3225_v13 }
 0x559   :  { %v6816_v3 = vadd.f32 %v2228_v4, %v2165_v46  ;;  %v2166_v18 = vmax.f32 %v2138_v34, 0.0  ;;  %2815 = vadd.xlane.f32.xlu0 %v2814_v43  ;;  %v4701_v31 = vpop.f32.mrb[27].mxu1  ;;  %v6849_v4 = vld [vmem:[%s7746_s1 + $0xc] ss:$44 sps:$4 sm:$0xff]   ;;  %v2764_v46 = vsel %vm7993_vm2, %v2761_v50, %v2763_v21  ;;  %vm8006_vm2 = vmmov %vm7986_vm0 }
 0x55a   :  { %v3240_v52 = vunpack.c.l.bf16 %v6849_v4 }
 0x55b   :  { %v6821_v32 = vadd.f32 %v2230_v12, %v2166_v18  ;;  %v2285_v63 = vsel %vm7987_vm10, %v6816_v3, 0.0  ;;  %v2766_v18 = vsel %vm7995_vm13, %v2763_v21, %v2765_v22  ;;  %vm7999_vm10 = vmmov %vm7986_vm0 }
 0x55c   :  { %2286 = vadd.xlane.f32.xlu1 %v2285_v63  ;;  %vm8011_vm13 = vmmov %vm7986_vm0 }
 0x55d   :  { %v2668_v45 = vpop.f32.mrb[32].mxu0  ;;  %v2288_v1 = vsel %vm7989_vm9, %v6821_v32, 0.0  ;;  %vm8001_vm9 = vmmov %vm7986_vm0 }
 0x55e   :  { %v2698_v55 = vmax.f32 %v2668_v45, 0.0  ;;  %v4732_v0 = vpop.f32.mrb[33].mxu0  ;;  %2289 = vadd.xlane.f32.xlu0 %v2288_v1  ;;  %v2143_v16 = vpop.f32.mrb[28].mxu1 }
 0x55f   :  { %v2167_v17 = vmax.f32 %v2143_v16, 0.0  ;;  %v4704_v11 = vpop.f32.mrb[29].mxu1  ;;  %v2671_v59 = vpop.f32.mrb[34].mxu0  ;;  %v3746_v0 = vld [vmem:[%s7745_s0 + $0x8] sm:$0x8] }
 0x560   :  { %v6830_v62 = vadd.f32 %v2760_v5, %v2698_v55  ;;  %v2699_v2 = vmax.f32 %v2671_v59, 0.0  ;;  %v2146_v54 = vpop.f32.mrb[30].mxu1  ;;  %v4733_v10 = vpop.f32.mrb[35].mxu0  ;;  %v6872_v16 = vld [vmem:[%s7745_s0 + $0xc] ss:$44 sps:$4 sm:$0xff]   ;;  %v4580_v11 = vld [vmem:[%s7746_s1 + $0x10] sm:$0xff]   ;;  %v3760_v6 = vunpack.c.l.bf16 %v3746_v0 }
 0x561   :  { %v2168_v44 = vmax.f32 %v2146_v54, 0.0  ;;  %v4705_v35 = vpop.f32.mrb[31].mxu1  ;;  %v6833_v23 = vadd.f32 %v2232_v42, %v2167_v17  ;;  %v3268_v17 = vrot.slane %v3239_v58, 5  ;;  %v3269_v42 = vrot.slane %v3240_v52, 5  ;;  %v4585_v59 = vld [vmem:[%s7745_s0 + $0x10] sm:$0xff]  }
 0x562   :  { %v6835_v57 = vadd.f32 %v2762_v28, %v2699_v2  ;;  %v2817_v38 = vsel %vm7991_vm8, %v6830_v62, 0.0  ;;  %v3761_v2 = vunpack.c.l.bf16 %v6872_v16  ;;  %v4514_v13 = vunpack.c.l.bf16 %v4580_v11  ;;  %vm8003_vm8 = vmmov %vm7986_vm0 }
 0x563   :  { %2818 = vadd.xlane.f32.xlu1 %v2817_v38  ;;  %v6839_v24 = vadd.f32 %v2234_v60, %v2168_v44  ;;  %v2291_v34 = vsel %vm7994_vm1, %v6833_v23, 0.0  ;;  %v3270_v21 = vsel %vm3267_vm12, %v3268_v17, %v3269_v42  ;;  %vm8008_vm1 = vmmov %vm7986_vm0 }
 0x564   :  { %v2820_v33 = vsel %vm7992_vm11, %v6835_v57, 0.0  ;;  %v3271_v58 = vrot.slane %v4514_v13, 5  ;;  %vm8005_vm11 = vmmov %vm7986_vm0 }
 0x565   :  { %v2676_v25 = vpop.f32.mrb[36].mxu0  ;;  %2821 = vadd.xlane.f32.xlu0 %v2820_v33  ;;  %v2294_v45 = vsel %vm7996_vm4, %v6839_v24, 0.0  ;;  %vm8012_vm4 = vmmov %vm7986_vm0 }
 0x566   :  { %v2700_v27 = vmax.f32 %v2676_v25, 0.0  ;;  %v2151_v37 = vpop.f32.mrb[32].mxu1  ;;  %v4736_v40 = vpop.f32.mrb[37].mxu0  ;;  %v4534_v25 = vunpack.c.l.bf16 %v4585_v59 }
 0x567   :  { %v2169_v12 = vmax.f32 %v2151_v37, 0.0  ;;  %v2679_v43 = vpop.f32.mrb[38].mxu0  ;;  %2292 = vadd.xlane.f32.xlu1 %v2291_v34  ;;  %v4708_v31 = vpop.f32.mrb[33].mxu1  ;;  %v3789_v34 = vrot.slane %v3760_v6, 6 }
 0x568   :  { %v6856_v36 = vadd.f32 %v2764_v46, %v2700_v27  ;;  %v2701_v63 = vmax.f32 %v2679_v43, 0.0  ;;  %v2154_v61 = vpop.f32.mrb[34].mxu1  ;;  %v4737_v50 = vpop.f32.mrb[39].mxu0  ;;  %v4515_v43 = vunpack.c.h.bf16 %v4580_v11  ;;  %v3792_v52 = vrot.slane %v4534_v25, 6 }
 0x569   :  { %2295 = vadd.xlane.f32.xlu0 %v2294_v45  ;;  %v4709_v5 = vpop.f32.mrb[35].mxu1  ;;  %v6860_v1 = vadd.f32 %v2233_v29, %v2169_v12  ;;  %v3790_v12 = vrot.slane %v3761_v2, 6 }
 0x56a   :  { %v6862_v56 = vadd.f32 %v2766_v18, %v2701_v63  ;;  %v2823_v55 = vsel %vm7997_vm14, %v6856_v36, 0.0  ;;  %v4586_v63 = vld [vmem:[%s7745_s0 + $0x18] sm:$0xff]   ;;  %v3273_v45 = vrot.slane %v4515_v43, 5  ;;  %v4535_v5 = vunpack.c.h.bf16 %v4585_v59  ;;  %vm8013_vm14 = vmmov %vm7986_vm0 }
 0x56b   :  { %2824 = vadd.xlane.f32.xlu1 %v2823_v55  ;;  %v2298_v60 = vsel %vm2297_vm15, %v6860_v1, 0.0  ;;  %v3791_v50 = vsel %vm3788_vm3, %v3789_v34, %v3790_v12  ;;  %v3793_v2 = vsel %vm3788_vm3, %v3790_v12, %v3792_v52 }
 0x56c   :  { %v2826_v29 = vsel %vm7998_vm5, %v6862_v56, 0.0  ;;  %v3794_v25 = vrot.slane %v4535_v5, 6  ;;  %vm8014_vm5 = vmmov %vm7986_vm0 }
 0x56d   :  { %v2684_v28 = vpop.f32.mrb[40].mxu0  ;;  %2827 = vadd.xlane.f32.xlu0 %v2826_v29 }
 0x56e   :  { %v2702_v54 = vmax.f32 %v2684_v28, 0.0  ;;  %v4740_v10 = vpop.f32.mrb[41].mxu0  ;;  %v3158_v44 = vpop.f32.mrb[36].mxu1  ;;  %v3272_v28 = vsel %vm3267_vm12, %v3269_v42, %v3271_v58 }
 0x56f   :  { %v3212_v35 = vmax.f32 %v3158_v44, 0.0  ;;  %v2687_v38 = vpop.f32.mrb[42].mxu0  ;;  %2299 = vadd.xlane.f32.xlu1 %v2298_v60  ;;  %v4748_v33 = vpop.f32.mrb[37].mxu1  ;;  %v4538_v44 = vunpack.c.l.bf16 %v4586_v63 }
 0x570   :  { %v6886_v46 = vadd.f32 %v2765_v22, %v2702_v54  ;;  %v4741_v27 = vpop.f32.mrb[43].mxu0  ;;  %v3161_v37 = vpop.f32.mrb[38].mxu1  ;;  %v4581_v22 = vld [vmem:[%s7746_s1 + $0x18] sm:$0xff]   ;;  %v3274_v33 = vsel %vm3267_vm12, %v3271_v58, %v3273_v45  ;;  %v4582_v58 = vld [vmem:[%s7746_s1 + $0x20] sm:$0xff]  }
 0x571   :  { %v4749_v40 = vpop.f32.mrb[39].mxu1  ;;  %v6888_v18 = vadd.f32 %v3270_v21, %v3212_v35  ;;  %v3213_v55 = vmax.f32 %v3161_v37, 0.0  ;;  %v4518_v10 = vunpack.c.l.bf16 %v4581_v22  ;;  %v4519_v27 = vunpack.c.h.bf16 %v4581_v22  ;;  %v6922_v22 = vld [vmem:[%s7745_s0 + $0x20] sm:$0xff]  }
 0x572   :  { %v2829_v31 = vsel %vm2297_vm15, %v6886_v46, 0.0  ;;  %v3796_v12 = vrot.slane %v4538_v44, 6  ;;  %v4522_v44 = vunpack.c.l.bf16 %v4582_v58 }
 0x573   :  { %2830 = vadd.xlane.f32.xlu1 %v2829_v31  ;;  %v3321_v11 = vsel %vm7986_vm0, %v6888_v18, 0.0  ;;  %v6906_v37 = vadd.f32 %v3272_v28, %v3213_v55  ;;  %v3275_v34 = vrot.slane %v4518_v10, 5  ;;  %v3277_v5 = vrot.slane %v4519_v27, 5 }
 0x574   :  { %v4539_v55 = vunpack.c.h.bf16 %v4586_v63 }
 0x575   :  { %v3679_v61 = vpop.f32.mrb[44].mxu0  ;;  %v3324_v28 = vsel %vm8001_vm9, %v6906_v37, 0.0  ;;  %vm8020_vm9 = vmmov %vm7986_vm0 }
 0x576   :  { %v3733_v0 = vmax.f32 %v3679_v61, 0.0  ;;  %v3166_v17 = vpop.f32.mrb[40].mxu1  ;;  %v4780_v29 = vpop.f32.mrb[45].mxu0  ;;  %v3798_v27 = vrot.slane %v4539_v55, 6 }
 0x577   :  { %v3682_v6 = vpop.f32.mrb[46].mxu0  ;;  %3322 = vadd.xlane.f32.xlu1 %v3321_v11  ;;  %v4752_v54 = vpop.f32.mrb[41].mxu1  ;;  %v3214_v35 = vmax.f32 %v3166_v17, 0.0 }
 0x578   :  { %v6903_v60 = vadd.f32 %v3791_v50, %v3733_v0  ;;  %v3734_v59 = vmax.f32 %v3682_v6, 0.0  ;;  %v3169_v21 = vpop.f32.mrb[42].mxu1  ;;  %v4781_v38 = vpop.f32.mrb[47].mxu0  ;;  %v3795_v50 = vsel %vm3788_vm3, %v3792_v52, %v3794_v25  ;;  %v3276_v6 = vsel %vm3267_vm12, %v3273_v45, %v3275_v34 }
 0x579   :  { %v4753_v13 = vpop.f32.mrb[43].mxu1  ;;  %v6912_v43 = vadd.f32 %v3274_v33, %v3214_v35  ;;  %v3215_v0 = vmax.f32 %v3169_v21, 0.0  ;;  %v3797_v54 = vsel %vm3788_vm3, %v3794_v25, %v3796_v12  ;;  %v4542_v52 = vunpack.c.l.bf16 %v6922_v22 }
 0x57a   :  { %v6908_v42 = vadd.f32 %v3793_v2, %v3734_v59  ;;  %v3842_v40 = vsel %vm7999_vm10, %v6903_v60, 0.0  ;;  %v3278_v13 = vsel %vm3267_vm12, %v3275_v34, %v3277_v5  ;;  %v4523_v25 = vunpack.c.h.bf16 %v4582_v58  ;;  %v4583_v34 = vld [vmem:[%s7746_s1 + $0x28] sm:$0xff]   ;;  %vm8017_vm10 = vmmov %vm7986_vm0 }
 0x57b   :  { %3843 = vadd.xlane.f32.xlu0 %v3842_v40  ;;  %v3327_v33 = vsel %vm8002_vm6, %v6912_v43, 0.0  ;;  %v6935_v40 = vadd.f32 %v3276_v6, %v3215_v0  ;;  %v6951_v58 = vld [vmem:[%s7745_s0 + $0x28] sm:$0xff]   ;;  %v3799_v0 = vsel %vm3788_vm3, %v3796_v12, %v3798_v27  ;;  %v4543_v6 = vunpack.c.h.bf16 %v6922_v22  ;;  %vm8023_vm6 = vmmov %vm7986_vm0 }
 0x57c   :  { %v3845_v31 = vsel %vm8000_vm7, %v6908_v42, 0.0  ;;  %v4546_v12 = vunpack.c.l.bf16 %v6951_v58  ;;  %vm8018_vm7 = vmmov %vm7986_vm0 }
 0x57d   :  { %v3687_v61 = vpop.f32.mrb[48].mxu0  ;;  %3846 = vadd.xlane.f32.xlu1 %v3845_v31 }
 0x57e   :  { %v3735_v17 = vmax.f32 %v3687_v61, 0.0  ;;  %v3174_v29 = vpop.f32.mrb[44].mxu1  ;;  %v4784_v11 = vpop.f32.mrb[49].mxu0 }
 0x57f   :  { %v3690_v2 = vpop.f32.mrb[50].mxu0  ;;  %3325 = vadd.xlane.f32.xlu0 %v3324_v28  ;;  %v4756_v10 = vpop.f32.mrb[45].mxu1  ;;  %v3216_v63 = vmax.f32 %v3174_v29, 0.0  ;;  %v3281_v28 = vrot.slane %v4523_v25, 5 }
 0x580   :  { %v6930_v35 = vadd.f32 %v3795_v50, %v3735_v17  ;;  %v3736_v59 = vmax.f32 %v3690_v2, 0.0  ;;  %v3177_v21 = vpop.f32.mrb[46].mxu1  ;;  %v4785_v38 = vpop.f32.mrb[51].mxu0  ;;  %v3279_v50 = vrot.slane %v4522_v44, 5  ;;  %v3800_v17 = vrot.slane %v4542_v52, 6 }
 0x581   :  { %3328 = vadd.xlane.f32.xlu1 %v3327_v33  ;;  %v4757_v45 = vpop.f32.mrb[47].mxu1  ;;  %v6941_v29 = vadd.f32 %v3278_v13, %v3216_v63  ;;  %v3217_v2 = vmax.f32 %v3177_v21, 0.0  ;;  %v3330_v52 = vsel %vm8006_vm2, %v6935_v40, 0.0  ;;  %v4526_v13 = vunpack.c.l.bf16 %v4583_v34  ;;  %vm8026_vm2 = vmmov %vm7986_vm0 }
 0x582   :  { %v6937_v31 = vadd.f32 %v3797_v54, %v3736_v59  ;;  %v3848_v61 = vsel %vm8003_vm8, %v6930_v35, 0.0  ;;  %v3280_v63 = vsel %vm3267_vm12, %v3277_v5, %v3279_v50  ;;  %v3801_v38 = vsel %vm3788_vm3, %v3798_v27, %v3800_v17  ;;  %vm8024_vm8 = vmmov %vm7986_vm0 }
 0x583   :  { %3849 = vadd.xlane.f32.xlu0 %v3848_v61  ;;  %8004 = vst [vmem:[#allocation3_spill] sm:$0xff] %v6941_v29  ;;  %v4527_v27 = vunpack.c.h.bf16 %v4583_v34  ;;  %v6981_v34 = vld [vmem:[%s7745_s0 + $0x30] sm:$0xff]  }
 0x584   :  { %v3851_v11 = vsel %vm8005_vm11, %v6937_v31, 0.0  ;;  %vm8025_vm11 = vmmov %vm7986_vm0 }
 0x585   :  { %v3695_v55 = vpop.f32.mrb[52].mxu0  ;;  %3852 = vadd.xlane.f32.xlu1 %v3851_v11  ;;  %v3333_v11 = vsel %vm8008_vm1, %v6941_v29, 0.0  ;;  %vm8027_vm1 = vmmov %vm7986_vm0 }
 0x586   :  { %v3737_v54 = vmax.f32 %v3695_v55, 0.0  ;;  %v3182_v10 = vpop.f32.mrb[48].mxu1  ;;  %v4788_v44 = vpop.f32.mrb[53].mxu0  ;;  %v3282_v55 = vsel %vm3267_vm12, %v3279_v50, %v3281_v28  ;;  %v4584_v50 = vld [vmem:[%s7746_s1 + $0x30] sm:$0xff]  }
 0x587   :  { %v3698_v59 = vpop.f32.mrb[54].mxu0  ;;  %3331 = vadd.xlane.f32.xlu0 %v3330_v52  ;;  %v4760_v33 = vpop.f32.mrb[49].mxu1  ;;  %v3218_v22 = vmax.f32 %v3182_v10, 0.0  ;;  %v3802_v44 = vrot.slane %v4543_v6, 6  ;;  %v6965_v52 = vadd.f32 %v3280_v63, %v3217_v2  ;;  %v3804_v10 = vrot.slane %v4546_v12, 6 }
 0x588   :  { %v6960_v45 = vadd.f32 %v3799_v0, %v3737_v54  ;;  %v3738_v21 = vmax.f32 %v3698_v59, 0.0  ;;  %v3185_v25 = vpop.f32.mrb[50].mxu1  ;;  %v4789_v61 = vpop.f32.mrb[55].mxu0  ;;  %v3283_v54 = vrot.slane %v4526_v13, 5  ;;  %v3285_v63 = vrot.slane %v4527_v27, 5 }
 0x589   :  { %3334 = vadd.xlane.f32.xlu1 %v3333_v11  ;;  %v4761_v5 = vpop.f32.mrb[51].mxu1  ;;  %8009 = vst [vmem:[#allocation5_spill] sm:$0xff] %v6965_v52  ;;  %v6971_v59 = vadd.f32 %v3282_v55, %v3218_v22  ;;  %v3803_v2 = vsel %vm3788_vm3, %v3800_v17, %v3802_v44  ;;  %v3219_v13 = vmax.f32 %v3185_v25, 0.0  ;;  %v3336_v11 = vsel %vm8013_vm14, %v6965_v52, 0.0  ;;  %vm8032_vm14 = vmmov %vm7986_vm0 }
 0x58a   :  { %8007 = vst [vmem:[#allocation4_spill] sm:$0xff] %v6960_v45  ;;  %v6967_v33 = vadd.f32 %v3801_v38, %v3738_v21  ;;  %v3854_v0 = vsel %vm8011_vm13, %v6960_v45, 0.0  ;;  %v4547_v38 = vunpack.c.h.bf16 %v6951_v58  ;;  %v3284_v55 = vsel %vm3267_vm12, %v3281_v28, %v3283_v54  ;;  %vm8028_vm13 = vmmov %vm7986_vm0 }
 0x58b   :  { %3855 = vadd.xlane.f32.xlu0 %v3854_v0  ;;  %v3805_v0 = vsel %vm3788_vm3, %v3802_v44, %v3804_v10  ;;  %v4530_v45 = vunpack.c.l.bf16 %v4584_v50  ;;  %v4550_v17 = vunpack.c.l.bf16 %v6981_v34  ;;  %v3286_v52 = vsel %vm3267_vm12, %v3283_v54, %v3285_v63 }
 0x58c   :  { %8010 = vst [vmem:[#allocation6_spill] sm:$0xff] %v6967_v33  ;;  %v3857_v61 = vsel %vm8012_vm4, %v6967_v33, 0.0  ;;  %v3806_v29 = vrot.slane %v4547_v38, 6  ;;  %v4531_v44 = vunpack.c.h.bf16 %v4584_v50  ;;  %v4551_v38 = vunpack.c.h.bf16 %v6981_v34  ;;  %vm8031_vm4 = vmmov %vm7986_vm0 }
 0x58d   :  { %v3703_v6 = vpop.f32.mrb[56].mxu0  ;;  %3858 = vadd.xlane.f32.xlu1 %v3857_v61  ;;  %v3251_v34 = vunpack.c.h.bf16 %v6849_v4 }
 0x58e   :  { %v3739_v12 = vmax.f32 %v3703_v6, 0.0  ;;  %v3190_v22 = vpop.f32.mrb[52].mxu1  ;;  %v4792_v21 = vpop.f32.mrb[57].mxu0  ;;  %v3289_v50 = vrot.slane %v4531_v44, 5  ;;  %v3772_v44 = vunpack.c.h.bf16 %v6872_v16 }
 0x58f   :  { %v3706_v5 = vpop.f32.mrb[58].mxu0  ;;  %3337 = vadd.xlane.f32.xlu0 %v3336_v11  ;;  %v4764_v33 = vpop.f32.mrb[53].mxu1  ;;  %v3220_v58 = vmax.f32 %v3190_v22, 0.0  ;;  %v3339_v21 = vsel %vm8014_vm5, %v6971_v59, 0.0  ;;  %v6995_v11 = vadd.f32 %v3284_v55, %v3219_v13  ;;  %v3808_v22 = vrot.slane %v4550_v17, 6  ;;  %vm8033_vm5 = vmmov %vm7986_vm0 }
 0x590   :  { %v6990_v27 = vadd.f32 %v3803_v2, %v3739_v12  ;;  %v3740_v25 = vmax.f32 %v3706_v5, 0.0  ;;  %v3193_v61 = vpop.f32.mrb[54].mxu1  ;;  %v4793_v6 = vpop.f32.mrb[59].mxu0  ;;  %v3287_v12 = vrot.slane %v4530_v45, 5  ;;  %v3238_v13 = vld [vmem:[%s7746_s1 + $0x3c] sm:$0x1] }
 0x591   :  { %3340 = vadd.xlane.f32.xlu1 %v3339_v21  ;;  %v4765_v28 = vpop.f32.mrb[55].mxu1  ;;  %8015 = vst [vmem:[#allocation7_spill] sm:$0xff] %v6995_v11  ;;  %v7001_v5 = vadd.f32 %v3286_v52, %v3220_v58  ;;  %v3807_v21 = vsel %vm3788_vm3, %v3804_v10, %v3806_v29  ;;  %v3221_v55 = vmax.f32 %v3193_v61, 0.0  ;;  %v3342_v52 = vsel %vm8018_vm7, %v6995_v11, 0.0  ;;  %vm8035_vm7 = vmmov %vm7986_vm0 }
 0x592   :  { %v6997_v33 = vadd.f32 %v3805_v0, %v3740_v25  ;;  %v3860_v2 = vsel %vm7986_vm0, %v6990_v27, 0.0  ;;  %v3288_v58 = vsel %vm3267_vm12, %v3285_v63, %v3287_v12  ;;  %v3809_v10 = vsel %vm3788_vm3, %v3806_v29, %v3808_v22 }
 0x593   :  { %3861 = vadd.xlane.f32.xlu0 %v3860_v2  ;;  %v3345_v11 = vsel %vm8020_vm9, %v7001_v5, 0.0  ;;  %v3290_v63 = vsel %vm3267_vm12, %v3287_v12, %v3289_v50  ;;  %v3810_v29 = vrot.slane %v4551_v38, 6  ;;  %vm8036_vm9 = vmmov %vm7986_vm0 }
 0x594   :  { %8016 = vst [vmem:[#allocation8_spill] sm:$0xff] %v6997_v33  ;;  %v3863_v6 = vsel %vm8017_vm10, %v6997_v33, 0.0  ;;  %vm8034_vm10 = vmmov %vm7986_vm0 }
 0x595   :  { %v3711_v54 = vpop.f32.mrb[60].mxu0  ;;  %3864 = vadd.xlane.f32.xlu1 %v3863_v6  ;;  %v3811_v12 = vsel %vm3788_vm3, %v3808_v22, %v3810_v29 }
 0x596   :  { %v3741_v45 = vmax.f32 %v3711_v54, 0.0  ;;  %v3198_v0 = vpop.f32.mrb[56].mxu1  ;;  %v4796_v17 = vpop.f32.mrb[61].mxu0 }
 0x597   :  { %v3714_v25 = vpop.f32.mrb[62].mxu0  ;;  %3343 = vadd.xlane.f32.xlu0 %v3342_v52  ;;  %v4768_v28 = vpop.f32.mrb[57].mxu1  ;;  %v3222_v61 = vmax.f32 %v3198_v0, 0.0  ;;  %v3252_v52 = vunpack.c.l.bf16 %v3238_v13  ;;  %v3812_v0 = vrot.slane %v3772_v44, 6 }
 0x598   :  { %v7016_v2 = vadd.f32 %v3807_v21, %v3741_v45  ;;  %v3742_v6 = vmax.f32 %v3714_v25, 0.0  ;;  %v3201_v54 = vpop.f32.mrb[58].mxu1  ;;  %v4797_v17 = vpop.f32.mrb[63].mxu0  ;;  %v7021_v28 = vadd.f32 %v3288_v58, %v3221_v55  ;;  %v3759_v21 = vld [vmem:[%s7745_s0 + $0x3c] sm:$0x1]  ;;  %v3291_v45 = vrot.slane %v3251_v34, 5 }
 0x599   :  { %3346 = vadd.xlane.f32.xlu1 %v3345_v11  ;;  %v4769_v33 = vpop.f32.mrb[59].mxu1  ;;  %v7030_v25 = vadd.f32 %v3290_v63, %v3222_v61  ;;  %v3293_v13 = vrot.slane %v3252_v52, 5  ;;  %v3773_v55 = vunpack.c.l.bf16 %v3759_v21  ;;  %v3223_v58 = vmax.f32 %v3201_v54, 0.0 }
 0x59a   :  { %8019 = vst [vmem:[#allocation9_spill] sm:$0xff] %v7016_v2  ;;  %8021 = vst [vmem:[#allocation10_spill] sm:$0xff] %v7021_v28  ;;  %v7023_v4 = vadd.f32 %v3809_v10, %v3742_v6  ;;  %v3866_v16 = vsel %vm8023_vm6, %v7016_v2, 0.0  ;;  %v3348_v34 = vsel %vm8025_vm11, %v7021_v28, 0.0  ;;  %v3292_v44 = vsel %vm3267_vm12, %v3289_v50, %v3291_v45 }
 0x59b   :  { %3867 = vadd.xlane.f32.xlu0 %v3866_v16  ;;  %v3813_v63 = vsel %vm3788_vm3, %v3810_v29, %v3812_v0  ;;  %v3351_v54 = vsel %vm8026_vm2, %v7030_v25, 0.0  ;;  %v3814_v28 = vrot.slane %v3773_v55, 6  ;;  %v7044_v50 = vadd.f32 %v3292_v44, %v3223_v58  ;;  %vm8038_vm6 = vmmov %vm7986_vm0 }
 0x59c   :  { %8022 = vst [vmem:[#allocation11_spill] sm:$0xff] %v7023_v4  ;;  %v3869_v11 = vsel %vm8024_vm8, %v7023_v4, 0.0  ;;  %vm8039_vm8 = vmmov %vm7986_vm0 }
 0x59d   :  { %v3719_v33 = vpop.f32.mrb[64].mxu0  ;;  %v2263_v38 = vpop.xlane.xlu0 %2262  ;;  %3870 = vadd.xlane.f32.xlu1 %v3869_v11  ;;  %vm8040_vm11 = vmmov %vm7986_vm0 }
 0x59e   :  { %v3743_v10 = vmax.f32 %v3719_v33, 0.0  ;;  %v3206_v6 = vpop.f32.mrb[60].mxu1  ;;  %v4800_v17 = vpop.f32.mrb[65].mxu0  ;;  %v3294_v33 = vsel %vm3267_vm12, %v3291_v45, %v3293_v13  ;;  %v2302_v2 = vmul.f32 0.125, %v2263_v38  ;;  %v3815_v45 = vsel %vm3788_vm3, %v3812_v0, %v3814_v28  ;;  %vm8029_vm12 = vmmov %vm7986_vm0 }
 0x59f   :  { %v3722_v61 = vpop.f32.mrb[66].mxu0  ;;  %3349 = vadd.xlane.f32.xlu0 %v3348_v34  ;;  %v4772_v16 = vpop.f32.mrb[61].mxu1  ;;  %v3224_v22 = vmax.f32 %v3206_v6, 0.0  ;;  %vm8030_vm3 = vmmov %vm7986_vm0 }
 0x5a0   :  { %v7039_v4 = vadd.f32 %v3811_v12, %v3743_v10  ;;  %v3744_v11 = vmax.f32 %v3722_v61, 0.0  ;;  %v3209_v52 = vpop.f32.mrb[62].mxu1  ;;  %v4801_v21 = vpop.f32.mrb[67].mxu0  ;;  %v7056_v13 = vsub.f32 %v6708_v15, %v2302_v2  ;;  %vm8041_vm2 = vmmov %vm7986_vm0 }
 0x5a1   :  { %3352 = vadd.xlane.f32.xlu1 %v3351_v54  ;;  %v4773_v17 = vpop.f32.mrb[63].mxu1  ;;  %v7050_v10 = vadd.f32 %v3294_v33, %v3224_v22 }
 0x5a2   :  { %v7046_v29 = vadd.f32 %v3813_v63, %v3744_v11  ;;  %v3872_v12 = vsel %vm8027_vm1, %v7039_v4, 0.0  ;;  %v3354_v63 = vsel %vm8029_vm12, %v7044_v50, 0.0  ;;  %v2328_v54 = vmul.f32 %v7056_v13, %v7056_v13  ;;  %vm8044_vm1 = vmmov %vm7986_vm0 }
 0x5a3   :  { %3873 = vadd.xlane.f32.xlu0 %v3872_v12  ;;  %v3357_v28 = vsel %vm2297_vm15, %v7050_v10, 0.0  ;;  %vm8046_vm12 = vmmov %vm7986_vm0 }
 0x5a4   :  { %v2795_v6 = vpop.xlane.xlu1 %2794  ;;  %v3875_v34 = vsel %vm8028_vm13, %v7046_v29, 0.0  ;;  %vm8045_vm13 = vmmov %vm7986_vm0 }
 0x5a5   :  { %v3727_v61 = vpop.f32.mrb[68].mxu0  ;;  %3876 = vadd.xlane.f32.xlu1 %v3875_v34  ;;  %v2832_v38 = vmul.f32 0.125, %v2795_v6  ;;  %v2341_v6 = vsel %vm8030_vm3, %v2328_v54, 0.0  ;;  %vm8048_vm3 = vmmov %vm7986_vm0 }
 0x5a6   :  { %v3745_v55 = vmax.f32 %v3727_v61, 0.0  ;;  %v4804_v58 = vpop.f32.mrb[69].mxu0  ;;  %v2798_v44 = vpop.xlane.xlu0 %2797 }
 0x5a7   :  { %v2833_v16 = vmul.f32 0.125, %v2798_v44  ;;  %v3730_v22 = vpop.f32.mrb[70].mxu0  ;;  %3355 = vadd.xlane.f32.xlu0 %v3354_v63  ;;  %v7065_v15 = vsub.f32 %v6715_v19, %v2832_v38 }
 0x5a8   :  { %v7060_v11 = vadd.f32 %v3815_v45, %v3745_v55  ;;  %v2266_v52 = vpop.xlane.xlu1 %2265  ;;  %v4805_v21 = vpop.f32.mrb[71].mxu0 }
 0x5a9   :  { %v2303_v0 = vmul.f32 0.125, %v2266_v52  ;;  %3358 = vadd.xlane.f32.xlu1 %v3357_v28  ;;  %v7072_v33 = vsub.f32 %v6719_v14, %v2833_v16  ;;  %v2858_v19 = vmul.f32 %v7065_v15, %v7065_v15 }
 0x5aa   :  { %v3878_v2 = vsel %vm2297_vm15, %v7060_v11, 0.0 }
 0x5ab   :  { %v7075_v17 = vsub.f32 %v6717_v20, %v2303_v0  ;;  %3879 = vadd.xlane.f32.xlu0 %v3878_v2  ;;  %v2859_v61 = vmul.f32 %v7072_v33, %v7072_v33  ;;  %v2871_v14 = vsel %vm8032_vm14, %v2858_v19, 0.0  ;;  %vm8051_vm14 = vmmov %vm7986_vm0 }
 0x5ad   :  { %v2329_v12 = vmul.f32 %v7075_v17, %v7075_v17  ;;  %v2874_v20 = vsel %vm8033_vm5, %v2859_v61, 0.0  ;;  %vm8053_vm5 = vmmov %vm7986_vm0 }
 0x5af   :  { %2342 = vadd.xlane.f32.xlu0 %v2341_v6  ;;  %v2344_v34 = vsel %vm8031_vm4, %v2329_v12, 0.0  ;;  %vm8050_vm4 = vmmov %vm7986_vm0 }
 0x5b0   :  { %2345 = vadd.xlane.f32.xlu1 %v2344_v34 }
 0x5b3   :  { %2872 = vadd.xlane.f32.xlu0 %v2871_v14 }
 0x5b4   :  { %2875 = vadd.xlane.f32.xlu1 %v2874_v20 }
 0x5b5   :  { %v2269_v45 = vpop.xlane.xlu0 %2268 }
 0x5b6   :  { %v2304_v38 = vmul.f32 0.125, %v2269_v45 }
 0x5b8   :  { %v7088_v55 = vsub.f32 %v6735_v8, %v2304_v38 }
 0x5b9   :  { %v2272_v58 = vpop.xlane.xlu0 %2271 }
 0x5ba   :  { %v2305_v44 = vmul.f32 0.125, %v2272_v58  ;;  %v2330_v63 = vmul.f32 %v7088_v55, %v7088_v55 }
 0x5bc   :  { %v7093_v16 = vsub.f32 %v6737_v7, %v2305_v44  ;;  %v2347_v22 = vsel %vm7986_vm0, %v2330_v63, 0.0 }
 0x5bd   :  { %2348 = vadd.xlane.f32.xlu0 %v2347_v22 }
 0x5be   :  { %v2331_v52 = vmul.f32 %v7093_v16, %v7093_v16 }
 0x5c0   :  { %v2801_v21 = vpop.xlane.xlu1 %2800  ;;  %v2350_v28 = vsel %vm8034_vm10, %v2331_v52, 0.0  ;;  %vm8055_vm10 = vmmov %vm7986_vm0 }
 0x5c1   :  { %v2834_v0 = vmul.f32 0.125, %v2801_v21  ;;  %2351 = vadd.xlane.f32.xlu1 %v2350_v28 }
 0x5c2   :  { %v2804_v8 = vpop.xlane.xlu0 %2803 }
 0x5c3   :  { %v7100_v2 = vsub.f32 %v6751_v39, %v2834_v0  ;;  %v2835_v54 = vmul.f32 0.125, %v2804_v8 }
 0x5c5   :  { %v7103_v12 = vsub.f32 %v6753_v26, %v2835_v54  ;;  %v2275_v7 = vpop.xlane.xlu1 %2274  ;;  %v2860_v6 = vmul.f32 %v7100_v2, %v7100_v2 }
 0x5c6   :  { %v2306_v19 = vmul.f32 0.125, %v2275_v7 }
 0x5c7   :  { %v2278_v34 = vpop.xlane.xlu0 %2277  ;;  %v2877_v61 = vsel %vm8035_vm7, %v2860_v6, 0.0  ;;  %v2861_v14 = vmul.f32 %v7103_v12, %v7103_v12  ;;  %vm8056_vm7 = vmmov %vm7986_vm0 }
 0x5c8   :  { %v7111_v20 = vsub.f32 %v6761_v9, %v2306_v19  ;;  %v2307_v39 = vmul.f32 0.125, %v2278_v34  ;;  %2878 = vadd.xlane.f32.xlu0 %v2877_v61 }
 0x5c9   :  { %v2880_v45 = vsel %vm8036_vm9, %v2861_v14, 0.0  ;;  %vm8058_vm9 = vmmov %vm7986_vm0 }
 0x5ca   :  { %v7115_v26 = vsub.f32 %v6763_v48, %v2307_v39  ;;  %2881 = vadd.xlane.f32.xlu1 %v2880_v45  ;;  %v2332_v38 = vmul.f32 %v7111_v20, %v7111_v20 }
 0x5cc   :  { %8037 = vst [vmem:[#allocation12_spill] sm:$0xff] %v7115_v26  ;;  %v2807_v58 = vpop.xlane.xlu1 %2806  ;;  %v2353_v44 = vsel %vm8038_vm6, %v2332_v38, 0.0  ;;  %v2333_v63 = vmul.f32 %v7115_v26, %v7115_v26  ;;  %vm8059_vm6 = vmmov %vm7986_vm0 }
 0x5cd   :  { %v2836_v22 = vmul.f32 0.125, %v2807_v58  ;;  %2354 = vadd.xlane.f32.xlu0 %v2353_v44 }
 0x5ce   :  { %v2810_v9 = vpop.xlane.xlu0 %2809  ;;  %v2356_v52 = vsel %vm8039_vm8, %v2333_v63, 0.0  ;;  %vm8060_vm8 = vmmov %vm7986_vm0 }
 0x5cf   :  { %v7124_v21 = vsub.f32 %v6774_v51, %v2836_v22  ;;  %v2837_v48 = vmul.f32 0.125, %v2810_v9  ;;  %2357 = vadd.xlane.f32.xlu1 %v2356_v52 }
 0x5d1   :  { %v7127_v28 = vsub.f32 %v6776_v53, %v2837_v48  ;;  %v2862_v0 = vmul.f32 %v7124_v21, %v7124_v21 }
 0x5d3   :  { %v2883_v8 = vsel %vm8040_vm11, %v2862_v0, 0.0  ;;  %v2863_v54 = vmul.f32 %v7127_v28, %v7127_v28  ;;  %vm8061_vm11 = vmmov %vm7986_vm0 }
 0x5d4   :  { %2884 = vadd.xlane.f32.xlu0 %v2883_v8 }
 0x5d5   :  { %v2281_v7 = vpop.xlane.xlu1 %2280  ;;  %v2886_v6 = vsel %vm8041_vm2, %v2863_v54, 0.0  ;;  %vm8062_vm2 = vmmov %vm7986_vm0 }
 0x5d6   :  { %v2308_v19 = vmul.f32 0.125, %v2281_v7  ;;  %2887 = vadd.xlane.f32.xlu1 %v2886_v6 }
 0x5d7   :  { %v2284_v51 = vpop.xlane.xlu0 %2283 }
 0x5d8   :  { %v7136_v34 = vsub.f32 %v6784_v30, %v2308_v19  ;;  %v2309_v53 = vmul.f32 0.125, %v2284_v51 }
 0x5da   :  { %8042 = vst [vmem:[#allocation13_spill] sm:$0xff] %v7136_v34  ;;  %v7139_v61 = vsub.f32 %v6789_v47, %v2309_v53  ;;  %v2334_v14 = vmul.f32 %v7136_v34, %v7136_v34 }
 0x5dc   :  { %8043 = vst [vmem:[#allocation14_spill] sm:$0xff] %v7139_v61  ;;  %v2359_v39 = vsel %vm8044_vm1, %v2334_v14, 0.0  ;;  %v2335_v45 = vmul.f32 %v7139_v61, %v7139_v61  ;;  %vm8063_vm1 = vmmov %vm7986_vm0 }
 0x5dd   :  { %2360 = vadd.xlane.f32.xlu0 %v2359_v39 }
 0x5de   :  { %v2362_v38 = vsel %vm8045_vm13, %v2335_v45, 0.0  ;;  %vm8064_vm13 = vmmov %vm7986_vm0 }
 0x5df   :  { %2363 = vadd.xlane.f32.xlu1 %v2362_v38 }
 0x5e4   :  { %v2813_v58 = vpop.xlane.xlu1 %2812 }
 0x5e5   :  { %v2838_v44 = vmul.f32 0.125, %v2813_v58 }
 0x5e6   :  { %v2816_v30 = vpop.xlane.xlu0 %2815 }
 0x5e7   :  { %v7148_v63 = vsub.f32 %v6803_v41, %v2838_v44  ;;  %v2839_v47 = vmul.f32 0.125, %v2816_v30 }
 0x5e9   :  { %v7151_v22 = vsub.f32 %v6808_v49, %v2839_v47  ;;  %v2287_v9 = vpop.xlane.xlu1 %2286  ;;  %v2864_v52 = vmul.f32 %v7148_v63, %v7148_v63 }
 0x5ea   :  { %v2310_v48 = vmul.f32 0.125, %v2287_v9 }
 0x5eb   :  { %v2290_v0 = vpop.xlane.xlu0 %2289  ;;  %v2889_v8 = vsel %vm8046_vm12, %v2864_v52, 0.0  ;;  %v2865_v54 = vmul.f32 %v7151_v22, %v7151_v22  ;;  %vm8067_vm12 = vmmov %vm7986_vm0 }
 0x5ec   :  { %v7159_v7 = vsub.f32 %v6816_v3, %v2310_v48  ;;  %v2311_v41 = vmul.f32 0.125, %v2290_v0  ;;  %2890 = vadd.xlane.f32.xlu0 %v2889_v8 }
 0x5ed   :  { %v2892_v6 = vsel %vm8048_vm3, %v2865_v54, 0.0  ;;  %vm8068_vm3 = vmmov %vm7986_vm0 }
 0x5ee   :  { %8047 = vst [vmem:[#allocation15_spill] sm:$0xff] %v7159_v7  ;;  %v7163_v49 = vsub.f32 %v6821_v32, %v2311_v41  ;;  %2893 = vadd.xlane.f32.xlu1 %v2892_v6  ;;  %v2336_v19 = vmul.f32 %v7159_v7, %v7159_v7 }
 0x5f0   :  { %8049 = vst [vmem:[#allocation16_spill] sm:$0xff] %v7163_v49  ;;  %v2819_v51 = vpop.xlane.xlu1 %2818  ;;  %v2365_v53 = vsel %vm8050_vm4, %v2336_v19, 0.0  ;;  %v2337_v14 = vmul.f32 %v7163_v49, %v7163_v49  ;;  %vm8069_vm4 = vmmov %vm7986_vm0 }
 0x5f1   :  { %v2840_v39 = vmul.f32 0.125, %v2819_v51  ;;  %2366 = vadd.xlane.f32.xlu0 %v2365_v53 }
 0x5f2   :  { %v2822_v3 = vpop.xlane.xlu0 %2821  ;;  %v2368_v45 = vsel %vm8051_vm14, %v2337_v14, 0.0  ;;  %vm8072_vm14 = vmmov %vm7986_vm0 }
 0x5f3   :  { %v7172_v38 = vsub.f32 %v6830_v62, %v2840_v39  ;;  %v2841_v32 = vmul.f32 0.125, %v2822_v3  ;;  %2369 = vadd.xlane.f32.xlu1 %v2368_v45 }
 0x5f4   :  { %v2293_v58 = vpop.xlane.xlu1 %2292 }
 0x5f5   :  { %v7175_v44 = vsub.f32 %v6835_v57, %v2841_v32  ;;  %v2312_v30 = vmul.f32 0.125, %v2293_v58  ;;  %v2866_v47 = vmul.f32 %v7172_v38, %v7172_v38 }
 0x5f6   :  { %v2296_v9 = vpop.xlane.xlu0 %2295 }
 0x5f7   :  { %v7180_v52 = vsub.f32 %v6833_v23, %v2312_v30  ;;  %v2313_v48 = vmul.f32 0.125, %v2296_v9  ;;  %v2895_v0 = vsel %vm8053_vm5, %v2866_v47, 0.0  ;;  %v2867_v62 = vmul.f32 %v7175_v44, %v7175_v44  ;;  %vm8073_vm5 = vmmov %vm7986_vm0 }
 0x5f8   :  { %v2825_v8 = vpop.xlane.xlu1 %2824  ;;  %2896 = vadd.xlane.f32.xlu0 %v2895_v0 }
 0x5f9   :  { %8052 = vst [vmem:[#allocation17_spill] sm:$0xff] %v7180_v52  ;;  %v7186_v54 = vsub.f32 %v6839_v24, %v2313_v48  ;;  %v2842_v57 = vmul.f32 0.125, %v2825_v8  ;;  %v2898_v41 = vsel %vm7986_vm0, %v2867_v62, 0.0  ;;  %v2338_v6 = vmul.f32 %v7180_v52, %v7180_v52 }
 0x5fa   :  { %v2828_v19 = vpop.xlane.xlu0 %2827  ;;  %2899 = vadd.xlane.f32.xlu1 %v2898_v41 }
 0x5fb   :  { %8054 = vst [vmem:[#allocation18_spill] sm:$0xff] %v7186_v54  ;;  %v7192_v23 = vsub.f32 %v6856_v36, %v2842_v57  ;;  %v2843_v51 = vmul.f32 0.125, %v2828_v19  ;;  %v2371_v53 = vsel %vm8055_vm10, %v2338_v6, 0.0  ;;  %v2339_v14 = vmul.f32 %v7186_v54, %v7186_v54  ;;  %vm8076_vm10 = vmmov %vm7986_vm0 }
 0x5fc   :  { %v2300_v39 = vpop.xlane.xlu1 %2299  ;;  %2372 = vadd.xlane.f32.xlu0 %v2371_v53 }
 0x5fd   :  { %v7198_v24 = vsub.f32 %v6862_v56, %v2843_v51  ;;  %v2314_v3 = vmul.f32 0.125, %v2300_v39  ;;  %v2374_v45 = vsel %vm8056_vm7, %v2339_v14, 0.0  ;;  %v2868_v32 = vmul.f32 %v7192_v23, %v7192_v23  ;;  %vm8077_vm7 = vmmov %vm7986_vm0 }
 0x5fe   :  { %2375 = vadd.xlane.f32.xlu1 %v2374_v45 }
 0x5ff   :  { %v7204_v36 = vsub.f32 %v6860_v1, %v2314_v3  ;;  %v2901_v58 = vsel %vm8058_vm9, %v2868_v32, 0.0  ;;  %v2869_v30 = vmul.f32 %v7198_v24, %v7198_v24  ;;  %vm8078_vm9 = vmmov %vm7986_vm0 }
 0x600   :  { %v2831_v47 = vpop.xlane.xlu1 %2830  ;;  %2902 = vadd.xlane.f32.xlu0 %v2901_v58 }
 0x601   :  { %8057 = vst [vmem:[#allocation19_spill] sm:$0xff] %v7204_v36  ;;  %v2844_v9 = vmul.f32 0.125, %v2831_v47  ;;  %v2904_v56 = vsel %vm8059_vm6, %v2869_v30, 0.0  ;;  %v2340_v48 = vmul.f32 %v7204_v36, %v7204_v36  ;;  %vm8080_vm6 = vmmov %vm7986_vm0 }
 0x602   :  { %2905 = vadd.xlane.f32.xlu1 %v2904_v56 }
 0x603   :  { %v7213_v0 = vsub.f32 %v6886_v46, %v2844_v9  ;;  %v2377_v1 = vsel %vm2297_vm15, %v2340_v48, 0.0 }
 0x604   :  { %v3323_v62 = vpop.xlane.xlu1 %3322  ;;  %2378 = vadd.xlane.f32.xlu0 %v2377_v1 }
 0x605   :  { %v3360_v8 = vmul.f32 0.125, %v3323_v62  ;;  %v2870_v57 = vmul.f32 %v7213_v0, %v7213_v0 }
 0x607   :  { %v7219_v41 = vsub.f32 %v6888_v18, %v3360_v8  ;;  %v2907_v6 = vsel %vm2297_vm15, %v2870_v57, 0.0 }
 0x608   :  { %v3844_v19 = vpop.xlane.xlu0 %3843  ;;  %2908 = vadd.xlane.f32.xlu0 %v2907_v6 }
 0x609   :  { %v3881_v51 = vmul.f32 0.125, %v3844_v19  ;;  %v3386_v46 = vmul.f32 %v7219_v41, %v7219_v41 }
 0x60a   :  { %v3847_v53 = vpop.xlane.xlu1 %3846 }
 0x60b   :  { %v7225_v14 = vsub.f32 %v6903_v60, %v3881_v51  ;;  %v3882_v39 = vmul.f32 0.125, %v3847_v53  ;;  %v3399_v3 = vsel %vm8060_vm8, %v3386_v46, 0.0  ;;  %vm8082_vm8 = vmmov %vm7986_vm0 }
 0x60c   :  { %v3326_v45 = vpop.xlane.xlu0 %3325  ;;  %3400 = vadd.xlane.f32.xlu0 %v3399_v3 }
 0x60d   :  { %v3361_v32 = vmul.f32 0.125, %v3326_v45  ;;  %v3907_v18 = vmul.f32 %v7225_v14, %v7225_v14  ;;  %v7231_v58 = vsub.f32 %v6908_v42, %v3882_v39 }
 0x60e   :  { %v3329_v30 = vpop.xlane.xlu1 %3328 }
 0x60f   :  { %v7234_v47 = vsub.f32 %v6906_v37, %v3361_v32  ;;  %v3362_v9 = vmul.f32 0.125, %v3329_v30  ;;  %v3920_v60 = vsel %vm8061_vm11, %v3907_v18, 0.0  ;;  %v3908_v8 = vmul.f32 %v7231_v58, %v7231_v58  ;;  %vm8084_vm11 = vmmov %vm7986_vm0 }
 0x610   :  { %v3850_v56 = vpop.xlane.xlu0 %3849  ;;  %3921 = vadd.xlane.f32.xlu0 %v3920_v60 }
 0x611   :  { %v3883_v48 = vmul.f32 0.125, %v3850_v56  ;;  %v3387_v1 = vmul.f32 %v7234_v47, %v7234_v47  ;;  %v7242_v42 = vsub.f32 %v6912_v43, %v3362_v9  ;;  %v3923_v3 = vsel %vm8063_vm1, %v3908_v8, 0.0  ;;  %v8065_v9 = vld [vmem:[#allocation3_spill] sm:$0xff]  ;;  %vm8086_vm1 = vmmov %vm7986_vm0 }
 0x612   :  { %v3853_v62 = vpop.xlane.xlu1 %3852 }
 0x613   :  { %v7245_v57 = vsub.f32 %v6930_v35, %v3883_v48  ;;  %v3884_v37 = vmul.f32 0.125, %v3853_v62  ;;  %v3402_v6 = vsel %vm8062_vm2, %v3387_v1, 0.0  ;;  %v3388_v32 = vmul.f32 %v7242_v42, %v7242_v42  ;;  %v8066_v48 = vld [vmem:[#allocation4_spill] sm:$0xff]  ;;  %vm8085_vm2 = vmmov %vm7986_vm0 }
 0x614   :  { %v3332_v19 = vpop.xlane.xlu0 %3331  ;;  %3403 = vadd.xlane.f32.xlu1 %v3402_v6 }
 0x615   :  { %v3363_v51 = vmul.f32 0.125, %v3332_v19  ;;  %v3909_v46 = vmul.f32 %v7245_v57, %v7245_v57  ;;  %v7251_v53 = vsub.f32 %v6937_v31, %v3884_v37  ;;  %v3405_v37 = vsel %vm8068_vm3, %v3388_v32, 0.0  ;;  %vm8089_vm3 = vmmov %vm7986_vm0 }
 0x616   :  { %v3335_v39 = vpop.xlane.xlu1 %3334 }
 0x617   :  { %v7255_v43 = vsub.f32 %v6935_v40, %v3363_v51  ;;  %v3364_v35 = vmul.f32 0.125, %v3335_v39  ;;  %v3926_v45 = vsel %vm8064_vm13, %v3909_v46, 0.0  ;;  %v3910_v40 = vmul.f32 %v7251_v53, %v7251_v53  ;;  %vm8087_vm13 = vmmov %vm7986_vm0 }
 0x618   :  { %v3856_v18 = vpop.xlane.xlu0 %3855  ;;  %3927 = vadd.xlane.f32.xlu0 %v3926_v45  ;;  %3924 = vadd.xlane.f32.xlu1 %v3923_v3 }
 0x619   :  { %v3885_v30 = vmul.f32 0.125, %v3856_v18  ;;  %v3389_v31 = vmul.f32 %v7255_v43, %v7255_v43  ;;  %v7263_v60 = vsub.f32 %v8065_v9, %v3364_v35  ;;  %v3929_v39 = vsel %vm8069_vm4, %v3910_v40, 0.0  ;;  %v8070_v35 = vld [vmem:[#allocation6_spill] sm:$0xff]  ;;  %v8071_v18 = vld [vmem:[#allocation5_spill] sm:$0xff]  ;;  %vm8090_vm4 = vmmov %vm7986_vm0 }
 0x61a   :  { %v3859_v56 = vpop.xlane.xlu1 %3858 }
 0x61b   :  { %v7268_v1 = vsub.f32 %v8066_v48, %v3885_v30  ;;  %v3886_v62 = vmul.f32 0.125, %v3859_v56  ;;  %v3408_v8 = vsel %vm8067_vm12, %v3389_v31, 0.0  ;;  %v3390_v3 = vmul.f32 %v7263_v60, %v7263_v60  ;;  %vm8088_vm12 = vmmov %vm7986_vm0 }
 0x61c   :  { %v3338_v6 = vpop.xlane.xlu0 %3337  ;;  %3409 = vadd.xlane.f32.xlu0 %v3408_v8  ;;  %3406 = vadd.xlane.f32.xlu1 %v3405_v37 }
 0x61d   :  { %v3365_v19 = vmul.f32 0.125, %v3338_v6  ;;  %v3911_v51 = vmul.f32 %v7268_v1, %v7268_v1  ;;  %v7278_v45 = vsub.f32 %v8070_v35, %v3886_v62  ;;  %v3411_v62 = vsel %vm8073_vm5, %v3390_v3, 0.0  ;;  %v8074_v35 = vld [vmem:[#allocation8_spill] sm:$0xff] }
 0x61e   :  { %v3341_v46 = vpop.xlane.xlu1 %3340  ;;  %vm8095_vm5 = vcmask 130048  }
 0x61f   :  { %v7281_v30 = vsub.f32 %v8071_v18, %v3365_v19  ;;  %v3366_v32 = vmul.f32 0.125, %v3341_v46  ;;  %v3932_v31 = vsel %vm8072_vm14, %v3911_v51, 0.0  ;;  %v3912_v51 = vmul.f32 %v7278_v45, %v7278_v45  ;;  %vm8091_vm14 = vmmov %vm7986_vm0 }
 0x620   :  { %v3862_v9 = vpop.xlane.xlu0 %3861  ;;  %3933 = vadd.xlane.f32.xlu0 %v3932_v31  ;;  %3930 = vadd.xlane.f32.xlu1 %v3929_v39 }
 0x621   :  { %v3887_v56 = vmul.f32 0.125, %v3862_v9  ;;  %v3391_v48 = vmul.f32 %v7281_v30, %v7281_v30  ;;  %v7287_v40 = vsub.f32 %v6971_v59, %v3366_v32  ;;  %v8075_v32 = vld [vmem:[#allocation7_spill] sm:$0xff] }
 0x622   :  { %v3865_v8 = vpop.xlane.xlu1 %3864 }
 0x623   :  { %v7291_v37 = vsub.f32 %v6990_v27, %v3887_v56  ;;  %v3888_v6 = vmul.f32 0.125, %v3865_v8  ;;  %v3414_v19 = vsel %vm7986_vm0, %v3391_v48, 0.0  ;;  %v3392_v27 = vmul.f32 %v7287_v40, %v7287_v40 }
 0x624   :  { %v3344_v46 = vpop.xlane.xlu0 %3343  ;;  %3415 = vadd.xlane.f32.xlu0 %v3414_v19  ;;  %3412 = vadd.xlane.f32.xlu1 %v3411_v62  ;;  %v3935_v48 = vsel %vm8077_vm7, %v3912_v51, 0.0  ;;  %vm8098_vm7 = vmmov %vm8086_vm1 }
 0x625   :  { %v3367_v39 = vmul.f32 0.125, %v3344_v46  ;;  %v3913_v59 = vmul.f32 %v7291_v37, %v7291_v37  ;;  %v7299_v18 = vsub.f32 %v8074_v35, %v3888_v6  ;;  %v3417_v46 = vsel %vm8078_vm9, %v3392_v27, 0.0  ;;  %v8081_v27 = vld [vmem:[#allocation11_spill] sm:$0xff]  ;;  %vm8099_vm9 = vmmov %vm8095_vm5 }
 0x626   :  { %v3347_v3 = vpop.xlane.xlu1 %3346 }
 0x627   :  { %v7304_v31 = vsub.f32 %v8075_v32, %v3367_v39  ;;  %v3368_v9 = vmul.f32 0.125, %v3347_v3  ;;  %v3938_v56 = vsel %vm8076_vm10, %v3913_v59, 0.0  ;;  %v3914_v35 = vmul.f32 %v7299_v18, %v7299_v18  ;;  %v8079_v3 = vld [vmem:[#allocation9_spill] sm:$0xff] }
 0x628   :  { %v3868_v8 = vpop.xlane.xlu0 %3867  ;;  %3939 = vadd.xlane.f32.xlu0 %v3938_v56  ;;  %3936 = vadd.xlane.f32.xlu1 %v3935_v48  ;;  %vm8097_vm10 = vcmask 261120  }
 0x629   :  { %v3889_v62 = vmul.f32 0.125, %v3868_v8  ;;  %v3393_v6 = vmul.f32 %v7304_v31, %v7304_v31  ;;  %v7314_v39 = vsub.f32 %v7001_v5, %v3368_v9  ;;  %v3941_v5 = vsel %vm8082_vm8, %v3914_v35, 0.0  ;;  %v8083_v9 = vld [vmem:[#allocation10_spill] sm:$0xff]  ;;  %vm8101_vm8 = vmmov %vm8097_vm10 }
 0x62a   :  { %v3871_v19 = vpop.xlane.xlu1 %3870 }
 0x62b   :  { %v7317_v59 = vsub.f32 %v8079_v3, %v3889_v62  ;;  %v3890_v51 = vmul.f32 0.125, %v3871_v19  ;;  %v3420_v32 = vsel %vm8080_vm6, %v3393_v6, 0.0  ;;  %v3394_v6 = vmul.f32 %v7314_v39, %v7314_v39 }
 0x62c   :  { %v3350_v56 = vpop.xlane.xlu0 %3349  ;;  %3421 = vadd.xlane.f32.xlu0 %v3420_v32  ;;  %3418 = vadd.xlane.f32.xlu1 %v3417_v46 }
 0x62d   :  { %v3369_v48 = vmul.f32 0.125, %v3350_v56  ;;  %v3915_v8 = vmul.f32 %v7317_v59, %v7317_v59  ;;  %v7323_v54 = vsub.f32 %v8081_v27, %v3890_v51  ;;  %v3423_v27 = vsel %vm8086_vm1, %v3394_v6, 0.0 }
 0x62e   :  { %v3353_v36 = vpop.xlane.xlu1 %3352 }
 0x62f   :  { %v7327_v52 = vsub.f32 %v8083_v9, %v3369_v48  ;;  %v3370_v62 = vmul.f32 0.125, %v3353_v36  ;;  %v3944_v19 = vsel %vm8084_vm11, %v3915_v8, 0.0  ;;  %v3916_v56 = vmul.f32 %v7323_v54, %v7323_v54  ;;  %vm8102_vm11 = vmmov %vm8086_vm1 }
 0x630   :  { %v3874_v46 = vpop.xlane.xlu0 %3873  ;;  %3945 = vadd.xlane.f32.xlu0 %v3944_v19  ;;  %3942 = vadd.xlane.f32.xlu1 %v3941_v5 }
 0x631   :  { %v3891_v3 = vmul.f32 0.125, %v3874_v46  ;;  %v3395_v51 = vmul.f32 %v7327_v52, %v7327_v52  ;;  %v7335_v32 = vsub.f32 %v7030_v25, %v3370_v62  ;;  %v3947_v19 = vsel %vm8087_vm13, %v3916_v56, 0.0  ;;  %vm8107_vm13 = vmmov %vm8089_vm3 }
 0x632   :  { %v3877_v35 = vpop.xlane.xlu1 %3876 }
 0x633   :  { %v7340_v36 = vsub.f32 %v7039_v4, %v3891_v3  ;;  %v3892_v48 = vmul.f32 0.125, %v3877_v35  ;;  %v3426_v8 = vsel %vm8085_vm2, %v3395_v51, 0.0  ;;  %v3396_v46 = vmul.f32 %v7335_v32, %v7335_v32  ;;  %vm8105_vm2 = vmmov %vm8095_vm5 }
 0x634   :  { %3427 = vadd.xlane.f32.xlu0 %v3426_v8  ;;  %v3356_v5 = vpop.xlane.xlu0 %3355  ;;  %3424 = vadd.xlane.f32.xlu1 %v3423_v27 }
 0x635   :  { %v3371_v9 = vmul.f32 0.125, %v3356_v5  ;;  %v3917_v25 = vmul.f32 %v7340_v36, %v7340_v36  ;;  %v7350_v4 = vsub.f32 %v7046_v29, %v3892_v48  ;;  %v3429_v56 = vsel %vm8089_vm3, %v3396_v46, 0.0  ;;  %vm8109_vm3 = vmmov %vm8105_vm2 }
 0x636   :  { %v3359_v62 = vpop.xlane.xlu1 %3358 }
 0x637   :  { %v7353_v3 = vsub.f32 %v7044_v50, %v3371_v9  ;;  %v3372_v6 = vmul.f32 0.125, %v3359_v62  ;;  %v3950_v51 = vsel %vm8088_vm12, %v3917_v25, 0.0  ;;  %v3918_v48 = vmul.f32 %v7350_v4, %v7350_v4  ;;  %vm8108_vm12 = vmmov %vm8101_vm8 }
 0x638   :  { %3951 = vadd.xlane.f32.xlu0 %v3950_v51  ;;  %v3880_v35 = vpop.xlane.xlu0 %3879  ;;  %3948 = vadd.xlane.f32.xlu1 %v3947_v19 }
 0x639   :  { %v3893_v8 = vmul.f32 0.125, %v3880_v35  ;;  %v3397_v27 = vmul.f32 %v7353_v3, %v7353_v3  ;;  %v7360_v5 = vsub.f32 %v7050_v10, %v3372_v6  ;;  %v3953_v19 = vsel %vm8091_vm14, %v3918_v48, 0.0  ;;  %vm8112_vm14 = vmmov %vm8101_vm8 }
 0x63b   :  { %v7363_v29 = vsub.f32 %v7060_v11, %v3893_v8  ;;  %v3432_v50 = vsel %vm8090_vm4, %v3397_v27, 0.0  ;;  %v3398_v11 = vmul.f32 %v7360_v5, %v7360_v5 }
 0x63c   :  { %3433 = vadd.xlane.f32.xlu0 %v3432_v50  ;;  %v7368_v9 = vpop.xlane.xlu0 %2342  ;;  %3430 = vadd.xlane.f32.xlu1 %v3429_v56 }
 0x63d   :  { %v7370_v25 = vpop.xlane.xlu1 %2345  ;;  %v3919_v62 = vmul.f32 %v7363_v29, %v7363_v29  ;;  %v3435_v27 = vsel %vm2297_vm15, %v3398_v11, 0.0 }
 0x63f   :  { %v3956_v10 = vsel %vm2297_vm15, %v3919_v62, 0.0  ;;  %vm8094_vm15 = vmmov %vm7986_vm0  ;;  %vm8096_vm0 = vcmask 195584  }
 0x640   :  { %3957 = vadd.xlane.f32.xlu0 %v3956_v10  ;;  %v2873_v46 = vpop.xlane.xlu0 %2872  ;;  %3954 = vadd.xlane.f32.xlu1 %v3953_v19  ;;  %v7385_v10 = vld [vmem:[%s7752_s8] ss:$0 sm:$0xff]  ;;  %vm8100_vm6 = vmmov %vm8096_vm0 }
 0x641   :  { %v2910_v6 = vmul.f32 0.125, %v2873_v46  ;;  %v2876_v51 = vpop.xlane.xlu1 %2875  ;;  %vm8106_vm1 = vmmov %vm8096_vm0 }
 0x642   :  { %v2911_v35 = vmul.f32 0.125, %v2876_v51  ;;  %vm8110_vm4 = vmmov %vm8096_vm0 }
 0x643   :  { %v2923_v8 = vadd.f32 1e-05, %v2910_v6  ;;  %v7394_v6 = vld [vmem:[%s7752_s8 + $0x1] ss:$0 sm:$0xff] }
 0x644   :  { %v2924_v56 = vadd.f32 1e-05, %v2911_v35  ;;  %3436 = vadd.xlane.f32.xlu1 %v3435_v27 }
 0x645   :  { %4903 = vrsqrt.f32 %v2923_v8 }
 0x646   :  { %4905 = vrsqrt.f32 %v2924_v56 }
 0x64a   :  { %v7380_v49 = vpop.xlane.xlu0 %2348 }
 0x64e   :  { %v7389_v11 = vpop.xlane.xlu1 %2351 }
 0x64f   :  { %v4904_v50 = vpop.eup %4903 }
 0x650   :  { %v4906_v62 = vpop.eup %4905  ;;  %v2949_v48 = vmul.f32 %v4904_v50, %v7065_v15 }
 0x651   :  { %v2950_v19 = vmul.f32 %v4906_v62, %v7072_v33 }
 0x652   :  { %v2962_v46 = vmul.f32 %v7385_v10, %v2949_v48 }
 0x653   :  { %v2963_v15 = vmul.f32 %v7385_v10, %v2950_v19 }
 0x654   :  { %v2975_v51 = vadd.f32 %v7394_v6, %v2962_v46 }
 0x655   :  { %v2879_v35 = vpop.xlane.xlu0 %2878  ;;  %v2976_v8 = vadd.f32 %v7394_v6, %v2963_v15 }
 0x656   :  { %v2912_v27 = vmul.f32 0.125, %v2879_v35  ;;  %4050 = vrot.lane.b32.xlu1 %v2975_v51, %s5017_s17 }
 0x657   :  { %4052 = vrot.lane.b32.xlu0 %v2976_v8, %s5017_s17  ;;  %v2882_v33 = vpop.xlane.xlu1 %2881 }
 0x658   :  { %v2925_v56 = vadd.f32 1e-05, %v2912_v27  ;;  %v2913_v50 = vmul.f32 0.125, %v2882_v33 }
 0x65a   :  { %4907 = vrsqrt.f32 %v2925_v56  ;;  %v2926_v62 = vadd.f32 1e-05, %v2913_v50  ;;  %v7401_v48 = vpop.xlane.xlu0 %2354 }
 0x65c   :  { %4909 = vrsqrt.f32 %v2926_v62  ;;  %v7403_v7 = vpop.xlane.xlu1 %2357 }
 0x661   :  { %v2885_v19 = vpop.xlane.xlu0 %2884 }
 0x662   :  { %v2914_v46 = vmul.f32 0.125, %v2885_v19 }
 0x663   :  { %v2888_v61 = vpop.xlane.xlu1 %2887 }
 0x664   :  { %v4908_v34 = vpop.eup %4907  ;;  %v2927_v15 = vadd.f32 1e-05, %v2914_v46  ;;  %v2915_v35 = vmul.f32 0.125, %v2888_v61 }
 0x665   :  { %v2951_v51 = vmul.f32 %v4908_v34, %v7100_v2 }
 0x666   :  { %v4910_v26 = vpop.eup %4909  ;;  %4911 = vrsqrt.f32 %v2927_v15  ;;  %v2928_v8 = vadd.f32 1e-05, %v2915_v35 }
 0x667   :  { %v2964_v27 = vmul.f32 %v7385_v10, %v2951_v51  ;;  %v2952_v33 = vmul.f32 %v4910_v26, %v7103_v12 }
 0x668   :  { %4913 = vrsqrt.f32 %v2928_v8 }
 0x669   :  { %v2977_v56 = vadd.f32 %v7394_v6, %v2964_v27  ;;  %v2965_v50 = vmul.f32 %v7385_v10, %v2952_v33 }
 0x66a   :  { %v7416_v12 = vpop.xlane.xlu0 %2360 }
 0x66b   :  { %4054 = vrot.lane.b32.xlu1 %v2977_v56, %s5017_s17  ;;  %v2978_v62 = vadd.f32 %v7394_v6, %v2965_v50 }
 0x66c   :  { %v7420_v35 = vpop.xlane.xlu1 %2363 }
 0x66f   :  { %4056 = vrot.lane.b32.xlu1 %v2978_v62, %s5017_s17 }
 0x670   :  { %v4912_v61 = vpop.eup %4911 }
 0x671   :  { %v2953_v2 = vmul.f32 %v4912_v61, %v7124_v21 }
 0x672   :  { %v4914_v34 = vpop.eup %4913 }
 0x673   :  { %v2966_v19 = vmul.f32 %v7385_v10, %v2953_v2  ;;  %v2954_v46 = vmul.f32 %v4914_v34, %v7127_v28 }
 0x675   :  { %v2979_v26 = vadd.f32 %v7394_v6, %v2966_v19  ;;  %v2967_v15 = vmul.f32 %v7385_v10, %v2954_v46 }
 0x677   :  { %4058 = vrot.lane.b32.xlu0 %v2979_v26, %s5017_s17  ;;  %v2980_v51 = vadd.f32 %v7394_v6, %v2967_v15 }
 0x679   :  { %v2891_v8 = vpop.xlane.xlu0 %2890  ;;  %4060 = vrot.lane.b32.xlu1 %v2980_v51, %s5017_s17 }
 0x67a   :  { %v2916_v21 = vmul.f32 0.125, %v2891_v8 }
 0x67b   :  { %v2894_v27 = vpop.xlane.xlu1 %2893 }
 0x67c   :  { %v2929_v33 = vadd.f32 1e-05, %v2916_v21  ;;  %v2917_v56 = vmul.f32 0.125, %v2894_v27 }
 0x67e   :  { %4915 = vrsqrt.f32 %v2929_v33  ;;  %v2930_v28 = vadd.f32 1e-05, %v2917_v56  ;;  %v7425_v50 = vpop.xlane.xlu0 %2366 }
 0x680   :  { %4917 = vrsqrt.f32 %v2930_v28  ;;  %v7427_v62 = vpop.xlane.xlu1 %2369 }
 0x685   :  { %v2897_v61 = vpop.xlane.xlu0 %2896 }
 0x686   :  { %v2918_v2 = vmul.f32 0.125, %v2897_v61 }
 0x687   :  { %v2900_v34 = vpop.xlane.xlu1 %2899 }
 0x688   :  { %v4916_v19 = vpop.eup %4915  ;;  %v2931_v46 = vadd.f32 1e-05, %v2918_v2  ;;  %v2919_v26 = vmul.f32 0.125, %v2900_v34 }
 0x689   :  { %v7429_v15 = vpop.xlane.xlu0 %2372  ;;  %v2955_v51 = vmul.f32 %v4916_v19, %v7148_v63 }
 0x68a   :  { %8092 = vst [vmem:[#allocation3_spill] sm:$0xff] %v7429_v15  ;;  %v4918_v8 = vpop.eup %4917  ;;  %4919 = vrsqrt.f32 %v2931_v46  ;;  %v2932_v21 = vadd.f32 1e-05, %v2919_v26 }
 0x68b   :  { %v7432_v27 = vpop.xlane.xlu1 %2375  ;;  %v2968_v33 = vmul.f32 %v7385_v10, %v2955_v51  ;;  %v2956_v56 = vmul.f32 %v4918_v8, %v7151_v22 }
 0x68c   :  { %8093 = vst [vmem:[#allocation4_spill] sm:$0xff] %v7432_v27  ;;  %4921 = vrsqrt.f32 %v2932_v21 }
 0x68d   :  { %v2903_v28 = vpop.xlane.xlu0 %2902  ;;  %v2981_v61 = vadd.f32 %v7394_v6, %v2968_v33  ;;  %v2969_v2 = vmul.f32 %v7385_v10, %v2956_v56 }
 0x68e   :  { %v2920_v34 = vmul.f32 0.125, %v2903_v28 }
 0x68f   :  { %4062 = vrot.lane.b32.xlu0 %v2981_v61, %s5017_s17  ;;  %v2906_v15 = vpop.xlane.xlu1 %2905  ;;  %v2982_v63 = vadd.f32 %v7394_v6, %v2969_v2 }
 0x690   :  { %v2933_v19 = vadd.f32 1e-05, %v2920_v34  ;;  %v2921_v46 = vmul.f32 0.125, %v2906_v15 }
 0x691   :  { %v7440_v26 = vpop.xlane.xlu0 %2378  ;;  %4064 = vrot.lane.b32.xlu1 %v2982_v63, %s5017_s17 }
 0x692   :  { %4923 = vrsqrt.f32 %v2933_v19  ;;  %v2934_v22 = vadd.f32 1e-05, %v2921_v46 }
 0x694   :  { %v4920_v51 = vpop.eup %4919  ;;  %4925 = vrsqrt.f32 %v2934_v22 }
 0x695   :  { %v2909_v8 = vpop.xlane.xlu0 %2908  ;;  %v2957_v21 = vmul.f32 %v4920_v51, %v7172_v38 }
 0x696   :  { %v4922_v33 = vpop.eup %4921  ;;  %v2922_v56 = vmul.f32 0.125, %v2909_v8 }
 0x697   :  { %v2970_v28 = vmul.f32 %v7385_v10, %v2957_v21  ;;  %v2958_v61 = vmul.f32 %v4922_v33, %v7175_v44 }
 0x698   :  { %v2935_v2 = vadd.f32 1e-05, %v2922_v56 }
 0x699   :  { %v3401_v34 = vpop.xlane.xlu0 %3400  ;;  %v2983_v15 = vadd.f32 %v7394_v6, %v2970_v28  ;;  %v2971_v27 = vmul.f32 %v7385_v10, %v2958_v61 }
 0x69a   :  { %4927 = vrsqrt.f32 %v2935_v2  ;;  %v3438_v63 = vmul.f32 0.125, %v3401_v34 }
 0x69b   :  { %4066 = vrot.lane.b32.xlu0 %v2983_v15, %s5017_s17  ;;  %v2984_v19 = vadd.f32 %v7394_v6, %v2971_v27 }
 0x69c   :  { %v4924_v46 = vpop.eup %4923  ;;  %v3451_v38 = vadd.f32 1e-05, %v3438_v63 }
 0x69d   :  { %v3922_v22 = vpop.xlane.xlu0 %3921  ;;  %4068 = vrot.lane.b32.xlu1 %v2984_v19, %s5017_s17  ;;  %v2959_v51 = vmul.f32 %v4924_v46, %v7192_v23 }
 0x69e   :  { %v4926_v44 = vpop.eup %4925  ;;  %4929 = vrsqrt.f32 %v3451_v38  ;;  %v3959_v8 = vmul.f32 0.125, %v3922_v22 }
 0x69f   :  { %v2972_v21 = vmul.f32 %v7385_v10, %v2959_v51  ;;  %v2960_v33 = vmul.f32 %v4926_v44, %v7198_v24 }
 0x6a0   :  { %v3972_v56 = vadd.f32 1e-05, %v3959_v8 }
 0x6a1   :  { %v3404_v28 = vpop.xlane.xlu1 %3403  ;;  %v2985_v61 = vadd.f32 %v7394_v6, %v2972_v21  ;;  %v2973_v27 = vmul.f32 %v7385_v10, %v2960_v33 }
 0x6a2   :  { %4931 = vrsqrt.f32 %v3972_v56  ;;  %v3439_v2 = vmul.f32 0.125, %v3404_v28 }
 0x6a3   :  { %4070 = vrot.lane.b32.xlu0 %v2985_v61, %s5017_s17  ;;  %v2986_v34 = vadd.f32 %v7394_v6, %v2973_v27 }
 0x6a4   :  { %v4928_v23 = vpop.eup %4927  ;;  %v3452_v15 = vadd.f32 1e-05, %v3439_v2 }
 0x6a5   :  { %v3928_v63 = vpop.xlane.xlu0 %3927  ;;  %4072 = vrot.lane.b32.xlu1 %v2986_v34, %s5017_s17  ;;  %v3925_v19 = vpop.xlane.xlu1 %3924  ;;  %v2961_v24 = vmul.f32 %v4928_v23, %v7213_v0 }
 0x6a6   :  { %4933 = vrsqrt.f32 %v3452_v15  ;;  %v3961_v46 = vmul.f32 0.125, %v3928_v63  ;;  %v3960_v38 = vmul.f32 0.125, %v3925_v19 }
 0x6a7   :  { %v2974_v22 = vmul.f32 %v7385_v10, %v2961_v24 }
 0x6a8   :  { %v4930_v51 = vpop.eup %4929  ;;  %v3974_v44 = vadd.f32 1e-05, %v3961_v46  ;;  %v3973_v8 = vadd.f32 1e-05, %v3960_v38 }
 0x6a9   :  { %v3410_v21 = vpop.xlane.xlu0 %3409  ;;  %v3407_v33 = vpop.xlane.xlu1 %3406  ;;  %v2987_v56 = vadd.f32 %v7394_v6, %v2974_v22  ;;  %v3477_v28 = vmul.f32 %v4930_v51, %v7219_v41 }
 0x6aa   :  { %4935 = vrsqrt.f32 %v3974_v44  ;;  %v3441_v61 = vmul.f32 0.125, %v3410_v21  ;;  %v3440_v27 = vmul.f32 0.125, %v3407_v33 }
 0x6ab   :  { %4937 = vrsqrt.f32 %v3973_v8  ;;  %4074 = vrot.lane.b32.xlu0 %v2987_v56, %s5017_s17  ;;  %v3490_v0 = vmul.f32 %v7385_v10, %v3477_v28 }
 0x6ac   :  { %v4932_v2 = vpop.eup %4931  ;;  %v3454_v34 = vadd.f32 1e-05, %v3441_v61  ;;  %v3453_v23 = vadd.f32 1e-05, %v3440_v27 }
 0x6ad   :  { %v3934_v15 = vpop.xlane.xlu0 %3933  ;;  %v3931_v63 = vpop.xlane.xlu1 %3930  ;;  %v3503_v19 = vadd.f32 %v7394_v6, %v3490_v0  ;;  %v3998_v24 = vmul.f32 %v4932_v2, %v7225_v14 }
 0x6ae   :  { %4939 = vrsqrt.f32 %v3454_v34  ;;  %v3963_v46 = vmul.f32 0.125, %v3934_v15  ;;  %v3962_v41 = vmul.f32 0.125, %v3931_v63 }
 0x6af   :  { %4941 = vrsqrt.f32 %v3453_v23  ;;  %4102 = vrot.lane.b32.xlu1 %v3503_v19, %s5018_s22  ;;  %v4011_v38 = vmul.f32 %v7385_v10, %v3998_v24 }
 0x6b0   :  { %v4934_v22 = vpop.eup %4933  ;;  %v3976_v51 = vadd.f32 1e-05, %v3963_v46  ;;  %v3975_v44 = vadd.f32 1e-05, %v3962_v41 }
 0x6b1   :  { %v3416_v8 = vpop.xlane.xlu0 %3415  ;;  %v3413_v21 = vpop.xlane.xlu1 %3412  ;;  %v4024_v33 = vadd.f32 %v7394_v6, %v4011_v38  ;;  %v3478_v56 = vmul.f32 %v4934_v22, %v7234_v47 }
 0x6b2   :  { %4943 = vrsqrt.f32 %v3976_v51  ;;  %v3443_v28 = vmul.f32 0.125, %v3416_v8  ;;  %v3442_v14 = vmul.f32 0.125, %v3413_v21 }
 0x6b3   :  { %4945 = vrsqrt.f32 %v3975_v44  ;;  %4154 = vrot.lane.b32.xlu0 %v4024_v33, %s5019_s25  ;;  %v3491_v61 = vmul.f32 %v7385_v10, %v3478_v56 }
 0x6b4   :  { %v4936_v27 = vpop.eup %4935  ;;  %v3456_v0 = vadd.f32 1e-05, %v3443_v28  ;;  %v3455_v2 = vadd.f32 1e-05, %v3442_v14 }
 0x6b5   :  { %v4938_v34 = vpop.eup %4937  ;;  %v3940_v23 = vpop.xlane.xlu0 %3939  ;;  %v3504_v63 = vadd.f32 %v7394_v6, %v3491_v61  ;;  %v4000_v19 = vmul.f32 %v4936_v27, %v7245_v57 }
 0x6b6   :  { %v3937_v15 = vpop.xlane.xlu1 %3936  ;;  %4947 = vrsqrt.f32 %v3456_v0  ;;  %v3965_v47 = vmul.f32 0.125, %v3940_v23  ;;  %v3999_v46 = vmul.f32 %v4938_v34, %v7231_v58 }
 0x6b7   :  { %v3964_v24 = vmul.f32 0.125, %v3937_v15  ;;  %4949 = vrsqrt.f32 %v3455_v2  ;;  %4104 = vrot.lane.b32.xlu0 %v3504_v63, %s5018_s22  ;;  %v4013_v41 = vmul.f32 %v7385_v10, %v4000_v19 }
 0x6b8   :  { %v4940_v38 = vpop.eup %4939  ;;  %v3978_v22 = vadd.f32 1e-05, %v3965_v47  ;;  %v4012_v44 = vmul.f32 %v7385_v10, %v3999_v46 }
 0x6b9   :  { %v3977_v51 = vadd.f32 1e-05, %v3964_v24  ;;  %v4942_v8 = vpop.eup %4941  ;;  %v3422_v21 = vpop.xlane.xlu0 %3421  ;;  %v4026_v57 = vadd.f32 %v7394_v6, %v4013_v41  ;;  %v3480_v56 = vmul.f32 %v4940_v38, %v7255_v43 }
 0x6ba   :  { %v3419_v33 = vpop.xlane.xlu1 %3418  ;;  %4951 = vrsqrt.f32 %v3978_v22  ;;  %v3445_v28 = vmul.f32 0.125, %v3422_v21  ;;  %v4025_v14 = vadd.f32 %v7394_v6, %v4012_v44  ;;  %v3479_v27 = vmul.f32 %v4942_v8, %v7242_v42 }
 0x6bb   :  { %v3444_v58 = vmul.f32 0.125, %v3419_v33  ;;  %4953 = vrsqrt.f32 %v3977_v51  ;;  %4158 = vrot.lane.b32.xlu0 %v4026_v57, %s5019_s25  ;;  %v3493_v61 = vmul.f32 %v7385_v10, %v3480_v56 }
 0x6bc   :  { %v4944_v0 = vpop.eup %4943  ;;  %v3458_v2 = vadd.f32 1e-05, %v3445_v28  ;;  %4156 = vrot.lane.b32.xlu1 %v4025_v14, %s5019_s25  ;;  %v3492_v19 = vmul.f32 %v7385_v10, %v3479_v27 }
 0x6bd   :  { %v3457_v34 = vadd.f32 1e-05, %v3444_v58  ;;  %v4946_v23 = vpop.eup %4945  ;;  %v3946_v15 = vpop.xlane.xlu0 %3945  ;;  %v3506_v63 = vadd.f32 %v7394_v6, %v3493_v61  ;;  %v4002_v47 = vmul.f32 %v4944_v0, %v7268_v1 }
 0x6be   :  { %v3943_v43 = vpop.xlane.xlu1 %3942  ;;  %4955 = vrsqrt.f32 %v3458_v2  ;;  %v3967_v24 = vmul.f32 0.125, %v3946_v15  ;;  %v4001_v41 = vmul.f32 %v4946_v23, %v7251_v53  ;;  %v3505_v42 = vadd.f32 %v7394_v6, %v3492_v19 }
 0x6bf   :  { %v3966_v46 = vmul.f32 0.125, %v3943_v43  ;;  %4957 = vrsqrt.f32 %v3457_v34  ;;  %4108 = vrot.lane.b32.xlu0 %v3506_v63, %s5018_s22  ;;  %v4015_v38 = vmul.f32 %v7385_v10, %v4002_v47 }
 0x6c0   :  { %v4948_v22 = vpop.eup %4947  ;;  %v3980_v51 = vadd.f32 1e-05, %v3967_v24  ;;  %v4014_v8 = vmul.f32 %v7385_v10, %v4001_v41  ;;  %4106 = vrot.lane.b32.xlu1 %v3505_v42, %s5018_s22 }
 0x6c1   :  { %v3979_v44 = vadd.f32 1e-05, %v3966_v46  ;;  %v4950_v21 = vpop.eup %4949  ;;  %v3428_v1 = vpop.xlane.xlu0 %3427  ;;  %v4028_v57 = vadd.f32 %v7394_v6, %v4015_v38  ;;  %v3482_v53 = vmul.f32 %v4948_v22, %v7281_v30 }
 0x6c2   :  { %v3425_v33 = vpop.xlane.xlu1 %3424  ;;  %4959 = vrsqrt.f32 %v3980_v51  ;;  %v3447_v56 = vmul.f32 0.125, %v3428_v1  ;;  %v4027_v58 = vadd.f32 %v7394_v6, %v4014_v8  ;;  %v3481_v61 = vmul.f32 %v4950_v21, %v7263_v60 }
 0x6c3   :  { %v3446_v28 = vmul.f32 0.125, %v3425_v33  ;;  %4961 = vrsqrt.f32 %v3979_v44  ;;  %4162 = vrot.lane.b32.xlu0 %v4028_v57, %s5019_s25  ;;  %v3495_v14 = vmul.f32 %v7385_v10, %v3482_v53 }
 0x6c4   :  { %v4952_v27 = vpop.eup %4951  ;;  %v3460_v0 = vadd.f32 1e-05, %v3447_v56  ;;  %4160 = vrot.lane.b32.xlu1 %v4027_v58, %s5019_s25  ;;  %v3494_v43 = vmul.f32 %v7385_v10, %v3481_v61 }
 0x6c5   :  { %v3459_v2 = vadd.f32 1e-05, %v3446_v28  ;;  %v4954_v34 = vpop.eup %4953  ;;  %v3952_v23 = vpop.xlane.xlu0 %3951  ;;  %v3508_v15 = vadd.f32 %v7394_v6, %v3495_v14  ;;  %v4004_v63 = vmul.f32 %v4952_v27, %v7291_v37 }
 0x6c6   :  { %v3949_v30 = vpop.xlane.xlu1 %3948  ;;  %4963 = vrsqrt.f32 %v3460_v0  ;;  %v3969_v19 = vmul.f32 0.125, %v3952_v23  ;;  %v4003_v24 = vmul.f32 %v4954_v34, %v7278_v45  ;;  %v3507_v60 = vadd.f32 %v7394_v6, %v3494_v43 }
 0x6c7   :  { %v3968_v47 = vmul.f32 0.125, %v3949_v30  ;;  %4965 = vrsqrt.f32 %v3459_v2  ;;  %4112 = vrot.lane.b32.xlu0 %v3508_v15, %s5018_s22  ;;  %v4017_v46 = vmul.f32 %v7385_v10, %v4004_v63 }
 0x6c8   :  { %v4956_v41 = vpop.eup %4955  ;;  %v3982_v42 = vadd.f32 1e-05, %v3969_v19  ;;  %v4016_v22 = vmul.f32 %v7385_v10, %v4003_v24  ;;  %4110 = vrot.lane.b32.xlu1 %v3507_v60, %s5018_s22 }
 0x6c9   :  { %v3981_v38 = vadd.f32 1e-05, %v3968_v47  ;;  %v4958_v51 = vpop.eup %4957  ;;  %v3434_v37 = vpop.xlane.xlu0 %3433  ;;  %v4030_v8 = vadd.f32 %v7394_v6, %v4017_v46  ;;  %v3484_v45 = vmul.f32 %v4956_v41, %v7304_v31 }
 0x6ca   :  { %v3431_v44 = vpop.xlane.xlu1 %3430  ;;  %4967 = vrsqrt.f32 %v3982_v42  ;;  %v3449_v21 = vmul.f32 0.125, %v3434_v37  ;;  %v4029_v33 = vadd.f32 %v7394_v6, %v4016_v22  ;;  %v3483_v53 = vmul.f32 %v4958_v51, %v7287_v40 }
 0x6cb   :  { %v3448_v1 = vmul.f32 0.125, %v3431_v44  ;;  %4969 = vrsqrt.f32 %v3981_v38  ;;  %4166 = vrot.lane.b32.xlu0 %v4030_v8, %s5019_s25  ;;  %v3497_v57 = vmul.f32 %v7385_v10, %v3484_v45 }
 0x6cc   :  { %v4960_v56 = vpop.eup %4959  ;;  %v3462_v28 = vadd.f32 1e-05, %v3449_v21  ;;  %4164 = vrot.lane.b32.xlu1 %v4029_v33, %s5019_s25  ;;  %v3496_v0 = vmul.f32 %v7385_v10, %v3483_v53 }
 0x6cd   :  { %v3461_v58 = vadd.f32 1e-05, %v3448_v1  ;;  %v4962_v14 = vpop.eup %4961  ;;  %v3958_v61 = vpop.xlane.xlu0 %3957  ;;  %v3510_v27 = vadd.f32 %v7394_v6, %v3497_v57  ;;  %v4006_v2 = vmul.f32 %v4960_v56, %v7317_v59 }
 0x6ce   :  { %v3955_v31 = vpop.xlane.xlu1 %3954  ;;  %4971 = vrsqrt.f32 %v3462_v28  ;;  %v3971_v34 = vmul.f32 0.125, %v3958_v61  ;;  %v4005_v30 = vmul.f32 %v4962_v14, %v7299_v18  ;;  %v3509_v40 = vadd.f32 %v7394_v6, %v3496_v0 }
 0x6cf   :  { %v3970_v23 = vmul.f32 0.125, %v3955_v31  ;;  %4973 = vrsqrt.f32 %v3461_v58  ;;  %4116 = vrot.lane.b32.xlu0 %v3510_v27, %s5018_s22  ;;  %v4019_v15 = vmul.f32 %v7385_v10, %v4006_v2 }
 0x6d0   :  { %v4964_v43 = vpop.eup %4963  ;;  %v3984_v63 = vadd.f32 1e-05, %v3971_v34  ;;  %v4018_v47 = vmul.f32 %v7385_v10, %v4005_v30  ;;  %4114 = vrot.lane.b32.xlu1 %v3509_v40, %s5018_s22 }
 0x6d1   :  { %v3983_v19 = vadd.f32 1e-05, %v3970_v23  ;;  %v4966_v24 = vpop.eup %4965  ;;  %v4032_v60 = vadd.f32 %v7394_v6, %v4019_v15  ;;  %v3486_v18 = vmul.f32 %v4964_v43, %v7327_v52 }
 0x6d2   :  { %v3437_v59 = vpop.xlane.xlu1 %3436  ;;  %4975 = vrsqrt.f32 %v3984_v63  ;;  %v4031_v41 = vadd.f32 %v7394_v6, %v4018_v47  ;;  %v3485_v38 = vmul.f32 %v4966_v24, %v7314_v39  ;;  %v2380_v63 = vmul.f32 0.125, %v7368_v9 }
 0x6d3   :  { %v3450_v46 = vmul.f32 0.125, %v3437_v59  ;;  %4170 = vrot.lane.b32.xlu0 %v4032_v60, %s5019_s25  ;;  %v3499_v42 = vmul.f32 %v7385_v10, %v3486_v18  ;;  %4977 = vrsqrt.f32 %v3983_v19  ;;  %v4053_v19 = vpop.permute.xlu0 %4052  ;;  %v2381_v47 = vmul.f32 0.125, %v7370_v25 }
 0x6d4   :  { %v4968_v22 = vpop.eup %4967  ;;  %4168 = vrot.lane.b32.xlu1 %v4031_v41, %s5019_s25  ;;  %v3498_v52 = vmul.f32 %v7385_v10, %v3485_v38  ;;  %v2383_v9 = vmul.f32 0.125, %v7389_v11 }
 0x6d5   :  { %v3463_v51 = vadd.f32 1e-05, %v3450_v46  ;;  %v4970_v37 = vpop.eup %4969  ;;  %v3512_v44 = vadd.f32 %v7394_v6, %v3499_v42  ;;  %v4008_v8 = vmul.f32 %v4968_v22, %v7340_v36  ;;  %v2394_v60 = vadd.f32 1e-05, %v2381_v47 }
 0x6d6   :  { %v4007_v45 = vmul.f32 %v4970_v37, %v7323_v54  ;;  %v3511_v21 = vadd.f32 %v7394_v6, %v3498_v52  ;;  %v4051_v43 = vpop.permute.xlu1 %4050  ;;  %v2382_v46 = vmul.f32 0.125, %v7380_v49  ;;  %v2396_v25 = vadd.f32 1e-05, %v2383_v9 }
 0x6d7   :  { %4979 = vrsqrt.f32 %v3463_v51  ;;  %4120 = vrot.lane.b32.xlu0 %v3512_v44, %s5018_s22  ;;  %v4021_v39 = vmul.f32 %v7385_v10, %v4008_v8  ;;  %v2384_v52 = vmul.f32 0.125, %v7401_v48  ;;  %v2386_v48 = vmul.f32 0.125, %v7416_v12 }
 0x6d8   :  { %v4972_v1 = vpop.eup %4971  ;;  %v4020_v33 = vmul.f32 %v7385_v10, %v4007_v45  ;;  %4118 = vrot.lane.b32.xlu1 %v3511_v21, %s5018_s22  ;;  %v2395_v22 = vadd.f32 1e-05, %v2382_v46  ;;  %v2385_v45 = vmul.f32 0.125, %v7403_v7  ;;  %v8103_v46 = vld [vmem:[#allocation3_spill] sm:$0xff] }
 0x6d9   :  { %v4974_v57 = vpop.eup %4973  ;;  %v4034_v53 = vadd.f32 %v7394_v6, %v4021_v39  ;;  %v3488_v56 = vmul.f32 %v4972_v1, %v7353_v3  ;;  %v2397_v39 = vadd.f32 1e-05, %v2384_v52  ;;  %v2399_v12 = vadd.f32 1e-05, %v2386_v48  ;;  %v8111_v48 = vld [vmem:[#allocation13_spill] sm:$0xff] }
 0x6da   :  { %v4033_v36 = vadd.f32 %v7394_v6, %v4020_v33  ;;  %v3487_v54 = vmul.f32 %v4974_v57, %v7335_v32  ;;  %v2398_v57 = vadd.f32 1e-05, %v2385_v45  ;;  %v2390_v9 = vmul.f32 0.125, %v8103_v46 }
 0x6db   :  { %4174 = vrot.lane.b32.xlu0 %v4034_v53, %s5019_s25  ;;  %v3501_v28 = vmul.f32 %v7385_v10, %v3488_v56 }
 0x6dc   :  { %v4976_v58 = vpop.eup %4975  ;;  %v3500_v14 = vmul.f32 %v7385_v10, %v3487_v54  ;;  %4172 = vrot.lane.b32.xlu1 %v4033_v36, %s5019_s25 }
 0x6dd   :  { %v3514_v61 = vadd.f32 %v7394_v6, %v3501_v28  ;;  %v4010_v31 = vmul.f32 %v4976_v58, %v7363_v29  ;;  %v4978_v27 = vpop.eup %4977  ;;  %v2387_v58 = vmul.f32 0.125, %v7420_v35  ;;  %v2388_v35 = vmul.f32 0.125, %v7425_v50 }
 0x6de   :  { %v3513_v3 = vadd.f32 %v7394_v6, %v3500_v14  ;;  %v4009_v23 = vmul.f32 %v4978_v27, %v7350_v4  ;;  %v2393_v4 = vadd.f32 1e-05, %v2380_v63 }
 0x6df   :  { %4124 = vrot.lane.b32.xlu0 %v3514_v61, %s5018_s22  ;;  %v4023_v32 = vmul.f32 %v7385_v10, %v4010_v31  ;;  %v2400_v27 = vadd.f32 1e-05, %v2387_v58  ;;  %v8114_v58 = vld [vmem:[#allocation14_spill] sm:$0xff] }
 0x6e0   :  { %4122 = vrot.lane.b32.xlu1 %v3513_v3, %s5018_s22  ;;  %v4022_v40 = vmul.f32 %v7385_v10, %v4009_v23  ;;  %4981 = vrsqrt.f32 %v2393_v4 }
 0x6e1   :  { %v4980_v0 = vpop.eup %4979  ;;  %v4036_v2 = vadd.f32 %v7394_v6, %v4023_v32  ;;  %4983 = vrsqrt.f32 %v2394_v60 }
 0x6e2   :  { %v3489_v34 = vmul.f32 %v4980_v0, %v7360_v5  ;;  %v4035_v15 = vadd.f32 %v7394_v6, %v4022_v40  ;;  %v7568_v5 = vpop.permute.xlu1 %4054  ;;  %4985 = vrsqrt.f32 %v2395_v22 }
 0x6e3   :  { %4178 = vrot.lane.b32.xlu0 %v4036_v2, %s5019_s25  ;;  %4987 = vrsqrt.f32 %v2396_v25 }
 0x6e4   :  { %v3502_v29 = vmul.f32 %v7385_v10, %v3489_v34  ;;  %4989 = vrsqrt.f32 %v2397_v39  ;;  %v2403_v39 = vadd.f32 1e-05, %v2390_v9 }
 0x6e5   :  { %4991 = vrsqrt.f32 %v2398_v57 }
 0x6e6   :  { %v3515_v30 = vadd.f32 %v7394_v6, %v3502_v29  ;;  %v7571_v24 = vpop.permute.xlu1 %4056  ;;  %4993 = vrsqrt.f32 %v2399_v12  ;;  %v8116_v12 = vld [vmem:[#allocation4_spill] sm:$0xff] }
 0x6e7   :  { %4995 = vrsqrt.f32 %v2400_v27 }
 0x6e8   :  { %4126 = vrot.lane.b32.xlu1 %v3515_v30, %s5018_s22 }
 0x6e9   :  { %v7573_v59 = vpop.permute.xlu0 %4058 }
 0x6ea   :  { %v4982_v38 = vpop.eup %4981 }
 0x6eb   :  { %v7575_v18 = vpop.permute.xlu1 %4060  ;;  %v2419_v37 = vmul.f32 %v4982_v38, %v7056_v13  ;;  %v4984_v21 = vpop.eup %4983  ;;  %v8104_v38 = vld [vmem:[#allocation12_spill] sm:$0xff] }
 0x6ec   :  { %4176 = vrot.lane.b32.xlu1 %v4035_v15, %s5019_s25  ;;  %v2420_v53 = vmul.f32 %v4984_v21, %v7075_v17  ;;  %v4986_v28 = vpop.eup %4985 }
 0x6ed   :  { %v2436_v8 = vmul.f32 %v7385_v10, %v2419_v37  ;;  %v4988_v17 = vpop.eup %4987  ;;  %v2421_v61 = vmul.f32 %v4986_v28, %v7088_v55  ;;  %v2389_v55 = vmul.f32 0.125, %v7427_v62 }
 0x6ee   :  { %v2437_v14 = vmul.f32 %v7385_v10, %v2420_v53  ;;  %v2422_v32 = vmul.f32 %v4988_v17, %v7093_v16  ;;  %v4990_v23 = vpop.eup %4989  ;;  %v2401_v16 = vadd.f32 1e-05, %v2388_v35 }
 0x6ef   :  { %v2453_v13 = vadd.f32 %v7394_v6, %v2436_v8  ;;  %v2438_v2 = vmul.f32 %v7385_v10, %v2421_v61  ;;  %v4992_v50 = vpop.eup %4991  ;;  %v2423_v63 = vmul.f32 %v4990_v23, %v7111_v20  ;;  %v2391_v61 = vmul.f32 0.125, %v8116_v12 }
 0x6f0   :  { %v2454_v3 = vadd.f32 %v7394_v6, %v2437_v14  ;;  %v2439_v40 = vmul.f32 %v7385_v10, %v2422_v32  ;;  %4997 = vrsqrt.f32 %v2401_v16  ;;  %v2424_v22 = vmul.f32 %v4992_v50, %v8104_v38  ;;  %v4994_v8 = vpop.eup %4993 }
 0x6f1   :  { %v4193_v56 = vsel %vm8094_vm15, %v2453_v13, %v4051_v43  ;;  %v2455_v43 = vadd.f32 %v7394_v6, %v2438_v2  ;;  %v2440_v37 = vmul.f32 %v7385_v10, %v2423_v63  ;;  %v4996_v57 = vpop.eup %4995  ;;  %vm8113_vm15 = vmmov %vm8098_vm7 }
 0x6f2   :  { %v4194_v0 = vsel %vm8098_vm7, %v2454_v3, %v4053_v19  ;;  %v2402_v19 = vadd.f32 1e-05, %v2389_v55  ;;  %v2456_v47 = vadd.f32 %v7394_v6, %v2439_v40  ;;  %v2441_v13 = vmul.f32 %v7385_v10, %v2424_v22  ;;  %v8121_v55 = vld [vmem:[#allocation15_spill] sm:$0xff] }
 0x6f3   :  { %v4195_v62 = vsel %vm8102_vm11, %v2455_v43, %v7568_v5  ;;  %v2457_v53 = vadd.f32 %v7394_v6, %v2440_v37  ;;  %v2426_v14 = vmul.f32 %v4996_v57, %v8114_v58  ;;  %v8124_v43 = vld [vmem:[#allocation16_spill] sm:$0xff]  ;;  %v8130_v37 = vld [vmem:[#allocation17_spill] sm:$0xff] }
 0x6f4   :  { %v4196_v45 = vsel %vm8107_vm13, %v2456_v47, %v7571_v24  ;;  %4999 = vrsqrt.f32 %v2402_v19 }
 0x6f5   :  { %5001 = vrsqrt.f32 %v2403_v39  ;;  %v2443_v2 = vmul.f32 %v7385_v10, %v2426_v14 }
 0x6f7   :  { %v2460_v50 = vadd.f32 %v7394_v6, %v2443_v2 }
 0x6fa   :  { %v4998_v32 = vpop.eup %4997 }
 0x6fb   :  { %v2427_v40 = vmul.f32 %v4998_v32, %v8121_v55 }
 0x6fd   :  { %v2444_v19 = vmul.f32 %v7385_v10, %v2427_v40 }
 0x6fe   :  { %v5000_v23 = vpop.eup %4999 }
 0x6ff   :  { %v2428_v63 = vmul.f32 %v5000_v23, %v8124_v43 }
 0x701   :  { %v7578_v41 = vpop.permute.xlu0 %4062  ;;  %v2445_v38 = vmul.f32 %v7385_v10, %v2428_v63 }
 0x703   :  { %v7581_v42 = vpop.permute.xlu1 %4064 }
 0x70d   :  { %v7583_v51 = vpop.permute.xlu0 %4066 }
 0x70f   :  { %v7586_v44 = vpop.permute.xlu1 %4068 }
 0x715   :  { %v7589_v49 = vpop.permute.xlu0 %4070 }
 0x717   :  { %v7592_v11 = vpop.permute.xlu1 %4072 }
 0x71d   :  { %v7595_v1 = vpop.permute.xlu0 %4074 }
 0x721   :  { %v4103_v33 = vpop.permute.xlu1 %4102 }
 0x722   :  { %v4206_v36 = vsel %vm8095_vm5, %v4193_v56, %v4103_v33  ;;  %v2425_v56 = vmul.f32 %v4994_v8, %v8111_v48  ;;  %vm8115_vm5 = vmmov %vm8105_vm2 }
 0x725   :  { %v4155_v54 = vpop.permute.xlu0 %4154 }
 0x726   :  { %v4219_v7 = vsel %vm8096_vm0, %v4206_v36, %v4155_v54  ;;  %v2392_v36 = vmul.f32 0.125, %v7440_v26  ;;  %v4197_v54 = vsel %vm8113_vm15, %v2457_v53, %v7573_v59  ;;  %v8134_v53 = vld [vmem:[#allocation19_spill] sm:$0xff] }
 0x727   :  { %4232 = vst.msk [vmem:[%s7753_s9] sm:$0xff] %vm8097_vm10, %v4219_v7  ;;  %v2458_v7 = vadd.f32 %v7394_v6, %v2441_v13  ;;  %vm8117_vm10 = vmmov %vm8098_vm7 }
 0x728   :  { %v2405_v26 = vadd.f32 1e-05, %v2392_v36  ;;  %vm8118_vm7 = vmmov %vm8101_vm8 }
 0x729   :  { %v4105_v31 = vpop.permute.xlu0 %4104  ;;  %v4198_v59 = vsel %vm8117_vm10, %v2458_v7, %v7575_v18  ;;  %vm8123_vm11 = vmmov %vm8117_vm10  ;;  %v5013_v7 = vld [vmem:[%s7752_s8] ss:$0 sm:$0xff] }
 0x72a   :  { %v4207_v29 = vsel %vm8099_vm9, %v4194_v0, %v4105_v31  ;;  %v2442_v31 = vmul.f32 %v7385_v10, %v2425_v56  ;;  %vm8119_vm9 = vmmov %vm8105_vm2  ;;  %5003 = vrsqrt.f32 %v2405_v26 }
 0x72b   :  { %vm8126_vm13 = vmmov %vm8117_vm10 }
 0x72c   :  { %v4200_v46 = vsel %vm8126_vm13, %v2460_v50, %v7581_v42  ;;  %vm8132_vm15 = vmmov %vm8117_vm10 }
 0x72d   :  { %v4159_v34 = vpop.permute.xlu0 %4158  ;;  %vm8141_vm13 = vmmov %vm8118_vm7 }
 0x72e   :  { %v4157_v30 = vpop.permute.xlu1 %4156 }
 0x72f   :  { %v4220_v15 = vsel %vm8100_vm6, %v4207_v29, %v4157_v30  ;;  %vm8120_vm6 = vmmov %vm8096_vm0  ;;  %v2404_v29 = vadd.f32 1e-05, %v2391_v61  ;;  %v2459_v30 = vadd.f32 %v7394_v6, %v2442_v31 }
 0x730   :  { %4233 = vst.msk [vmem:[%s7753_s9 + $0x8] sm:$0xff] %vm8101_vm8, %v4220_v15  ;;  %vm8122_vm8 = vmmov %vm8118_vm7 }
 0x731   :  { %v4109_v4 = vpop.permute.xlu0 %4108  ;;  %v4199_v15 = vsel %vm8123_vm11, %v2459_v30, %v7578_v41  ;;  %5005 = vrsqrt.f32 %v2404_v29  ;;  %vm8139_vm11 = vmmov %vm8117_vm10 }
 0x732   :  { %v4107_v60 = vpop.permute.xlu1 %4106  ;;  %v4209_v5 = vsel %vm8109_vm3, %v4196_v45, %v4109_v4  ;;  %vm8128_vm3 = vmmov %vm8105_vm2 }
 0x733   :  { %v4208_v25 = vsel %vm8105_vm2, %v4195_v62, %v4107_v60  ;;  %v5002_v60 = vpop.eup %5001 }
 0x734   :  { %v4221_v52 = vsel %vm8106_vm1, %v4208_v25, %v4159_v34  ;;  %vm8125_vm1 = vmmov %vm8096_vm0  ;;  %v2461_v25 = vadd.f32 %v7394_v6, %v2444_v19  ;;  %v5004_v45 = vpop.eup %5003 }
 0x735   :  { %v4163_v20 = vpop.permute.xlu0 %4162  ;;  %4234 = vst.msk [vmem:[%s7753_s9 + $0x10] sm:$0xff] %vm8108_vm12, %v4221_v52  ;;  %vm8127_vm12 = vmmov %vm8118_vm7  ;;  %v2429_v52 = vmul.f32 %v5002_v60, %v8130_v37  ;;  %v2431_v48 = vmul.f32 %v5004_v45, %v8134_v53 }
 0x736   :  { %v4161_v21 = vpop.permute.xlu1 %4160 }
 0x737   :  { %v4222_v33 = vsel %vm8110_vm4, %v4209_v5, %v4161_v21  ;;  %vm8129_vm4 = vmmov %vm8096_vm0  ;;  %v2462_v5 = vadd.f32 %v7394_v6, %v2445_v38  ;;  %v2446_v39 = vmul.f32 %v7385_v10, %v2429_v52  ;;  %v2448_v58 = vmul.f32 %v5013_v7, %v2431_v48 }
 0x738   :  { %4235 = vst.msk [vmem:[%s7753_s9 + $0x18] sm:$0xff] %vm8112_vm14, %v4222_v33  ;;  %vm8131_vm14 = vmmov %vm8118_vm7 }
 0x739   :  { %v4113_v24 = vpop.permute.xlu0 %4112  ;;  %v4202_v33 = vsel %vm8117_vm10, %v2462_v5, %v7586_v44  ;;  %v2463_v10 = vadd.f32 %v7394_v6, %v2446_v39  ;;  %v8138_v44 = vld [vmem:[#allocation18_spill] sm:$0xff] }
 0x73a   :  { %v4111_v28 = vpop.permute.xlu1 %4110  ;;  %v4211_v35 = vsel %vm8119_vm9, %v4198_v59, %v4113_v24  ;;  %vm8135_vm9 = vmmov %vm8105_vm2 }
 0x73b   :  { %v4210_v17 = vsel %vm8115_vm5, %v4197_v54, %v4111_v28  ;;  %vm8133_vm5 = vmmov %vm8105_vm2  ;;  %v4203_v28 = vsel %vm8139_vm11, %v2463_v10, %v7589_v49  ;;  %v5014_v49 = vld [vmem:[%s7752_s8 + $0x1] ss:$0 sm:$0xff] }
 0x73c   :  { %v4223_v27 = vsel %vm8096_vm0, %v4210_v17, %v4163_v20  ;;  %v4201_v20 = vsel %vm8132_vm15, %v2461_v25, %v7583_v51  ;;  %v5006_v51 = vpop.eup %5005  ;;  %v2465_v31 = vadd.f32 %v5014_v49, %v2448_v58  ;;  %vm8145_vm15 = vmmov %vm8117_vm10 }
 0x73d   :  { %v4167_v3 = vpop.permute.xlu0 %4166  ;;  %4236 = vst.msk [vmem:[%s7753_s9 + $0x20] sm:$0xff] %vm8118_vm7, %v4223_v27  ;;  %v2430_v54 = vmul.f32 %v5006_v51, %v8138_v44 }
 0x73e   :  { %v4165_v0 = vpop.permute.xlu1 %4164 }
 0x73f   :  { %v4224_v34 = vsel %vm8120_vm6, %v4211_v35, %v4165_v0  ;;  %vm8136_vm6 = vmmov %vm8096_vm0  ;;  %v2447_v61 = vmul.f32 %v5013_v7, %v2430_v54 }
 0x740   :  { %4237 = vst.msk [vmem:[%s7753_s9 + $0x28] sm:$0xff] %vm8122_vm8, %v4224_v34  ;;  %vm8137_vm8 = vmmov %vm8118_vm7 }
 0x741   :  { %v4117_v18 = vpop.permute.xlu0 %4116  ;;  %v2464_v32 = vadd.f32 %v5014_v49, %v2447_v61 }
 0x742   :  { %v4115_v16 = vpop.permute.xlu1 %4114  ;;  %v4213_v41 = vsel %vm8128_vm3, %v4200_v46, %v4117_v18  ;;  %vm4244_vm3 = vcmask 257024  }
 0x743   :  { %v4212_v4 = vsel %vm8105_vm2, %v4199_v15, %v4115_v16  ;;  %v4204_v0 = vsel %vm8145_vm15, %v2464_v32, %v7592_v11 }
 0x744   :  { %v4225_v62 = vsel %vm8125_vm1, %v4212_v4, %v4167_v3  ;;  %vm8140_vm1 = vmmov %vm8096_vm0 }
 0x745   :  { %v4171_v47 = vpop.permute.xlu0 %4170  ;;  %4238 = vst.msk [vmem:[%s7753_s9 + $0x30] sm:$0xff] %vm8127_vm12, %v4225_v62  ;;  %vm8142_vm12 = vmmov %vm8117_vm10 }
 0x746   :  { %v4169_v9 = vpop.permute.xlu1 %4168  ;;  %v4205_v27 = vsel %vm8142_vm12, %v2465_v31, %v7595_v1  ;;  %vm8147_vm10 = vmmov %vm8118_vm7 }
 0x747   :  { %v4226_v22 = vsel %vm8129_vm4, %v4213_v41, %v4169_v9  ;;  %vm8143_vm4 = vmmov %vm8105_vm2 }
 0x748   :  { %4239 = vst.msk [vmem:[%s7753_s9 + $0x38] sm:$0xff] %vm8131_vm14, %v4226_v22  ;;  %vm8144_vm14 = vmmov %vm8096_vm0 }
 0x749   :  { %v4121_v42 = vpop.permute.xlu0 %4120 }
 0x74a   :  { %v4119_v8 = vpop.permute.xlu1 %4118  ;;  %v4215_v56 = vsel %vm8135_vm9, %v4202_v33, %v4121_v42 }
 0x74b   :  { %v4214_v21 = vsel %vm8133_vm5, %v4201_v20, %v4119_v8  ;;  %vm8146_vm5 = vmmov %vm8105_vm2 }
 0x74c   :  { %v4227_v13 = vsel %vm8096_vm0, %v4214_v21, %v4171_v47 }
 0x74d   :  { %4240 = vst.msk [vmem:[%s7753_s9 + $0x40] sm:$0xff] %vm8118_vm7, %v4227_v13  ;;  %v4175_v57 = vpop.permute.xlu0 %4174 }
 0x74e   :  { %v4173_v24 = vpop.permute.xlu1 %4172 }
 0x74f   :  { %v4228_v36 = vsel %vm8136_vm6, %v4215_v56, %v4173_v24 }
 0x750   :  { %4241 = vst.msk [vmem:[%s7753_s9 + $0x48] sm:$0xff] %vm8137_vm8, %v4228_v36 }
 0x751   :  { %v4125_v17 = vpop.permute.xlu0 %4124 }
 0x752   :  { %v4123_v14 = vpop.permute.xlu1 %4122  ;;  %v4217_v2 = vsel %vm8146_vm5, %v4204_v0, %v4125_v17 }
 0x753   :  { %v4216_v12 = vsel %vm8105_vm2, %v4203_v28, %v4123_v14 }
 0x754   :  { %v4229_v6 = vsel %vm8140_vm1, %v4216_v12, %v4175_v57 }
 0x755   :  { %4242 = vst.msk [vmem:[%s7753_s9 + $0x50] sm:$0xff] %vm8141_vm13, %v4229_v6  ;;  %v4179_v26 = vpop.permute.xlu0 %4178 }
 0x75a   :  { %v4127_v3 = vpop.permute.xlu1 %4126 }
 0x75b   :  { %v4218_v59 = vsel %vm8143_vm4, %v4205_v27, %v4127_v3 }
 0x75c   :  { %v4231_v35 = vsel %vm8144_vm14, %v4218_v59, %v4179_v26 }
 0x75d   :  { %4245 = vst.msk [vmem:[%s7753_s9 + $0x60] sm:$0xf] %vm4244_vm3, %v4231_v35 }
 0x75e   :  { %v4177_v34 = vpop.permute.xlu1 %4176 }
 0x75f   :  { %v4230_v1 = vsel %vm8096_vm0, %v4217_v2, %v4177_v34 }
 0x760   :  { %4243 = vst.msk [vmem:[%s7753_s9 + $0x58] sm:$0xff] %vm8147_vm10, %v4230_v1 }

</bundles_post_ra>
